<compile_context>
chip_gen: v7x
topology: tpu7x:2x2x1
jax: 0.10.0
libtpu: 0.0.40
codegen_flags: <defaults>
</compile_context>

<pallas_src>
import functools

import jax
import jax.numpy as jnp
from jax.experimental import pallas as pl
from jax.experimental.pallas import tpu as pltpu


# --------------------------- 3x3 conv + BN + ReLU ----------------------------

def conv3x3_bn_relu_kernel(x_ref, top_ref, bot_ref, w_ref, scale_ref, bias_ref,
                           o_ref, xpad_ref):
    # x_ref:    (1, BH, W, Cin)   row band of the image (no halo)
    # top_ref:  (1, 1, W, Cin)    image row just above the band (clamped index)
    # bot_ref:  (1, 1, W, Cin)    image row just below the band (clamped index)
    # w_ref:    (3, 3*Cin, Cout)  per-dx weight slabs, dy stacked along K
    # scale/bias: (1, Cout)       folded BatchNorm affine (f32)
    # o_ref:    (1, BH, W, Cout)
    # xpad_ref: VMEM scratch (BH+2, Wp, Cin); band rows live at [1, BH+1),
    #           image cols at [2, W+2); col 1 / col W+2 are the zero halo.
    BH, W, Cout = o_ref.shape[1], o_ref.shape[2], o_ref.shape[3]
    Cin = x_ref.shape[3]
    Wp = xpad_ref.shape[1]
    R = BH * Wp
    b = pl.program_id(1)
    nb = pl.num_programs(1)

    # Zero only the halo / padding columns (left cols [0,2), right [W+2, Wp));
    # the interior is fully rewritten every step, so the old full-scratch fill
    # (pure vst work on the critical path) is gone.  Zeroing these columns
    # every step keeps this correct under megacore grid sharding.
    xpad_ref[:, 0:2, :] = jnp.zeros((BH + 2, 2, Cin), xpad_ref.dtype)
    xpad_ref[:, W + 2:Wp, :] = jnp.zeros((BH + 2, Wp - W - 2, Cin), xpad_ref.dtype)

    # Band interior + top/bottom halo rows (zero at the image border).
    xpad_ref[1:BH + 1, 2:W + 2, :] = x_ref[0]
    top = jnp.where(b > 0, top_ref[0], jnp.zeros_like(top_ref[0]))
    bot = jnp.where(b < nb - 1, bot_ref[0], jnp.zeros_like(bot_ref[0]))
    xpad_ref[0:1, 2:W + 2, :] = top
    xpad_ref[BH + 1:BH + 2, 2:W + 2, :] = bot

    # dy-stacked operand (R, 3*Cin): turns 9 K=Cin matmuls into 3 K=3*Cin
    # matmuls (fills the MXU contraction depth for narrow stages); every
    # matmul operand stays a contiguous full-width row band (Wp % 8 == 0
    # keeps the reshape layout-preserving).
    stacked = jnp.concatenate(
        [xpad_ref[dy:dy + BH, :, :].reshape(R, Cin) for dy in range(3)], axis=-1)

    # Single live f32 accumulator: each dx partial is folded into y (via its
    # static column shift) before the next dx GEMM is issued.
    y = None
    for dx in range(3):
        acc = jnp.dot(stacked, w_ref[dx], preferred_element_type=jnp.float32)
        acc = acc.reshape(BH, Wp, Cout)[:, 1 + dx:1 + dx + W, :]
        y = acc if y is None else y + acc

    y = y * scale_ref[...].reshape(1, 1, Cout) + bias_ref[...].reshape(1, 1, Cout)
    o_ref[0] = jnp.maximum(y, 0.0).astype(o_ref.dtype)


def _pick_band_rows(h, max_rows):
    best = 1
    for cand in range(1, min(h, max_rows) + 1):
        if h % cand == 0:
            best = cand
    if best == 1 and h > max_rows:
        return h          # prime H: whole image rather than degenerate 1-row bands
    return best


def conv3x3_bn_relu(x, w, scale, bias, *, max_band_rows=8,
                    vmem_limit_bytes=64 * 1024 * 1024):
    # x: (N, H, W, Cin) NHWC, w: (3, 3, Cin, Cout) HWIO (channel-padded).
    N, H, W, Cin = x.shape
    Cout = w.shape[-1]
    BH = _pick_band_rows(H, max_band_rows)
    NB = H // BH
    # columns: [0] unused, [1] left halo, [2, W+2) image, [W+2] right halo
    Wp = ((W + 3) + 7) // 8 * 8
    # per-dx weight slabs with dy stacked along K: wf[dx, dy*Cin + c, co]
    wf = jnp.transpose(w, (1, 0, 2, 3)).reshape(3, 3 * Cin, Cout).astype(x.dtype)
    return pl.pallas_call(
        conv3x3_bn_relu_kernel,
        out_shape=jax.ShapeDtypeStruct((N, H, W, Cout), x.dtype),
        grid=(N, NB),
        in_specs=[
            pl.BlockSpec((1, BH, W, Cin), lambda n, b: (n, b, 0, 0)),
            pl.BlockSpec((1, 1, W, Cin),
                         lambda n, b: (n, jnp.maximum(b * BH - 1, 0), 0, 0)),
            pl.BlockSpec((1, 1, W, Cin),
                         lambda n, b: (n, jnp.minimum(b * BH + BH, H - 1), 0, 0)),
            pl.BlockSpec((3, 3 * Cin, Cout), lambda n, b: (0, 0, 0)),
            pl.BlockSpec((1, Cout), lambda n, b: (0, 0)),
            pl.BlockSpec((1, Cout), lambda n, b: (0, 0)),
        ],
        out_specs=pl.BlockSpec((1, BH, W, Cout), lambda n, b: (n, b, 0, 0)),
        scratch_shapes=[pltpu.VMEM((BH + 2, Wp, Cin), x.dtype)],
        compiler_params=pltpu.CompilerParams(
            dimension_semantics=("parallel", "parallel"),
            vmem_limit_bytes=vmem_limit_bytes),
    )(x, x, x, wf,
      scale.reshape(1, Cout).astype(jnp.float32),
      bias.reshape(1, Cout).astype(jnp.float32))


# ----------------- concat-free 1x1 aggregation conv + BN + ReLU --------------

def make_agg_kernel(num_inputs, offsets):
    def kernel(*refs):
        x_refs = refs[:num_inputs]
        w_ref = refs[num_inputs]
        scale_ref = refs[num_inputs + 1]
        bias_ref = refs[num_inputs + 2]
        o_ref = refs[num_inputs + 3]
        cat_ref = refs[num_inputs + 4]
        # Gather branch tiles into one (tm, total_ch) VMEM slab (vst work that
        # hides under the GEMM) and issue a single wide-K GEMM per row tile;
        # the concatenated activation never exists in HBM.
        for i in range(num_inputs):
            ci = x_refs[i].shape[-1]
            cat_ref[:, offsets[i]:offsets[i] + ci] = x_refs[i][...]
        acc = jnp.dot(cat_ref[...], w_ref[...], preferred_element_type=jnp.float32)
        y = acc * scale_ref[...] + bias_ref[...]
        o_ref[...] = jnp.maximum(y, 0.0).astype(o_ref.dtype)
    return kernel


def aggregation_conv1x1(xs, w, scale, bias, *, tile_rows=512,
                        vmem_limit_bytes=64 * 1024 * 1024):
    # xs: list of NHWC branch maps (the would-be torch.cat inputs).
    # w:  (total_ch, Cout) 1x1 conv weight, rows ordered like xs.
    N, H, W, _ = xs[0].shape
    total_ch, Cout = w.shape
    assert sum(x.shape[-1] for x in xs) == total_ch
    M = N * H * W
    dtype = xs[0].dtype
    item = jnp.dtype(dtype).itemsize
    # Budget: 2x input bufs + cat scratch + 2x output bufs + resident weight
    # must stay inside scoped VMEM (v7x has only 64 MiB physical per core).
    budget = vmem_limit_bytes // 2 - total_ch * Cout * item
    per_row = (3 * total_ch + 2 * Cout) * item
    tm = min(tile_rows, M, max(8, budget // max(per_row, 1)))
    if tm < M:
        tm = max(8, (tm // 8) * 8)
    offsets, off = [], 0
    for x in xs:
        offsets.append(off)
        off += x.shape[-1]
    xf = [x.reshape(M, x.shape[-1]) for x in xs]
    in_specs = ([pl.BlockSpec((tm, x.shape[-1]), lambda m: (m, 0)) for x in xf]
                + [pl.BlockSpec((total_ch, Cout), lambda m: (0, 0)),
                   pl.BlockSpec((1, Cout), lambda m: (0, 0)),
                   pl.BlockSpec((1, Cout), lambda m: (0, 0))])
    y = pl.pallas_call(
        make_agg_kernel(len(xs), tuple(offsets)),
        out_shape=jax.ShapeDtypeStruct((M, Cout), dtype),
        grid=(pl.cdiv(M, tm),),
        in_specs=in_specs,
        out_specs=pl.BlockSpec((tm, Cout), lambda m: (m, 0)),
        scratch_shapes=[pltpu.VMEM((tm, total_ch), dtype)],
        compiler_params=pltpu.CompilerParams(
            dimension_semantics=("parallel",),
            vmem_limit_bytes=vmem_limit_bytes),
    )(*xf, w.astype(dtype),
      scale.reshape(1, Cout).astype(jnp.float32),
      bias.reshape(1, Cout).astype(jnp.float32))
    return y.reshape(N, H, W, Cout)


# --------------------------- ESE attention -----------------------------------

def _ese_body(x_ref, idn_ref, w_ref, b_ref, o_ref):
    C = x_ref.shape[3]
    x = x_ref[0]                                                  # (H, W, C) native dtype
    # Pool in f32 on the reduction only; no whole-image f32 upcast and no
    # (H, W, C) -> (H*W, C) reshape (which would relayout when W % 8 != 0).
    pooled = jnp.mean(x, axis=(0, 1), keepdims=True,
                      dtype=jnp.float32).reshape(1, C)            # (1, C) f32
    s = jnp.dot(pooled.astype(w_ref.dtype), w_ref[...],
                preferred_element_type=jnp.float32) + b_ref[...]
    gate = jax.nn.sigmoid(s).astype(x.dtype).reshape(1, 1, C)
    y = x * gate                                                  # native dtype
    if idn_ref is not None:
        y = y + idn_ref[0]
    o_ref[0] = y.astype(o_ref.dtype)


def make_ese_kernel(add_identity):
    if add_identity:
        def kernel(x_ref, idn_ref, w_ref, b_ref, o_ref):
            _ese_body(x_ref, idn_ref, w_ref, b_ref, o_ref)
    else:
        def kernel(x_ref, w_ref, b_ref, o_ref):
            _ese_body(x_ref, None, w_ref, b_ref, o_ref)
    return kernel


def ese_module(x, idn, w, b, add_identity, *, vmem_limit_bytes=32 * 1024 * 1024):
    # x: (N, H, W, C) output of the aggregation conv.  The identity stream is
    # only DMA'd into the kernel when add_identity=True.
    # TODO(synk): v7x split-ESE (pool emitted by the aggregation kernel + tiny
    #             gate kernel + row-tiled apply) for very large feature maps.
    N, H, W, C = x.shape
    dtype = x.dtype
    in_specs = [pl.BlockSpec((1, H, W, C), lambda n: (n, 0, 0, 0))]
    args = [x]
    if add_identity:
        assert idn.shape[-1] == C, "identity=True requires in_ch == out_ch"
        in_specs.append(pl.BlockSpec((1, H, W, C), lambda n: (n, 0, 0, 0)))
        args.append(idn)
    in_specs += [pl.BlockSpec((C, C), lambda n: (0, 0)),
                 pl.BlockSpec((1, C), lambda n: (0, 0))]
    args += [w.astype(dtype), b.reshape(1, C).astype(jnp.float32)]
    return pl.pallas_call(
        make_ese_kernel(add_identity),
        out_shape=jax.ShapeDtypeStruct((N, H, W, C), dtype),
        grid=(N,),
        in_specs=in_specs,
        out_specs=pl.BlockSpec((1, H, W, C), lambda n: (n, 0, 0, 0)),
        compiler_params=pltpu.CompilerParams(
            dimension_semantics=("parallel",),
            vmem_limit_bytes=vmem_limit_bytes),
    )(*args)


# --------------------------- parameters --------------------------------------

def _bn_fold(gamma, beta, mean, var, eps=1e-5):
    scale = gamma / jnp.sqrt(var + eps)
    bias = beta - mean * scale
    return scale, bias


def make_hg_block_params(key, in_ch, mid_ch, out_ch, layer_num):
    keys = iter(jax.random.split(key, 8 * (layer_num + 3)))

    def conv_bn(cin, cout, k):
        w = jax.random.normal(next(keys), (k, k, cin, cout), jnp.float32) * (0.2 / (k * k))
        gamma = 1.0 + 0.1 * jax.random.normal(next(keys), (cout,), jnp.float32)
        beta = 0.1 * jax.random.normal(next(keys), (cout,), jnp.float32)
        mean = 0.1 * jax.random.normal(next(keys), (cout,), jnp.float32)
        var = 1.0 + 0.1 * jnp.abs(jax.random.normal(next(keys), (cout,), jnp.float32))
        scale, bias = _bn_fold(gamma, beta, mean, var)
        return {"w": w, "scale": scale, "bias": bias}

    layers = [conv_bn(in_ch, mid_ch, 3)]
    for _ in range(layer_num - 1):
        layers.append(conv_bn(mid_ch, mid_ch, 3))

    total_ch = in_ch + layer_num * mid_ch
    agg = conv_bn(total_ch, out_ch, 1)
    agg["w"] = agg["w"].reshape(total_ch, out_ch)      # 1x1 conv as GEMM weight

    # ESE 1x1 conv (with bias), stored input-major: pooled(1,C) @ W(C,C) + b
    ese_w = 0.1 * jax.random.normal(next(keys), (out_ch, out_ch), jnp.float32)
    ese_b = 0.1 * jax.random.normal(next(keys), (out_ch,), jnp.float32)
    return {"layers": layers, "agg": agg, "ese_w": ese_w, "ese_b": ese_b}


# --------------------------- HG_Block forward ---------------------------------

def _round_up(c, m):
    return -(-c // m) * m


def hg_block_forward(x_nchw, params, identity=False, compute_dtype=jnp.float32,
                     channel_multiple=128, max_band_rows=8):
    # x_nchw: (N, C_in, H, W) -> (N, C_out, H, W)
    cm = channel_multiple
    x = jnp.transpose(x_nchw, (0, 2, 3, 1)).astype(compute_dtype)   # NCHW -> NHWC
    in_ch = x.shape[-1]
    in_ch_p = _round_up(in_ch, cm)
    # Channel padding to a lane multiple: padded channels are exactly zero all
    # the way through (zero weight rows/cols + zero folded-BN scale/bias), so
    # results are unchanged while every kernel store stays lane-dense.
    x = jnp.pad(x, ((0, 0), (0, 0), (0, 0), (0, in_ch_p - in_ch)))
    idn = x
    outputs = [x]
    cur = x
    for lp in params["layers"]:
        w = lp["w"]
        cin, cout = w.shape[2], w.shape[3]
        cin_p, cout_p = _round_up(cin, cm), _round_up(cout, cm)
        w_p = jnp.pad(w, ((0, 0), (0, 0), (0, cin_p - cin), (0, cout_p - cout)))
        s_p = jnp.pad(lp["scale"], (0, cout_p - cout))
        b_p = jnp.pad(lp["bias"], (0, cout_p - cout))
        cur = conv3x3_bn_relu(cur, w_p, s_p, b_p, max_band_rows=max_band_rows)
        outputs.append(cur)

    # torch.cat(dim=1) + 1x1 conv, fused: the 1x1 weight rows are re-stacked
    # (with zero padding) to line up with the padded branch channel widths;
    # the concatenated activation is never materialized in HBM.
    agg = params["agg"]
    w_full = agg["w"]
    out_ch = w_full.shape[1]
    out_ch_p = _round_up(out_ch, cm)
    branch_c = [in_ch] + [lp["w"].shape[3] for lp in params["layers"]]
    w_blocks, off = [], 0
    for ci in branch_c:
        blk = w_full[off:off + ci, :]
        blk = jnp.pad(blk, ((0, _round_up(ci, cm) - ci), (0, out_ch_p - out_ch)))
        w_blocks.append(blk)
        off += ci
    w_cat = jnp.concatenate(w_blocks, axis=0)
    agg_s = jnp.pad(agg["scale"], (0, out_ch_p - out_ch))
    agg_b = jnp.pad(agg["bias"], (0, out_ch_p - out_ch))
    y = aggregation_conv1x1(outputs, w_cat, agg_s, agg_b)

    ese_w = jnp.pad(params["ese_w"],
                    ((0, out_ch_p - out_ch), (0, out_ch_p - out_ch)))
    ese_b = jnp.pad(params["ese_b"], (0, out_ch_p - out_ch))
    y = ese_module(y, idn if identity else None, ese_w, ese_b, identity)
    y = y[..., :out_ch]
    return jnp.transpose(y, (0, 3, 1, 2))                            # NHWC -> NCHW


# --------------------------- pure-JAX reference -------------------------------

def ref_forward(x_nchw, params, identity=False):
    x = jnp.transpose(x_nchw, (0, 2, 3, 1))
    idn = x
    outs = [x]
    cur = x
    for lp in params["layers"]:
        y = jax.lax.conv_general_dilated(
            cur, lp["w"], (1, 1), "SAME",
            dimension_numbers=("NHWC", "HWIO", "NHWC"))
        cur = jnp.maximum(y * lp["scale"] + lp["bias"], 0.0)
        outs.append(cur)
    cat = jnp.concatenate(outs, axis=-1)
    agg = params["agg"]
    y = jnp.maximum((cat @ agg["w"]) * agg["scale"] + agg["bias"], 0.0)
    pooled = jnp.mean(y, axis=(1, 2), keepdims=True)
    gate = jax.nn.sigmoid(pooled @ params["ese_w"] + params["ese_b"])
    out = y * gate
    if identity:
        out = out + idn
    return jnp.transpose(out, (0, 3, 1, 2))


# --------------------------- main ---------------------------------------------

if __name__ == "__main__":
    key = jax.random.PRNGKey(0)
    kx, kp = jax.random.split(key)

    # small synthetic config: identity=True requires in_ch == out_ch
    N, in_ch, H, W = 2, 8, 16, 16
    mid_ch, out_ch, layer_num = 8, 8, 2

    x = jax.random.normal(kx, (N, in_ch, H, W), jnp.float32)
    params = make_hg_block_params(kp, in_ch, mid_ch, out_ch, layer_num)

    ref_id = ref_forward(x, params, identity=True)
    ref_noid = ref_forward(x, params, identity=False)

    # float32 path, identity=True (H=16 with 8-row bands exercises the halo path)
    fwd_id = jax.jit(functools.partial(hg_block_forward, identity=True))
    out = jax.block_until_ready(fwd_id(x, params))
    assert out.shape == (N, out_ch, H, W)
    err = float(jnp.max(jnp.abs(out - ref_id)))
    assert jnp.allclose(out, ref_id, atol=1e-4, rtol=1e-4), f"max_err={err}"

    # float32 path, identity=False (ESE kernel without the extra idn stream)
    fwd_noid = jax.jit(functools.partial(hg_block_forward, identity=False))
    out2 = jax.block_until_ready(fwd_noid(x, params))
    err2 = float(jnp.max(jnp.abs(out2 - ref_noid)))
    assert jnp.allclose(out2, ref_noid, atol=1e-4, rtol=1e-4), f"max_err={err2}"

    # bf16 activations/weights, f32 accumulation (loose normalized check)
    fwd_bf16 = jax.jit(functools.partial(
        hg_block_forward, identity=True, compute_dtype=jnp.bfloat16))
    out_bf16 = jax.block_until_ready(fwd_bf16(x, params)).astype(jnp.float32)
    rel = float(jnp.max(jnp.abs(out_bf16 - ref_id)) /
                (jnp.max(jnp.abs(ref_id)) + 1e-6))
    assert rel < 0.1, f"bf16 normalized err={rel}"

    print("KERNEL_OK")
</pallas_src>

<mosaic_0001>
module attributes {stable_mosaic.version = 11 : i64} {
  func.func @conv3x3_bn_relu_kernel(%arg0: i32, %arg1: i32, %arg2: memref<1x8x16x128xf32, #tpu.memory_space<vmem>>, %arg3: memref<1x1x16x128xf32, #tpu.memory_space<vmem>>, %arg4: memref<1x1x16x128xf32, #tpu.memory_space<vmem>>, %arg5: memref<3x384x128xf32, #tpu.memory_space<vmem>>, %arg6: memref<1x128xf32, #tpu.memory_space<vmem>>, %arg7: memref<1x128xf32, #tpu.memory_space<vmem>>, %arg8: memref<1x8x16x128xf32, #tpu.memory_space<vmem>>, %arg9: memref<10x24x128xf32, #tpu.memory_space<vmem>>) attributes {dimension_semantics = [#tpu.dimension_semantics<parallel>, #tpu.dimension_semantics<parallel>], iteration_bounds = array<i64: 2, 2>, scalar_prefetch = 0 : i64, scratch_operands = 1 : i64, tpu.core_type = #tpu.core_type<tc>, window_params = [{transform_indices = @transform_0, window_bounds = array<i64: 1, 8, 16, 128>}, {transform_indices = @transform_1, window_bounds = array<i64: 1, 1, 16, 128>}, {transform_indices = @transform_2, window_bounds = array<i64: 1, 1, 16, 128>}, {pipeline_mode = #tpu.pipeline_mode<synchronous>, transform_indices = @transform_3, window_bounds = array<i64: 3, 384, 128>}, {pipeline_mode = #tpu.pipeline_mode<synchronous>, transform_indices = @transform_4, window_bounds = array<i64: 1, 128>}, {pipeline_mode = #tpu.pipeline_mode<synchronous>, transform_indices = @transform_5, window_bounds = array<i64: 1, 128>}, {transform_indices = @transform_6, window_bounds = array<i64: 1, 8, 16, 128>}]} {
    %cst = arith.constant 0.000000e+00 : f32
    %0 = vector.broadcast %cst : f32 to vector<10x2x128xf32>
    %c0 = arith.constant 0 : index
    %c0_0 = arith.constant 0 : index
    %c0_1 = arith.constant 0 : index
    %1 = vector.load %arg9[%c0, %c0_0, %c0_1] : memref<10x24x128xf32, #tpu.memory_space<vmem>>, vector<10x2x128xf32>
    tpu.vector_store %arg9[%c0, %c0_0, %c0_1], %0 {strides = array<i32>} : memref<10x24x128xf32, #tpu.memory_space<vmem>>, vector<10x2x128xf32>,
    %cst_2 = arith.constant 0.000000e+00 : f32
    %2 = vector.broadcast %cst_2 : f32 to vector<10x6x128xf32>
    %c0_3 = arith.constant 0 : index
    %c18 = arith.constant 18 : index
    %c0_4 = arith.constant 0 : index
    %3 = vector.load %arg9[%c0_3, %c18, %c0_4] : memref<10x24x128xf32, #tpu.memory_space<vmem>>, vector<10x6x128xf32>
    tpu.vector_store %arg9[%c0_3, %c18, %c0_4], %2 {strides = array<i32>} : memref<10x24x128xf32, #tpu.memory_space<vmem>>, vector<10x6x128xf32>,
    %c0_5 = arith.constant 0 : index
    %c0_6 = arith.constant 0 : index
    %c0_7 = arith.constant 0 : index
    %c0_8 = arith.constant 0 : index
    %4 = vector.load %arg2[%c0_5, %c0_6, %c0_7, %c0_8] : memref<1x8x16x128xf32, #tpu.memory_space<vmem>>, vector<1x8x16x128xf32>
    %5 = vector.shape_cast %4 : vector<1x8x16x128xf32> to vector<8x16x128xf32>
    %c1 = arith.constant 1 : index
    %c2 = arith.constant 2 : index
    %c0_9 = arith.constant 0 : index
    %6 = vector.load %arg9[%c1, %c2, %c0_9] : memref<10x24x128xf32, #tpu.memory_space<vmem>>, vector<8x16x128xf32>
    tpu.vector_store %arg9[%c1, %c2, %c0_9], %5 {strides = array<i32>} : memref<10x24x128xf32, #tpu.memory_space<vmem>>, vector<8x16x128xf32>,
    %c0_i32 = arith.constant 0 : i32
    %7 = arith.cmpi sgt, %arg1, %c0_i32 : i32
    %c0_10 = arith.constant 0 : index
    %c0_11 = arith.constant 0 : index
    %c0_12 = arith.constant 0 : index
    %c0_13 = arith.constant 0 : index
    %8 = vector.load %arg3[%c0_10, %c0_11, %c0_12, %c0_13] : memref<1x1x16x128xf32, #tpu.memory_space<vmem>>, vector<1x1x16x128xf32>
    %9 = vector.shape_cast %8 : vector<1x1x16x128xf32> to vector<1x16x128xf32>
    %cst_14 = arith.constant 0.000000e+00 : f32
    %10 = vector.broadcast %cst_14 : f32 to vector<1x16x128xf32>
    %11 = arith.select %7, %9, %10 : vector<1x16x128xf32>
    %c1_i32 = arith.constant 1 : i32
    %12 = arith.cmpi slt, %arg1, %c1_i32 : i32
    %c0_15 = arith.constant 0 : index
    %c0_16 = arith.constant 0 : index
    %c0_17 = arith.constant 0 : index
    %c0_18 = arith.constant 0 : index
    %13 = vector.load %arg4[%c0_15, %c0_16, %c0_17, %c0_18] : memref<1x1x16x128xf32, #tpu.memory_space<vmem>>, vector<1x1x16x128xf32>
    %14 = vector.shape_cast %13 : vector<1x1x16x128xf32> to vector<1x16x128xf32>
    %cst_19 = arith.constant 0.000000e+00 : f32
    %15 = vector.broadcast %cst_19 : f32 to vector<1x16x128xf32>
    %16 = arith.select %12, %14, %15 : vector<1x16x128xf32>
    %c0_20 = arith.constant 0 : index
    %c2_21 = arith.constant 2 : index
    %c0_22 = arith.constant 0 : index
    %17 = vector.load %arg9[%c0_20, %c2_21, %c0_22] : memref<10x24x128xf32, #tpu.memory_space<vmem>>, vector<1x16x128xf32>
    tpu.vector_store %arg9[%c0_20, %c2_21, %c0_22], %11 {strides = array<i32>} : memref<10x24x128xf32, #tpu.memory_space<vmem>>, vector<1x16x128xf32>,
    %c9 = arith.constant 9 : index
    %c2_23 = arith.constant 2 : index
    %c0_24 = arith.constant 0 : index
    %18 = vector.load %arg9[%c9, %c2_23, %c0_24] : memref<10x24x128xf32, #tpu.memory_space<vmem>>, vector<1x16x128xf32>
    tpu.vector_store %arg9[%c9, %c2_23, %c0_24], %16 {strides = array<i32>} : memref<10x24x128xf32, #tpu.memory_space<vmem>>, vector<1x16x128xf32>,
    %c0_25 = arith.constant 0 : index
    %c0_26 = arith.constant 0 : index
    %c0_27 = arith.constant 0 : index
    %19 = vector.load %arg9[%c0_25, %c0_26, %c0_27] : memref<10x24x128xf32, #tpu.memory_space<vmem>>, vector<8x24x128xf32>
    %20 = vector.shape_cast %19 : vector<8x24x128xf32> to vector<192x128xf32>
    %c1_28 = arith.constant 1 : index
    %c0_29 = arith.constant 0 : index
    %c0_30 = arith.constant 0 : index
    %21 = vector.load %arg9[%c1_28, %c0_29, %c0_30] : memref<10x24x128xf32, #tpu.memory_space<vmem>>, vector<8x24x128xf32>
    %22 = vector.shape_cast %21 : vector<8x24x128xf32> to vector<192x128xf32>
    %c2_31 = arith.constant 2 : index
    %c0_32 = arith.constant 0 : index
    %c0_33 = arith.constant 0 : index
    %23 = vector.load %arg9[%c2_31, %c0_32, %c0_33] : memref<10x24x128xf32, #tpu.memory_space<vmem>>, vector<8x24x128xf32>
    %24 = vector.shape_cast %23 : vector<8x24x128xf32> to vector<192x128xf32>
    %25 = tpu.concatenate %20, %22, %24 in 1 : vector<192x128xf32>, vector<192x128xf32>, vector<192x128xf32> -> vector<192x384xf32>
    %c0_34 = arith.constant 0 : index
    %c0_35 = arith.constant 0 : index
    %c0_36 = arith.constant 0 : index
    %26 = vector.load %arg5[%c0_34, %c0_35, %c0_36] : memref<3x384x128xf32, #tpu.memory_space<vmem>>, vector<1x384x128xf32>
    %27 = vector.shape_cast %26 : vector<1x384x128xf32> to vector<384x128xf32>
    %cst_37 = arith.constant dense<0.000000e+00> : vector<192x128xf32>
    %28 = tpu.matmul %25, %27, %cst_37 {dimension_numbers = #tpu.dot_dimension_numbers<[1], [0], [0], [1], [0, 0, 1, 1], [], []>} : vector<192x384xf32>, vector<384x128xf32>, vector<192x128xf32> -> vector<192x128xf32>
    %29 = vector.shape_cast %28 : vector<192x128xf32> to vector<8x24x128xf32>
    %30 = vector.extract_strided_slice %29 {offsets = [0, 1, 0], sizes = [8, 16, 128], strides = [1, 1, 1]} : vector<8x24x128xf32> to vector<8x16x128xf32>
    %c1_38 = arith.constant 1 : index
    %c0_39 = arith.constant 0 : index
    %c0_40 = arith.constant 0 : index
    %31 = vector.load %arg5[%c1_38, %c0_39, %c0_40] : memref<3x384x128xf32, #tpu.memory_space<vmem>>, vector<1x384x128xf32>
    %32 = vector.shape_cast %31 : vector<1x384x128xf32> to vector<384x128xf32>
    %cst_41 = arith.constant dense<0.000000e+00> : vector<192x128xf32>
    %33 = tpu.matmul %25, %32, %cst_41 {dimension_numbers = #tpu.dot_dimension_numbers<[1], [0], [0], [1], [0, 0, 1, 1], [], []>} : vector<192x384xf32>, vector<384x128xf32>, vector<192x128xf32> -> vector<192x128xf32>
    %34 = vector.shape_cast %33 : vector<192x128xf32> to vector<8x24x128xf32>
    %35 = vector.extract_strided_slice %34 {offsets = [0, 2, 0], sizes = [8, 16, 128], strides = [1, 1, 1]} : vector<8x24x128xf32> to vector<8x16x128xf32>
    %36 = arith.addf %30, %35 : vector<8x16x128xf32>
    %c2_42 = arith.constant 2 : index
    %c0_43 = arith.constant 0 : index
    %c0_44 = arith.constant 0 : index
    %37 = vector.load %arg5[%c2_42, %c0_43, %c0_44] : memref<3x384x128xf32, #tpu.memory_space<vmem>>, vector<1x384x128xf32>
    %38 = vector.shape_cast %37 : vector<1x384x128xf32> to vector<384x128xf32>
    %cst_45 = arith.constant dense<0.000000e+00> : vector<192x128xf32>
    %39 = tpu.matmul %25, %38, %cst_45 {dimension_numbers = #tpu.dot_dimension_numbers<[1], [0], [0], [1], [0, 0, 1, 1], [], []>} : vector<192x384xf32>, vector<384x128xf32>, vector<192x128xf32> -> vector<192x128xf32>
    %40 = vector.shape_cast %39 : vector<192x128xf32> to vector<8x24x128xf32>
    %41 = vector.extract_strided_slice %40 {offsets = [0, 3, 0], sizes = [8, 16, 128], strides = [1, 1, 1]} : vector<8x24x128xf32> to vector<8x16x128xf32>
    %42 = arith.addf %36, %41 : vector<8x16x128xf32>
    %c0_46 = arith.constant 0 : index
    %c0_47 = arith.constant 0 : index
    %43 = vector.load %arg6[%c0_46, %c0_47] : memref<1x128xf32, #tpu.memory_space<vmem>>, vector<1x128xf32>
    %44 = vector.shape_cast %43 : vector<1x128xf32> to vector<1x1x128xf32>
    %45 = vector.broadcast %44 : vector<1x1x128xf32> to vector<8x16x128xf32>
    %46 = arith.mulf %42, %45 : vector<8x16x128xf32>
    %c0_48 = arith.constant 0 : index
    %c0_49 = arith.constant 0 : index
    %47 = vector.load %arg7[%c0_48, %c0_49] : memref<1x128xf32, #tpu.memory_space<vmem>>, vector<1x128xf32>
    %48 = vector.shape_cast %47 : vector<1x128xf32> to vector<1x1x128xf32>
    %49 = vector.broadcast %48 : vector<1x1x128xf32> to vector<8x16x128xf32>
    %50 = arith.addf %46, %49 : vector<8x16x128xf32>
    %cst_50 = arith.constant 0.000000e+00 : f32
    %51 = vector.broadcast %cst_50 : f32 to vector<8x16x128xf32>
    %52 = arith.maximumf %50, %51 : vector<8x16x128xf32>
    %c0_51 = arith.constant 0 : index
    %c0_52 = arith.constant 0 : index
    %c0_53 = arith.constant 0 : index
    %c0_54 = arith.constant 0 : index
    %53 = vector.load %arg8[%c0_51, %c0_52, %c0_53, %c0_54] : memref<1x8x16x128xf32, #tpu.memory_space<vmem>>, vector<1x8x16x128xf32>
    %54 = vector.shape_cast %53 : vector<1x8x16x128xf32> to vector<8x16x128xf32>
    %55 = vector.shape_cast %52 : vector<8x16x128xf32> to vector<1x8x16x128xf32>
    tpu.vector_store %arg8[%c0_51, %c0_52, %c0_53, %c0_54], %55 {strides = array<i32>} : memref<1x8x16x128xf32, #tpu.memory_space<vmem>>, vector<1x8x16x128xf32>,
    return
  }
  func.func @transform_0(%arg0: i32, %arg1: i32) -> (i32, i32, i32, i32) {
    %c0_i32 = arith.constant 0 : i32
    %c0_i32_0 = arith.constant 0 : i32
    %c0_i32_1 = arith.constant 0 : i32
    return %arg0, %arg1, %c0_i32, %c0_i32_0 : i32, i32, i32, i32
  }
  func.func @transform_1(%arg0: i32, %arg1: i32) -> (i32, i32, i32, i32) {
    %c8_i32 = arith.constant 8 : i32
    %0 = arith.muli %arg1, %c8_i32 : i32
    %c1_i32 = arith.constant 1 : i32
    %1 = arith.subi %0, %c1_i32 : i32
    %c0_i32 = arith.constant 0 : i32
    %2 = arith.maxsi %1, %c0_i32 : i32
    %c0_i32_0 = arith.constant 0 : i32
    %c0_i32_1 = arith.constant 0 : i32
    %c0_i32_2 = arith.constant 0 : i32
    return %arg0, %2, %c0_i32_0, %c0_i32_1 : i32, i32, i32, i32
  }
  func.func @transform_2(%arg0: i32, %arg1: i32) -> (i32, i32, i32, i32) {
    %c8_i32 = arith.constant 8 : i32
    %0 = arith.muli %arg1, %c8_i32 : i32
    %c8_i32_0 = arith.constant 8 : i32
    %1 = arith.addi %0, %c8_i32_0 : i32
    %c15_i32 = arith.constant 15 : i32
    %2 = arith.minsi %1, %c15_i32 : i32
    %c0_i32 = arith.constant 0 : i32
    %c0_i32_1 = arith.constant 0 : i32
    %c0_i32_2 = arith.constant 0 : i32
    return %arg0, %2, %c0_i32, %c0_i32_1 : i32, i32, i32, i32
  }
  func.func @transform_3(%arg0: i32, %arg1: i32) -> (i32, i32, i32) {
    %c0_i32 = arith.constant 0 : i32
    %c0_i32_0 = arith.constant 0 : i32
    %c0_i32_1 = arith.constant 0 : i32
    %c0_i32_2 = arith.constant 0 : i32
    return %c0_i32, %c0_i32_0, %c0_i32_1 : i32, i32, i32
  }
  func.func @transform_4(%arg0: i32, %arg1: i32) -> (i32, i32) {
    %c0_i32 = arith.constant 0 : i32
    %c0_i32_0 = arith.constant 0 : i32
    %c0_i32_1 = arith.constant 0 : i32
    return %c0_i32, %c0_i32_0 : i32, i32
  }
  func.func @transform_5(%arg0: i32, %arg1: i32) -> (i32, i32) {
    %c0_i32 = arith.constant 0 : i32
    %c0_i32_0 = arith.constant 0 : i32
    %c0_i32_1 = arith.constant 0 : i32
    return %c0_i32, %c0_i32_0 : i32, i32
  }
  func.func @transform_6(%arg0: i32, %arg1: i32) -> (i32, i32, i32, i32) {
    %c0_i32 = arith.constant 0 : i32
    %c0_i32_0 = arith.constant 0 : i32
    %c0_i32_1 = arith.constant 0 : i32
    return %arg0, %arg1, %c0_i32, %c0_i32_0 : i32, i32, i32, i32
  }
}

module attributes {stable_mosaic.version = 11 : i64} {
  func.func @kernel(%arg0: i32, %arg1: memref<512x128xf32, #tpu.memory_space<vmem>>, %arg2: memref<512x128xf32, #tpu.memory_space<vmem>>, %arg3: memref<512x128xf32, #tpu.memory_space<vmem>>, %arg4: memref<384x128xf32, #tpu.memory_space<vmem>>, %arg5: memref<1x128xf32, #tpu.memory_space<vmem>>, %arg6: memref<1x128xf32, #tpu.memory_space<vmem>>, %arg7: memref<512x128xf32, #tpu.memory_space<vmem>>, %arg8: memref<512x384xf32, #tpu.memory_space<vmem>>) attributes {dimension_semantics = [#tpu.dimension_semantics<parallel>], iteration_bounds = array<i64: 1>, scalar_prefetch = 0 : i64, scratch_operands = 1 : i64, tpu.core_type = #tpu.core_type<tc>, window_params = [{transform_indices = @transform_0, window_bounds = array<i64: 512, 128>}, {transform_indices = @transform_1, window_bounds = array<i64: 512, 128>}, {transform_indices = @transform_2, window_bounds = array<i64: 512, 128>}, {pipeline_mode = #tpu.pipeline_mode<synchronous>, transform_indices = @transform_3, window_bounds = array<i64: 384, 128>}, {pipeline_mode = #tpu.pipeline_mode<synchronous>, transform_indices = @transform_4, window_bounds = array<i64: 1, 128>}, {pipeline_mode = #tpu.pipeline_mode<synchronous>, transform_indices = @transform_5, window_bounds = array<i64: 1, 128>}, {transform_indices = @transform_6, window_bounds = array<i64: 512, 128>}]} {
    %c0 = arith.constant 0 : index
    %c0_0 = arith.constant 0 : index
    %0 = vector.load %arg1[%c0, %c0_0] : memref<512x128xf32, #tpu.memory_space<vmem>>, vector<512x128xf32>
    %c0_1 = arith.constant 0 : index
    %c0_2 = arith.constant 0 : index
    %1 = vector.load %arg8[%c0_1, %c0_2] : memref<512x384xf32, #tpu.memory_space<vmem>>, vector<512x128xf32>
    tpu.vector_store %arg8[%c0_1, %c0_2], %0 {strides = array<i32>} : memref<512x384xf32, #tpu.memory_space<vmem>>, vector<512x128xf32>,
    %c0_3 = arith.constant 0 : index
    %c0_4 = arith.constant 0 : index
    %2 = vector.load %arg2[%c0_3, %c0_4] : memref<512x128xf32, #tpu.memory_space<vmem>>, vector<512x128xf32>
    %c0_5 = arith.constant 0 : index
    %c128 = arith.constant 128 : index
    %3 = vector.load %arg8[%c0_5, %c128] : memref<512x384xf32, #tpu.memory_space<vmem>>, vector<512x128xf32>
    tpu.vector_store %arg8[%c0_5, %c128], %2 {strides = array<i32>} : memref<512x384xf32, #tpu.memory_space<vmem>>, vector<512x128xf32>,
    %c0_6 = arith.constant 0 : index
    %c0_7 = arith.constant 0 : index
    %4 = vector.load %arg3[%c0_6, %c0_7] : memref<512x128xf32, #tpu.memory_space<vmem>>, vector<512x128xf32>
    %c0_8 = arith.constant 0 : index
    %c256 = arith.constant 256 : index
    %5 = vector.load %arg8[%c0_8, %c256] : memref<512x384xf32, #tpu.memory_space<vmem>>, vector<512x128xf32>
    tpu.vector_store %arg8[%c0_8, %c256], %4 {strides = array<i32>} : memref<512x384xf32, #tpu.memory_space<vmem>>, vector<512x128xf32>,
    %c0_9 = arith.constant 0 : index
    %c0_10 = arith.constant 0 : index
    %6 = vector.load %arg8[%c0_9, %c0_10] : memref<512x384xf32, #tpu.memory_space<vmem>>, vector<512x384xf32>
    %c0_11 = arith.constant 0 : index
    %c0_12 = arith.constant 0 : index
    %7 = vector.load %arg4[%c0_11, %c0_12] : memref<384x128xf32, #tpu.memory_space<vmem>>, vector<384x128xf32>
    %cst = arith.constant dense<0.000000e+00> : vector<512x128xf32>
    %8 = tpu.matmul %6, %7, %cst {dimension_numbers = #tpu.dot_dimension_numbers<[1], [0], [0], [1], [0, 0, 1, 1], [], []>} : vector<512x384xf32>, vector<384x128xf32>, vector<512x128xf32> -> vector<512x128xf32>
    %c0_13 = arith.constant 0 : index
    %c0_14 = arith.constant 0 : index
    %9 = vector.load %arg5[%c0_13, %c0_14] : memref<1x128xf32, #tpu.memory_space<vmem>>, vector<1x128xf32>
    %10 = vector.broadcast %9 : vector<1x128xf32> to vector<512x128xf32>
    %11 = arith.mulf %8, %10 : vector<512x128xf32>
    %c0_15 = arith.constant 0 : index
    %c0_16 = arith.constant 0 : index
    %12 = vector.load %arg6[%c0_15, %c0_16] : memref<1x128xf32, #tpu.memory_space<vmem>>, vector<1x128xf32>
    %13 = vector.broadcast %12 : vector<1x128xf32> to vector<512x128xf32>
    %14 = arith.addf %11, %13 : vector<512x128xf32>
    %cst_17 = arith.constant 0.000000e+00 : f32
    %15 = vector.broadcast %cst_17 : f32 to vector<512x128xf32>
    %16 = arith.maximumf %14, %15 : vector<512x128xf32>
    %c0_18 = arith.constant 0 : index
    %c0_19 = arith.constant 0 : index
    %17 = vector.load %arg7[%c0_18, %c0_19] : memref<512x128xf32, #tpu.memory_space<vmem>>, vector<512x128xf32>
    tpu.vector_store %arg7[%c0_18, %c0_19], %16 {strides = array<i32>} : memref<512x128xf32, #tpu.memory_space<vmem>>, vector<512x128xf32>,
    return
  }
  func.func @transform_0(%arg0: i32) -> (i32, i32) {
    %c0_i32 = arith.constant 0 : i32
    %c0_i32_0 = arith.constant 0 : i32
    return %arg0, %c0_i32 : i32, i32
  }
  func.func @transform_1(%arg0: i32) -> (i32, i32) {
    %c0_i32 = arith.constant 0 : i32
    %c0_i32_0 = arith.constant 0 : i32
    return %arg0, %c0_i32 : i32, i32
  }
  func.func @transform_2(%arg0: i32) -> (i32, i32) {
    %c0_i32 = arith.constant 0 : i32
    %c0_i32_0 = arith.constant 0 : i32
    return %arg0, %c0_i32 : i32, i32
  }
  func.func @transform_3(%arg0: i32) -> (i32, i32) {
    %c0_i32 = arith.constant 0 : i32
    %c0_i32_0 = arith.constant 0 : i32
    %c0_i32_1 = arith.constant 0 : i32
    return %c0_i32, %c0_i32_0 : i32, i32
  }
  func.func @transform_4(%arg0: i32) -> (i32, i32) {
    %c0_i32 = arith.constant 0 : i32
    %c0_i32_0 = arith.constant 0 : i32
    %c0_i32_1 = arith.constant 0 : i32
    return %c0_i32, %c0_i32_0 : i32, i32
  }
  func.func @transform_5(%arg0: i32) -> (i32, i32) {
    %c0_i32 = arith.constant 0 : i32
    %c0_i32_0 = arith.constant 0 : i32
    %c0_i32_1 = arith.constant 0 : i32
    return %c0_i32, %c0_i32_0 : i32, i32
  }
  func.func @transform_6(%arg0: i32) -> (i32, i32) {
    %c0_i32 = arith.constant 0 : i32
    %c0_i32_0 = arith.constant 0 : i32
    return %arg0, %c0_i32 : i32, i32
  }
}

module attributes {stable_mosaic.version = 11 : i64} {
  func.func @kernel(%arg0: i32, %arg1: memref<1x16x16x128xf32, #tpu.memory_space<vmem>>, %arg2: memref<1x16x16x128xf32, #tpu.memory_space<vmem>>, %arg3: memref<128x128xf32, #tpu.memory_space<vmem>>, %arg4: memref<1x128xf32, #tpu.memory_space<vmem>>, %arg5: memref<1x16x16x128xf32, #tpu.memory_space<vmem>>) attributes {dimension_semantics = [#tpu.dimension_semantics<parallel>], iteration_bounds = array<i64: 2>, scalar_prefetch = 0 : i64, scratch_operands = 0 : i64, tpu.core_type = #tpu.core_type<tc>, window_params = [{transform_indices = @transform_0, window_bounds = array<i64: 1, 16, 16, 128>}, {transform_indices = @transform_1, window_bounds = array<i64: 1, 16, 16, 128>}, {pipeline_mode = #tpu.pipeline_mode<synchronous>, transform_indices = @transform_2, window_bounds = array<i64: 128, 128>}, {pipeline_mode = #tpu.pipeline_mode<synchronous>, transform_indices = @transform_3, window_bounds = array<i64: 1, 128>}, {transform_indices = @transform_4, window_bounds = array<i64: 1, 16, 16, 128>}]} {
    %c0 = arith.constant 0 : index
    %c0_0 = arith.constant 0 : index
    %c0_1 = arith.constant 0 : index
    %c0_2 = arith.constant 0 : index
    %0 = vector.load %arg1[%c0, %c0_0, %c0_1, %c0_2] : memref<1x16x16x128xf32, #tpu.memory_space<vmem>>, vector<1x16x16x128xf32>
    %1 = vector.shape_cast %0 : vector<1x16x16x128xf32> to vector<16x16x128xf32>
    %cst = arith.constant dense<0.000000e+00> : vector<128xf32>
    %2 = vector.multi_reduction <add>, %1, %cst [0, 1] : vector<16x16x128xf32> to vector<128xf32>
    %3 = vector.shape_cast %2 : vector<128xf32> to vector<1x1x128xf32>
    %cst_3 = arith.constant 2.560000e+02 : f32
    %4 = vector.broadcast %cst_3 : f32 to vector<1x1x128xf32>
    %5 = arith.divf %3, %4 : vector<1x1x128xf32>
    %6 = vector.shape_cast %5 : vector<1x1x128xf32> to vector<1x128xf32>
    %c0_4 = arith.constant 0 : index
    %c0_5 = arith.constant 0 : index
    %7 = vector.load %arg3[%c0_4, %c0_5] : memref<128x128xf32, #tpu.memory_space<vmem>>, vector<128x128xf32>
    %cst_6 = arith.constant dense<0.000000e+00> : vector<1x128xf32>
    %8 = tpu.matmul %6, %7, %cst_6 {dimension_numbers = #tpu.dot_dimension_numbers<[1], [0], [0], [1], [0, 0, 1, 1], [], []>} : vector<1x128xf32>, vector<128x128xf32>, vector<1x128xf32> -> vector<1x128xf32>
    %c0_7 = arith.constant 0 : index
    %c0_8 = arith.constant 0 : index
    %9 = vector.load %arg4[%c0_7, %c0_8] : memref<1x128xf32, #tpu.memory_space<vmem>>, vector<1x128xf32>
    %10 = arith.addf %8, %9 : vector<1x128xf32>
    %11 = arith.negf %10 : vector<1x128xf32>
    %12 = math.exp %11 : vector<1x128xf32>
    %cst_9 = arith.constant 1.000000e+00 : f32
    %13 = vector.broadcast %cst_9 : f32 to vector<1x128xf32>
    %14 = arith.addf %13, %12 : vector<1x128xf32>
    %15 = arith.divf %13, %14 : vector<1x128xf32>
    %16 = vector.shape_cast %15 : vector<1x128xf32> to vector<1x1x128xf32>
    %17 = vector.broadcast %16 : vector<1x1x128xf32> to vector<16x16x128xf32>
    %18 = arith.mulf %1, %17 : vector<16x16x128xf32>
    %c0_10 = arith.constant 0 : index
    %c0_11 = arith.constant 0 : index
    %c0_12 = arith.constant 0 : index
    %c0_13 = arith.constant 0 : index
    %19 = vector.load %arg2[%c0_10, %c0_11, %c0_12, %c0_13] : memref<1x16x16x128xf32, #tpu.memory_space<vmem>>, vector<1x16x16x128xf32>
    %20 = vector.shape_cast %19 : vector<1x16x16x128xf32> to vector<16x16x128xf32>
    %21 = arith.addf %18, %20 : vector<16x16x128xf32>
    %c0_14 = arith.constant 0 : index
    %c0_15 = arith.constant 0 : index
    %c0_16 = arith.constant 0 : index
    %c0_17 = arith.constant 0 : index
    %22 = vector.load %arg5[%c0_14, %c0_15, %c0_16, %c0_17] : memref<1x16x16x128xf32, #tpu.memory_space<vmem>>, vector<1x16x16x128xf32>
    %23 = vector.shape_cast %22 : vector<1x16x16x128xf32> to vector<16x16x128xf32>
    %24 = vector.shape_cast %21 : vector<16x16x128xf32> to vector<1x16x16x128xf32>
    tpu.vector_store %arg5[%c0_14, %c0_15, %c0_16, %c0_17], %24 {strides = array<i32>} : memref<1x16x16x128xf32, #tpu.memory_space<vmem>>, vector<1x16x16x128xf32>,
    return
  }
  func.func @transform_0(%arg0: i32) -> (i32, i32, i32, i32) {
    %c0_i32 = arith.constant 0 : i32
    %c0_i32_0 = arith.constant 0 : i32
    %c0_i32_1 = arith.constant 0 : i32
    %c0_i32_2 = arith.constant 0 : i32
    return %arg0, %c0_i32, %c0_i32_0, %c0_i32_1 : i32, i32, i32, i32
  }
  func.func @transform_1(%arg0: i32) -> (i32, i32, i32, i32) {
    %c0_i32 = arith.constant 0 : i32
    %c0_i32_0 = arith.constant 0 : i32
    %c0_i32_1 = arith.constant 0 : i32
    %c0_i32_2 = arith.constant 0 : i32
    return %arg0, %c0_i32, %c0_i32_0, %c0_i32_1 : i32, i32, i32, i32
  }
  func.func @transform_2(%arg0: i32) -> (i32, i32) {
    %c0_i32 = arith.constant 0 : i32
    %c0_i32_0 = arith.constant 0 : i32
    %c0_i32_1 = arith.constant 0 : i32
    return %c0_i32, %c0_i32_0 : i32, i32
  }
  func.func @transform_3(%arg0: i32) -> (i32, i32) {
    %c0_i32 = arith.constant 0 : i32
    %c0_i32_0 = arith.constant 0 : i32
    %c0_i32_1 = arith.constant 0 : i32
    return %c0_i32, %c0_i32_0 : i32, i32
  }
  func.func @transform_4(%arg0: i32) -> (i32, i32, i32, i32) {
    %c0_i32 = arith.constant 0 : i32
    %c0_i32_0 = arith.constant 0 : i32
    %c0_i32_1 = arith.constant 0 : i32
    %c0_i32_2 = arith.constant 0 : i32
    return %arg0, %c0_i32, %c0_i32_0, %c0_i32_1 : i32, i32, i32, i32
  }
}

</mosaic_0001>

<bundles_post_ra>
// kernel: hg_block_forward.7
= control target key start
LH: loop header
LB: loop body
LE: loop exit
PB: predicated region body
PF: predicated region fallthrough
CT: control target
= control target key end

     0   :  { %9 = vsyncpa [#allocation3], 0  ;;  %s1445_s0 = inlined_call_operand.hbm [shape: f32[2,16,16,128], index: 0, kind: input, shape index: {}]   ;;  %s1446_s1 = inlined_call_operand.hbm [shape: f32[2,16,16,128], index: 1, kind: input, shape index: {}]   ;;  %s1447_s2 = inlined_call_operand.vmem [shape: f32[128,128], index: 2, kind: input, shape index: {}]   ;;  %s1448_s3 = inlined_call_operand.vmem [shape: f32[1,128], index: 3, kind: input, shape index: {}]   ;;  %s1449_s4 = inlined_call_operand.vmem [shape: f32[2,16,16,128], index: 4, kind: output, shape index: {}]  }
   0x1   :  { %11 = vsyncpa [#allocation3 + $0x1], 0 }
   0x2   :  { %12 = vsyncpa [#allocation5], 0 }
   0x3   :  { %14 = vsyncpa [#allocation5 + $0x1], 0  ;;  %s925_s15 = smov 0   ;;  %s927_s16 = smov 0  }
   0x4   :  { %s929_s17 = smov 0   ;;  %s931_s18 = smov 0  }
   0x5 LB: > { %s944_s19 = sadd.s32 4294967295, %s891_s18   ;;  %s947_s20 = sadd.s32 1, %s891_s18   ;;  %s891_s18 = sphi %s931_s18, %s1461_s18   ;;  %s887_s17 = sphi %s929_s17, %s1460_s17   ;;  %s883_s16 = sphi %s927_s16, %s1459_s16   ;;  %s879_s15 = sphi %s925_s15, %s1458_s15  }
   0x6   : > { %s24_s21 = ssub.s32 %s891_s18, %s947_s20  ;;  %s27_s22 = sadd.s32 1, %s887_s17 }
   0x7   : > { %p25_p0 = scmp.eq.s32.totalorder %s24_s21, 0  ;;  %p34_p1 = scmp.ne.s32.totalorder %s887_s17, %s883_s16 }
   0x8   : > { %p35_p2 = scmp.eq.s32.totalorder %s891_s18, 0  ;;  %p40_p3 = scmp.ne.s32.totalorder %s883_s16, %s879_s15 }
   0x9   : > { %s957_s23 = scalar_select %p25_p0, %s887_s17, %s27_s22  }
   0xa   : > { %p36_p4 = por %p35_p2, %p34_p1  ;;  %p41_p5 = scmp.eq.s32.totalorder %s944_s19, 0 }
   0xb   : > { %p751_p6 = scmp.lt.s32.totalorder %s891_s18, 2  ;;  %s966_s25 = sand.u32 1, %s887_s17  }
   0xc   : > { %p961_p7 = por %p41_p5, %p40_p3  ;;  %s647_s26 = sshll.u32 %s966_s25, 8 }
   0xd   : > { %s661_s27 = sshll.u32 %s891_s18, 12  ;;  %s168_s5 = scalar_lea.vmem [#allocation2], %s647_s26 }
   0xe   : > { %s1451_s24 = scalar_select %p961_p7, 1, 0 }
   0xf   : > { %s975_s30 = scalar_lea.hbm %s1445_s0, %s661_s27  ;;  %s175_s6 = sshll.u32 %s168_s5, 4  ;;  %s979_s6 = int_to_ptr.vmem [resolvable:$true] %s175_s6 }
  0x10   : > { %p981_p8 = pnand %p751_p6, %p36_p4  ;;  %s165_s8 = scalar_lea.sflag [#allocation3], %s966_s25 }
  0x11   : > { %s793_s9 = scalar_lea.hbm %s975_s30, 4096  ;;  %s798_s12 = scalar_lea.hbm %s1445_s0, 8192 }
  0x12   : > { %p794_p10 = scmp.ne.s32.totalorder %s975_s30, %s793_s9  ;;  %p795_p11 = pneg %p981_p8 }
  0x13   : > { %p799_p0 = scmp.lt.u32.totalorder %s975_s30, %s1445_s0  ;;  %p800_p1 = scmp.lt.u32.totalorder %s798_s12, %s793_s9 }
  0x14   : > { %p796_p12 = pnand %p795_p11, %p794_p10  ;;  %p802_p3 = scmp.lt.u32.totalorder %s793_s9, %s975_s30 }
  0x15   : > { %p801_p2 = por %p800_p1, %p799_p0 }
  0x16   : > { %p797_p13 = pneg %p796_p12 }
  0x17   : > { %p803_p4 = por %p802_p3, %p801_p2 }
  0x19   : > { %p804_p5 = pnand %p803_p4, %p797_p13 }
  0x1b   : > { %807 = shalt.err (!%p804_p5)
}
  0x1c   : > { %s808_s15 = scalar_lea.vmem %s979_s6, 4096  ;;  %s893_s21 = smov [#allocation2]  }
  0x1d   : > { %p809_p6 = scmp.ne.s32.totalorder %s979_s6, %s808_s15  ;;  %s813_s22 = sshll.u32 %s893_s21, 4  ;;  %s814_s22 = int_to_ptr.vmem [resolvable:$false] %s813_s22 }
  0x1e   : > { %s815_s28 = scalar_lea.vmem %s814_s22, 8192  ;;  %p816_p9 = scmp.lt.s32.totalorder %s979_s6, %s814_s22 }
  0x1f   : > { %p811_p10 = pnand %p809_p6, %p795_p11  ;;  %p817_p0 = scmp.lt.s32.totalorder %s815_s28, %s808_s15 }
  0x21   : > { %p812_p12 = pneg %p811_p10  ;;  %p818_p1 = por %p817_p0, %p816_p9 }
  0x23   : > { %p819_p2 = pnand %p818_p1, %p812_p12 }
  0x25   : > { %822 = shalt.err (!%p819_p2)
}
  0x26   : > { %s894_s29 = smov 128   ;;  %s895_s5 = smov 8  }
  0x27   : > { %747 = dma.hbm_to_vmem [thread:$0]  (!%p981_p8), %s975_s30, 4096, %s979_s6, %s165_s8, %s894_s29, %s894_s29, %s895_s5  }
  0x28   : > { %p204_p9 = scmp.lt.s32.totalorder %s891_s18, 3  ;;  %s1023_s11 = scalar_lea.hbm %s1446_s1, %s661_s27 }
  0x29   : > { %p1453_p13 = scmp.ge.s32.totalorder %s891_s18, 1  ;;  %s189_s13 = scalar_lea.vmem [#allocation4], %s647_s26 }
  0x2a   : > { %s196_s14 = sshll.u32 %s189_s13, 4  ;;  %s186_s30 = scalar_lea.sflag [#allocation5], %s966_s25  ;;  %s1033_s14 = int_to_ptr.vmem [resolvable:$true] %s196_s14 }
  0x2b   : > { %p1027_p3 = pnand %p1453_p13, %p204_p9  ;;  %s823_s6 = scalar_lea.hbm %s1023_s11, 4096 }
  0x2c   : > { %p824_p4 = scmp.ne.s32.totalorder %s1023_s11, %s823_s6  ;;  %s828_s8 = scalar_lea.hbm %s1446_s1, 8192 }
  0x2d   : > { %p829_p10 = scmp.lt.u32.totalorder %s1023_s11, %s1446_s1  ;;  %p830_p12 = scmp.lt.u32.totalorder %s828_s8, %s823_s6 }
  0x2e   : > { %p826_p5 = pnand %p824_p4, %p795_p11  ;;  %p832_p1 = scmp.lt.u32.totalorder %s823_s6, %s1023_s11 }
  0x2f   : > { %p831_p0 = por %p830_p12, %p829_p10 }
  0x30   : > { %p827_p6 = pneg %p826_p5 }
  0x31   : > { %p833_p2 = por %p832_p1, %p831_p0 }
  0x33   : > { %p834_p9 = pnand %p833_p2, %p827_p6 }
  0x35   : > { %837 = shalt.err (!%p834_p9)
}
  0x36   : > { %s838_s26 = scalar_lea.vmem %s1033_s14, 4096  ;;  %s896_s22 = smov [#allocation4]  }
  0x37   : > { %p839_p13 = scmp.ne.s32.totalorder %s1033_s14, %s838_s26  ;;  %s843_s28 = sshll.u32 %s896_s22, 4  ;;  %s844_s28 = int_to_ptr.vmem [resolvable:$false] %s843_s28 }
  0x38   : > { %s845_s9 = scalar_lea.vmem %s844_s28, 8192  ;;  %p846_p7 = scmp.lt.s32.totalorder %s1033_s14, %s844_s28 }
  0x39   : > { %p841_p4 = pnand %p839_p13, %p795_p11  ;;  %p847_p10 = scmp.lt.s32.totalorder %s845_s9, %s838_s26 }
  0x3b   : > { %p842_p5 = pneg %p841_p4  ;;  %p848_p12 = por %p847_p10, %p846_p7 }
  0x3d   : > { %p849_p0 = pnand %p848_p12, %p842_p5 }
  0x3f   : > { %852 = shalt.err (!%p849_p0)
}
  0x40   : > { %750 = dma.hbm_to_vmem [thread:$0]  (!%p981_p8), %s1023_s11, 4096, %s1033_s14, %s186_s30, %s894_s29, %s894_s29, %s895_s5  }
  0x41   : > { %208 = sbr.rel (%p1027_p3) target bundleno = 427 (0x1ab), region = 36 }
  0x48   : > { %s210_s10 = sand.u32 1, %s883_s16   ;;  %p1455_p7 = scmp.ne.s32.totalorder %s1451_s24, 0 }
  0x49   : > { %s654_s13 = sshll.u32 %s210_s10, 8  ;;  %s211_s6 = scalar_lea.sflag [#allocation3], %s210_s10 }
  0x4a   : > { %s1067_s18 = scalar_lea.vmem [#allocation2], %s654_s13 }
  0x4b   : > { %870 = dma.done.wait (%p1455_p7), %s211_s6, 4096  }
  0x4c   : > { %872 = vsyncadd (%p1455_p7), %s211_s6, 4294963200  ;;  %s220_s25 = scalar_lea.sflag [#allocation5], %s210_s10  ;;  %s1073_s7 = scalar_lea.vmem [#allocation4], %s654_s13 }
  0x4d   : > { %874 = dma.done.wait (%p1455_p7), %s220_s25, 4096  }
  0x4e   : > { %876 = vsyncadd (%p1455_p7), %s220_s25, 4294963200  ;;  %v897_v0 = vmov 0.0|0.0   ;;  %vm898_vm0 = vmmov 0   ;;  %v899_v1 = vmov 0.0   ;;  %v329_v2 = vld [vmem:[%s1447_s2] sm:$0xff]  ;;  %v330_v3 = vld [vmem:[%s1447_s2 + $0x8] sm:$0xff] }
  0x4f   : > { %716 = vmatprep.subr.bf16.mxu0 %v897_v0  ;;  %713 = vmatprep.mubr.msk.f32.mxu0 %vm898_vm0, %v899_v1  ;;  %v331_v4 = vld [vmem:[%s1447_s2 + $0x10] sm:$0xff]  ;;  %v717_v5 = vpack.c.bf16 %v330_v3, %v329_v2  ;;  %v332_v6 = vld [vmem:[%s1447_s2 + $0x18] sm:$0xff]  ;;  %v333_v8 = vld [vmem:[%s1447_s2 + $0x20] sm:$0xff]  ;;  %p253_p8 = scmp.lt.s32.totalorder %s944_s19, 1 }
  0x50   : > { %v720_v7 = vpack.c.bf16 %v332_v6, %v331_v4  ;;  %v334_v9 = vld [vmem:[%s1447_s2 + $0x28] sm:$0xff]  ;;  %v1100_v10 = vld [vmem:[%s1067_s18] sm:$0xff]  ;;  %v1106_v12 = vld [vmem:[%s1067_s18 + $0x10] sm:$0xff] }
  0x51   : > { %718 = vmatpush3.bf16.msra.mxu0 %v717_v5  ;;  %v1103_v11 = vld [vmem:[%s1067_s18 + $0x8] sm:$0xff]  ;;  %v723_v14 = vpack.c.bf16 %v334_v9, %v333_v8  ;;  %v1111_v15 = vld [vmem:[%s1067_s18 + $0x18] sm:$0xff]  ;;  %v335_v16 = vld [vmem:[%s1447_s2 + $0x30] sm:$0xff]  ;;  %s1463_s19 = smov (!%p253_p8, %s944_s19), 1 }
  0x52   : > { %719 = vmatprep.subr.bf16.mxu0 %v897_v0  ;;  %v290_v13 = vadd.f32 %v1103_v11, %v1100_v10  ;;  %v336_v17 = vld [vmem:[%s1447_s2 + $0x38] sm:$0xff]  ;;  %v1122_v19 = vld [vmem:[%s1067_s18 + $0x20] sm:$0xff]  ;;  %v1126_v22 = vld [vmem:[%s1067_s18 + $0x28] sm:$0xff] }
  0x53   : > { %v726_v21 = vpack.c.bf16 %v336_v17, %v335_v16  ;;  %v337_v23 = vld [vmem:[%s1447_s2 + $0x40] sm:$0xff]  ;;  %v338_v24 = vld [vmem:[%s1447_s2 + $0x48] sm:$0xff]  ;;  %v1137_v26 = vld [vmem:[%s1067_s18 + $0x30] sm:$0xff] }
  0x54   : > { %v291_v18 = vadd.f32 %v290_v13, %v1106_v12  ;;  %v729_v28 = vpack.c.bf16 %v338_v24, %v337_v23  ;;  %v1141_v29 = vld [vmem:[%s1067_s18 + $0x38] sm:$0xff]  ;;  %v339_v30 = vld [vmem:[%s1447_s2 + $0x50] sm:$0xff]  ;;  %v1152_v33 = vld [vmem:[%s1067_s18 + $0x40] sm:$0xff] }
  0x55   : > { %721 = vmatpush3.bf16.msra.mxu0 %v720_v7  ;;  %v340_v31 = vld [vmem:[%s1447_s2 + $0x58] sm:$0xff]  ;;  %v1156_v36 = vld [vmem:[%s1067_s18 + $0x48] sm:$0xff]  ;;  %v341_v37 = vld [vmem:[%s1447_s2 + $0x60] sm:$0xff] }
  0x56   : > { %722 = vmatprep.subr.bf16.mxu0 %v897_v0  ;;  %v292_v20 = vadd.f32 %v291_v18, %v1111_v15  ;;  %v732_v35 = vpack.c.bf16 %v340_v31, %v339_v30  ;;  %v342_v38 = vld [vmem:[%s1447_s2 + $0x68] sm:$0xff]  ;;  %v1167_v40 = vld [vmem:[%s1067_s18 + $0x50] sm:$0xff]  ;;  %v1171_v43 = vld [vmem:[%s1067_s18 + $0x58] sm:$0xff] }
  0x57   : > { %v735_v42 = vpack.c.bf16 %v342_v38, %v341_v37  ;;  %v343_v44 = vld [vmem:[%s1447_s2 + $0x70] sm:$0xff]  ;;  %v344_v45 = vld [vmem:[%s1447_s2 + $0x78] sm:$0xff]  ;;  %v1182_v47 = vld [vmem:[%s1067_s18 + $0x60] sm:$0xff] }
  0x58   : > { %v293_v25 = vadd.f32 %v292_v20, %v1122_v19  ;;  %v738_v49 = vpack.c.bf16 %v344_v45, %v343_v44  ;;  %v1186_v50 = vld [vmem:[%s1067_s18 + $0x68] sm:$0xff]  ;;  %v1191_v52 = vld [vmem:[%s1067_s18 + $0x70] sm:$0xff]  ;;  %v1195_v54 = vld [vmem:[%s1067_s18 + $0x78] sm:$0xff] }
  0x59   : > { %724 = vmatpush3.bf16.msra.mxu0 %v723_v14  ;;  %v1199_v56 = vld [vmem:[%s1067_s18 + $0x80] sm:$0xff]  ;;  %v1203_v58 = vld [vmem:[%s1067_s18 + $0x88] sm:$0xff]  ;;  %v1207_v60 = vld [vmem:[%s1067_s18 + $0x90] sm:$0xff] }
  0x5a   : > { %725 = vmatprep.subr.bf16.mxu0 %v897_v0  ;;  %v294_v27 = vadd.f32 %v293_v25, %v1126_v22  ;;  %v1211_v62 = vld [vmem:[%s1067_s18 + $0x98] sm:$0xff]  ;;  %v1219_v2 = vld [vmem:[%s1067_s18 + $0xa8] sm:$0xff]  ;;  %v1223_v4 = vld [vmem:[%s1067_s18 + $0xb0] sm:$0xff] }
  0x5b   : > { %v1227_v6 = vld [vmem:[%s1067_s18 + $0xb8] sm:$0xff]  ;;  %v1231_v8 = vld [vmem:[%s1067_s18 + $0xc0] sm:$0xff]  ;;  %v1235_v13 = vld [vmem:[%s1067_s18 + $0xc8] sm:$0xff] }
  0x5c   : > { %v295_v32 = vadd.f32 %v294_v27, %v1137_v26  ;;  %v1239_v16 = vld [vmem:[%s1067_s18 + $0xd0] sm:$0xff]  ;;  %v1243_v18 = vld [vmem:[%s1067_s18 + $0xd8] sm:$0xff]  ;;  %v1251_v24 = vld [vmem:[%s1067_s18 + $0xe8] sm:$0xff] }
  0x5d   : > { %727 = vmatpush3.bf16.msra.mxu0 %v726_v21  ;;  %v1247_v21 = vld [vmem:[%s1067_s18 + $0xe0] sm:$0xff]  ;;  %v1255_v27 = vld [vmem:[%s1067_s18 + $0xf0] sm:$0xff]  ;;  %v1259_v30 = vld [vmem:[%s1067_s18 + $0xf8] sm:$0xff] }
  0x5e   : > { %728 = vmatprep.subr.bf16.mxu0 %v897_v0  ;;  %v296_v34 = vadd.f32 %v295_v32, %v1141_v29  ;;  %v345_v44 = vld [vmem:[%s1448_s3] sm:$0x1] }
  0x60   : > { %v297_v39 = vadd.f32 %v296_v34, %v1152_v33 }
  0x61   : > { %730 = vmatpush3.bf16.msra.mxu0 %v729_v28 }
  0x62   : > { %731 = vmatprep.subr.bf16.mxu0 %v897_v0  ;;  %v298_v41 = vadd.f32 %v297_v39, %v1156_v36 }
  0x64   : > { %v299_v46 = vadd.f32 %v298_v41, %v1167_v40 }
  0x65   : > { %733 = vmatpush3.bf16.msra.mxu0 %v732_v35 }
  0x66   : > { %734 = vmatprep.subr.bf16.mxu0 %v897_v0  ;;  %v300_v48 = vadd.f32 %v299_v46, %v1171_v43 }
  0x68   : > { %v301_v51 = vadd.f32 %v300_v48, %v1182_v47 }
  0x69   : > { %736 = vmatpush3.bf16.msra.mxu0 %v735_v42 }
  0x6a   : > { %737 = vmatprep.subr.bf16.mxu0 %v897_v0  ;;  %v302_v53 = vadd.f32 %v301_v51, %v1186_v50  ;;  %v1215_v0 = vld [vmem:[%s1067_s18 + $0xa0] sm:$0xff]  ;;  %s663_s18 = sshll.u32 %s1463_s19, 8 }
  0x6b   : > { %s1348_s13 = scalar_lea.vmem %s1449_s4, %s663_s18 }
  0x6c   : > { %v303_v55 = vadd.f32 %v302_v53, %v1191_v52 }
  0x6d   : > { %739 = vmatpush3.bf16.msra.mxu0 %v738_v49 }
  0x6e   : > { %v304_v57 = vadd.f32 %v303_v55, %v1195_v54  ;;  %v422_v55 = vlaneseq }
  0x70   : > { %v305_v59 = vadd.f32 %v304_v57, %v1199_v56  ;;  %v423_v57 = vshrl.u32 %v422_v55, 7 }
  0x72   : > { %v306_v61 = vadd.f32 %v305_v59, %v1203_v58  ;;  %v424_v59 = vsub.s32 0, %v423_v57 }
  0x74   : > { %v307_v63 = vadd.f32 %v306_v61, %v1207_v60 }
  0x76   : > { %v308_v1 = vadd.f32 %v307_v63, %v1211_v62 }
  0x78   : > { %v309_v3 = vadd.f32 %v308_v1, %v1215_v0 }
  0x7a   : > { %v310_v5 = vadd.f32 %v309_v3, %v1219_v2 }
  0x7c   : > { %v311_v7 = vadd.f32 %v310_v5, %v1223_v4 }
  0x7e   : > { %v312_v9 = vadd.f32 %v311_v7, %v1227_v6 }
  0x80   : > { %v313_v14 = vadd.f32 %v312_v9, %v1231_v8 }
  0x82   : > { %v314_v17 = vadd.f32 %v313_v14, %v1235_v13 }
  0x84   : > { %v315_v20 = vadd.f32 %v314_v17, %v1239_v16 }
  0x86   : > { %v316_v23 = vadd.f32 %v315_v20, %v1243_v18 }
  0x88   : > { %v317_v25 = vadd.f32 %v316_v23, %v1247_v21  ;;  %v462_v23 = vld [vmem:[%s1073_s7 + $0x20] sm:$0xff] }
  0x8a   : > { %v318_v28 = vadd.f32 %v317_v25, %v1251_v24  ;;  %v463_v25 = vld [vmem:[%s1073_s7 + $0x28] sm:$0xff] }
  0x8c   : > { %v319_v31 = vadd.f32 %v318_v28, %v1255_v27  ;;  %v464_v28 = vld [vmem:[%s1073_s7 + $0x30] sm:$0xff] }
  0x8e   : > { %v320_v32 = vadd.f32 %v319_v31, %v1259_v30  ;;  %v465_v31 = vld [vmem:[%s1073_s7 + $0x38] sm:$0xff] }
  0x90   : > { %v321_v34 = vrot.slane %v320_v32, 4 }
  0x92   : > { %v322_v35 = vadd.f32 %v321_v34, %v320_v32  ;;  %v467_v34 = vld [vmem:[%s1073_s7 + $0x48] sm:$0xff] }
  0x94   : > { %v323_v37 = vrot.slane %v322_v35, 2 }
  0x96   : > { %v324_v38 = vadd.f32 %v323_v37, %v322_v35  ;;  %v468_v35 = vld [vmem:[%s1073_s7 + $0x50] sm:$0xff] }
  0x98   : > { %v325_v39 = vrot.slane %v324_v38, 1 }
  0x9a   : > { %v326_v41 = vadd.f32 %v325_v39, %v324_v38  ;;  %v470_v38 = vld [vmem:[%s1073_s7 + $0x60] sm:$0xff]  ;;  %v471_v39 = vld [vmem:[%s1073_s7 + $0x68] sm:$0xff] }
  0x9c   : > { %v328_v42 = vmul.f32 0.00390625, %v326_v41  ;;  %v472_v41 = vld [vmem:[%s1073_s7 + $0x70] sm:$0xff] }
  0x9e   : > { %714 = vmatmul.mubr.f32.vlgmr.msra.gmra.mrb[0].mxu0 %v328_v42  ;;  %v473_v42 = vld [vmem:[%s1073_s7 + $0x78] sm:$0xff] }
 0x171   : > { %v412_v45 = vpop.f32.mrb[0].mxu0 }
 0x172   : > { %v413_v46 = vadd.f32 %v412_v45, %v345_v44  ;;  %v715_v48 = vpop.f32.mrb[1].mxu0  ;;  %v474_v44 = vld [vmem:[%s1073_s7 + $0x80] sm:$0xff]  ;;  %v475_v45 = vld [vmem:[%s1073_s7 + $0x88] sm:$0xff] }
 0x174   : > { %v658_v49 = vmul.f32 -1.442695, %v413_v46  ;;  %v476_v46 = vld [vmem:[%s1073_s7 + $0x90] sm:$0xff] }
 0x176   : > { %789 = vpow2.f32 %v658_v49 }
 0x180   : > { %v790_v51 = vpop.eup %789 }
 0x181   : > { %v419_v53 = vadd.f32 1.0, %v790_v51 }
 0x183   : > { %791 = vrcp.f32 %v419_v53  ;;  %v479_v53 = vld [vmem:[%s1073_s7 + $0xa8] sm:$0xff] }
 0x18d   : > { %v792_v61 = vpop.eup %791 }
 0x18e   : > { %v425_v63 = vrot.slane %v792_v61, %v424_v59 }
 0x190   : > { %v426_v1 = vmul.f32 %v425_v63, %v1100_v10  ;;  %v427_v3 = vmul.f32 %v425_v63, %v1103_v11  ;;  %v428_v5 = vmul.f32 %v425_v63, %v1106_v12  ;;  %v429_v7 = vmul.f32 %v425_v63, %v1111_v15 }
 0x191   : > { %v430_v9 = vmul.f32 %v425_v63, %v1122_v19  ;;  %v431_v14 = vmul.f32 %v425_v63, %v1126_v22  ;;  %v432_v17 = vmul.f32 %v425_v63, %v1137_v26  ;;  %v433_v20 = vmul.f32 %v425_v63, %v1141_v29 }
 0x192   : > { %v434_v10 = vmul.f32 %v425_v63, %v1152_v33  ;;  %v435_v11 = vmul.f32 %v425_v63, %v1156_v36  ;;  %v436_v12 = vmul.f32 %v425_v63, %v1167_v40  ;;  %v437_v15 = vmul.f32 %v425_v63, %v1171_v43  ;;  %v458_v33 = vld [vmem:[%s1073_s7] sm:$0xff]  ;;  %v459_v36 = vld [vmem:[%s1073_s7 + $0x8] sm:$0xff]  ;;  %v460_v40 = vld [vmem:[%s1073_s7 + $0x10] sm:$0xff] }
 0x193   : > { %v1283_v19 = vmul.f32 %v425_v63, %v1182_v47  ;;  %v1286_v22 = vmul.f32 %v425_v63, %v1186_v50  ;;  %v1289_v26 = vmul.f32 %v425_v63, %v1191_v52  ;;  %v1292_v29 = vmul.f32 %v425_v63, %v1195_v54  ;;  %v461_v43 = vld [vmem:[%s1073_s7 + $0x18] sm:$0xff] }
 0x194   : > { %v1300_v47 = vmul.f32 %v425_v63, %v1199_v56  ;;  %v1303_v50 = vmul.f32 %v425_v63, %v1203_v58  ;;  %v1306_v52 = vmul.f32 %v425_v63, %v1207_v60  ;;  %v1309_v54 = vmul.f32 %v425_v63, %v1211_v62  ;;  %v466_v62 = vld [vmem:[%s1073_s7 + $0x40] sm:$0xff] }
 0x195   : > { %v1316_v32 = vmul.f32 %v425_v63, %v1215_v0  ;;  %v1319_v56 = vmul.f32 %v425_v63, %v1219_v2  ;;  %v1322_v58 = vmul.f32 %v425_v63, %v1223_v4  ;;  %v1325_v60 = vmul.f32 %v425_v63, %v1227_v6  ;;  %v469_v6 = vld [vmem:[%s1073_s7 + $0x58] sm:$0xff] }
 0x196   : > { %v1331_v37 = vmul.f32 %v425_v63, %v1231_v8  ;;  %v1334_v0 = vmul.f32 %v425_v63, %v1235_v13  ;;  %v1337_v2 = vmul.f32 %v425_v63, %v1239_v16  ;;  %v1340_v4 = vmul.f32 %v425_v63, %v1243_v18 }
 0x197   : > { %v1351_v8 = vmul.f32 %v425_v63, %v1247_v21  ;;  %v1354_v13 = vmul.f32 %v425_v63, %v1251_v24  ;;  %v1357_v16 = vmul.f32 %v425_v63, %v1255_v27  ;;  %v1360_v18 = vmul.f32 %v425_v63, %v1259_v30  ;;  %v477_v21 = vld [vmem:[%s1073_s7 + $0x98] sm:$0xff]  ;;  %v478_v27 = vld [vmem:[%s1073_s7 + $0xa0] sm:$0xff]  ;;  %v480_v30 = vld [vmem:[%s1073_s7 + $0xb0] sm:$0xff] }
 0x198   : > { %v490_v48 = vadd.f32 %v458_v33, %v426_v1  ;;  %v491_v49 = vadd.f32 %v459_v36, %v427_v3  ;;  %v492_v51 = vadd.f32 %v460_v40, %v428_v5  ;;  %v493_v24 = vadd.f32 %v461_v43, %v429_v7  ;;  %v481_v63 = vld [vmem:[%s1073_s7 + $0xb8] sm:$0xff]  ;;  %v483_v1 = vld [vmem:[%s1073_s7 + $0xc8] sm:$0xff]  ;;  %v488_v36 = vld [vmem:[%s1073_s7 + $0xf0] sm:$0xff] }
 0x199   : > { %1456 = vst [vmem:[#allocation8_spill] sm:$0xff] %v1360_v18  ;;  %v494_v55 = vadd.f32 %v462_v23, %v430_v9  ;;  %v495_v57 = vadd.f32 %v463_v25, %v431_v14  ;;  %v496_v59 = vadd.f32 %v464_v28, %v432_v17  ;;  %v497_v61 = vadd.f32 %v465_v31, %v433_v20  ;;  %v482_v18 = vld [vmem:[%s1073_s7 + $0xc0] sm:$0xff]  ;;  %v484_v9 = vld [vmem:[%s1073_s7 + $0xd0] sm:$0xff]  ;;  %v485_v14 = vld [vmem:[%s1073_s7 + $0xd8] sm:$0xff] }
 0x19a   : > { %v498_v3 = vadd.f32 %v466_v62, %v434_v10  ;;  %v499_v5 = vadd.f32 %v467_v34, %v435_v11  ;;  %v500_v7 = vadd.f32 %v468_v35, %v436_v12  ;;  %v501_v33 = vadd.f32 %v469_v6, %v437_v15  ;;  %522 = vst [vmem:[%s1348_s13] sm:$0xff] %v490_v48  ;;  %v486_v17 = vld [vmem:[%s1073_s7 + $0xe0] sm:$0xff]  ;;  %v487_v15 = vld [vmem:[%s1073_s7 + $0xe8] sm:$0xff]  ;;  %v489_v40 = vld [vmem:[%s1073_s7 + $0xf8] sm:$0xff] }
 0x19b   : > { %523 = vst [vmem:[%s1348_s13 + $0x8] sm:$0xff] %v491_v49  ;;  %524 = vst [vmem:[%s1348_s13 + $0x10] sm:$0xff] %v492_v51  ;;  %v502_v20 = vadd.f32 %v470_v38, %v1283_v19  ;;  %v503_v10 = vadd.f32 %v471_v39, %v1286_v22  ;;  %v504_v11 = vadd.f32 %v472_v41, %v1289_v26 }
 0x19c   : > { %525 = vst [vmem:[%s1348_s13 + $0x18] sm:$0xff] %v493_v24  ;;  %v505_v12 = vadd.f32 %v473_v42, %v1292_v29  ;;  %526 = vst [vmem:[%s1348_s13 + $0x20] sm:$0xff] %v494_v55  ;;  %v506_v19 = vadd.f32 %v474_v44, %v1300_v47  ;;  %v507_v22 = vadd.f32 %v475_v45, %v1303_v50 }
 0x19d   : > { %527 = vst [vmem:[%s1348_s13 + $0x28] sm:$0xff] %v495_v57  ;;  %528 = vst [vmem:[%s1348_s13 + $0x30] sm:$0xff] %v496_v59  ;;  %v508_v26 = vadd.f32 %v476_v46, %v1306_v52  ;;  %v509_v43 = vadd.f32 %v477_v21, %v1309_v54  ;;  %v510_v29 = vadd.f32 %v478_v27, %v1316_v32 }
 0x19e   : > { %529 = vst [vmem:[%s1348_s13 + $0x38] sm:$0xff] %v497_v61  ;;  %530 = vst [vmem:[%s1348_s13 + $0x40] sm:$0xff] %v498_v3  ;;  %v511_v23 = vadd.f32 %v479_v53, %v1319_v56  ;;  %v512_v47 = vadd.f32 %v480_v30, %v1322_v58  ;;  %v513_v50 = vadd.f32 %v481_v63, %v1325_v60 }
 0x19f   : > { %531 = vst [vmem:[%s1348_s13 + $0x48] sm:$0xff] %v499_v5  ;;  %532 = vst [vmem:[%s1348_s13 + $0x50] sm:$0xff] %v500_v7  ;;  %v514_v52 = vadd.f32 %v482_v18, %v1331_v37  ;;  %v515_v54 = vadd.f32 %v483_v1, %v1334_v0  ;;  %v516_v25 = vadd.f32 %v484_v9, %v1337_v2 }
 0x1a0   : > { %533 = vst [vmem:[%s1348_s13 + $0x58] sm:$0xff] %v501_v33  ;;  %534 = vst [vmem:[%s1348_s13 + $0x60] sm:$0xff] %v502_v20  ;;  %v517_v28 = vadd.f32 %v485_v14, %v1340_v4  ;;  %v518_v31 = vadd.f32 %v486_v17, %v1351_v8  ;;  %v519_v32 = vadd.f32 %v487_v15, %v1354_v13  ;;  %v1457_v58 = vld [vmem:[#allocation8_spill] sm:$0xff] }
 0x1a1   : > { %535 = vst [vmem:[%s1348_s13 + $0x68] sm:$0xff] %v503_v10  ;;  %536 = vst [vmem:[%s1348_s13 + $0x70] sm:$0xff] %v504_v11  ;;  %v520_v56 = vadd.f32 %v488_v36, %v1357_v16  ;;  %v521_v60 = vadd.f32 %v489_v40, %v1457_v58 }
 0x1a2   : > { %537 = vst [vmem:[%s1348_s13 + $0x78] sm:$0xff] %v505_v12  ;;  %538 = vst [vmem:[%s1348_s13 + $0x80] sm:$0xff] %v506_v19 }
 0x1a3   : > { %539 = vst [vmem:[%s1348_s13 + $0x88] sm:$0xff] %v507_v22  ;;  %540 = vst [vmem:[%s1348_s13 + $0x90] sm:$0xff] %v508_v26 }
 0x1a4   : > { %541 = vst [vmem:[%s1348_s13 + $0x98] sm:$0xff] %v509_v43  ;;  %542 = vst [vmem:[%s1348_s13 + $0xa0] sm:$0xff] %v510_v29 }
 0x1a5   : > { %543 = vst [vmem:[%s1348_s13 + $0xa8] sm:$0xff] %v511_v23  ;;  %544 = vst [vmem:[%s1348_s13 + $0xb0] sm:$0xff] %v512_v47 }
 0x1a6   : > { %545 = vst [vmem:[%s1348_s13 + $0xb8] sm:$0xff] %v513_v50  ;;  %546 = vst [vmem:[%s1348_s13 + $0xc0] sm:$0xff] %v514_v52 }
 0x1a7   : > { %547 = vst [vmem:[%s1348_s13 + $0xc8] sm:$0xff] %v515_v54  ;;  %548 = vst [vmem:[%s1348_s13 + $0xd0] sm:$0xff] %v516_v25 }
 0x1a8   : > { %549 = vst [vmem:[%s1348_s13 + $0xd8] sm:$0xff] %v517_v28  ;;  %550 = vst [vmem:[%s1348_s13 + $0xe0] sm:$0xff] %v518_v31 }
 0x1a9   : > { %551 = vst [vmem:[%s1348_s13 + $0xe8] sm:$0xff] %v519_v32  ;;  %552 = vst [vmem:[%s1348_s13 + $0xf0] sm:$0xff] %v520_v56 }
 0x1aa   : > { %553 = vst [vmem:[%s1348_s13 + $0xf8] sm:$0xff] %v521_v60 }
 0x1ab PF: > { %p17_p11 = scmp.ge.s32.totalorder %s947_s20, 4   ;;  %s1458_s15 = smov %s883_s16 }
 0x1ac   : > { %s1459_s16 = smov %s887_s17  ;;  %s1460_s17 = smov %s957_s23 }
 0x1ad   : > { %s1461_s18 = smov %s947_s20  ;;  %19 = sbr.rel (!%p17_p11) target bundleno = 5 (0x5), region = 89 }
 0x1b4   :  { %575 = vsyncpa [#allocation3], 1 }
 0x1b5   :  { %577 = vsyncpa [#allocation3 + $0x1], 1 }
 0x1b6   :  { %578 = vsyncpa [#allocation5], 1 }
 0x1b7   :  { %580 = vsyncpa [#allocation5 + $0x1], 1 }

// kernel: hg_block_forward.4
= control target key start
LH: loop header
LB: loop body
LE: loop exit
PB: predicated region body
PF: predicated region fallthrough
CT: control target
= control target key end

     0   :  { %s4816_s0 = inlined_call_operand.hbm [shape: f32[2,16,16,128], index: 0, kind: input, shape index: {}, may-alias: {0,1,2}]   ;;  %s4817_s1 = inlined_call_operand.hbm [shape: f32[2,16,16,128], index: 1, kind: input, shape index: {}, may-alias: {0,1,2}]   ;;  %s4818_s2 = inlined_call_operand.hbm [shape: f32[2,16,16,128], index: 2, kind: input, shape index: {}, may-alias: {0,1,2}]   ;;  %s4819_s3 = inlined_call_operand.hbm [shape: f32[3,384,128], index: 3, kind: input, shape index: {}]   ;;  %s4820_s4 = inlined_call_operand.hbm [shape: f32[1,128], index: 4, kind: input, shape index: {}]   ;;  %s4821_s5 = inlined_call_operand.hbm [shape: f32[1,128], index: 5, kind: input, shape index: {}]   ;;  %s4822_s6 = inlined_call_operand.hbm [shape: f32[2,16,16,128], index: 6, kind: output, shape index: {}]  }
   0x1   :  { %4854 = sst [smem:[#allocation36_spill]] %s4816_s0 }
   0x2   :  { %4855 = sst [smem:[#allocation37_spill]] %s4817_s1 }
   0x3   :  { %4856 = sst [smem:[#allocation38_spill]] %s4818_s2 }
   0x4   :  { %4857 = sst [smem:[#allocation39_spill]] %s4819_s3 }
   0x5   :  { %4858 = sst [smem:[#allocation40_spill]] %s4820_s4 }
   0x6   :  { %4859 = sst [smem:[#allocation41_spill]] %s4821_s5 }
   0x7   :  { %4860 = sst [smem:[#allocation42_spill]] %s4822_s6 }
   0x8   :  { %11 = vsyncpa [#allocation4], 0 }
   0x9   :  { %13 = vsyncpa [#allocation4 + $0x1], 0 }
   0xa   :  { %14 = vsyncpa [#allocation7], 0 }
   0xb   :  { %16 = vsyncpa [#allocation7 + $0x1], 0 }
   0xc   :  { %17 = vsyncpa [#allocation10], 0 }
   0xd   :  { %18 = vsyncpa [#allocation13], 0 }
   0xe   :  { %19 = vsyncpa [#allocation5], 0 }
   0xf   :  { %21 = vsyncpa [#allocation5 + $0x1], 0  ;;  %s3556_s21 = smov 0   ;;  %s3558_s22 = smov 0  }
  0x10   :  { %s3560_s23 = smov 0   ;;  %s3562_s24 = smov 0  }
  0x11   :  { %s3564_s25 = smov 0   ;;  %s3566_s26 = smov 0  }
  0x12   :  { %s3568_s27 = smov 0   ;;  %s3570_s28 = smov 0  }
  0x13   :  { %s3572_s29 = smov 0   ;;  %s3574_s30 = smov 0  }
  0x14   :  { %s3576_s7 = smov 0   ;;  %s3578_s8 = smov 0  }
  0x15   :  { %s3580_s9 = smov 0   ;;  %s3582_s10 = smov 0  }
  0x16 LB: > { %4861 = sst [smem:[#allocation21_spill]] %s3454_s21  ;;  %s3627_s11 = sadd.s32 4294967295, %s3506_s10   ;;  %s3506_s10 = sphi %s3582_s10, %s27_s10   ;;  %s3502_s9 = sphi %s3580_s9, %s4938_s9   ;;  %s3498_s8 = sphi %s3578_s8, %s4937_s8   ;;  %s3494_s7 = sphi %s3576_s7, %s4946_s7   ;;  %s3490_s30 = sphi %s3574_s30, %s4935_s30   ;;  %s3486_s29 = sphi %s3572_s29, %s4945_s29   ;;  %s3482_s28 = sphi %s3570_s28, %s4944_s28   ;;  %s3478_s27 = sphi %s3568_s27, %s4943_s27   ;;  %s3474_s26 = sphi %s3566_s26, %s4942_s26   ;;  %s3470_s25 = sphi %s3564_s25, %s4941_s25   ;;  %s3466_s24 = sphi %s3562_s24, %s4940_s24   ;;  %s3462_s23 = sphi %s3560_s23, %s4939_s23   ;;  %s3458_s22 = sphi %s3558_s22, %s4931_s22   ;;  %s3454_s21 = sphi %s3556_s21, %s4930_s21  }
  0x17   : > { %4862 = sst [smem:[#allocation22_spill]] %s3458_s22  ;;  %p2380_p0 = scmp.ge.s32.totalorder %s3506_s10, 1 }
  0x18   : > { %4863 = sst [smem:[#allocation23_spill]] %s3462_s23  ;;  %p4824_p1 = scmp.eq.s32.totalorder %s3627_s11, 0 }
  0x19   : > { %4864 = sst [smem:[#allocation24_spill]] %s3470_s25  ;;  %p235_p3 = scmp.lt.s32.totalorder %s3506_s10, 5 }
  0x1a   : > { %4865 = sst [smem:[#allocation25_spill]] %s3490_s30  ;;  %s3508_s13 = smov [#allocation9]  }
  0x1b   : > { %4866 = sst [smem:[#allocation26_spill]] %s3494_s7  ;;  %p3633_p4 = pnand %p2380_p0, %p235_p3 }
  0x1c   : > { %4867 = sst [smem:[#allocation27_spill]] %s3498_s8  ;;  %s247_s14 = sshll.u32 %s3508_s13, 4  ;;  %s248_s14 = int_to_ptr.vmem [resolvable:$true] %s247_s14 }
  0x1d   : > { %4868 = sst [smem:[#allocation28_spill]] %s3502_s9  ;;  %p3004_p5 = pneg %p3633_p4 }
  0x1e   : > { %s4869_s12 = scalar_select %p3633_p4, 1, 0 }
  0x1f   : > { %p3641_p6 = pnand %p3004_p5, %p4824_p1  ;;  %s4872_s3 = sld [smem:[#allocation39_spill]] }
  0x20   : > { %4870 = sst [smem:[#allocation29_spill]] %s4869_s12 }
  0x21   : > { %s4871_s15 = scalar_select %p3641_p6, 1, 0 }
  0x22   : > { %p3653_p8 = pneg %p3641_p6 }
  0x25   : > { %s3170_s18 = scalar_lea.hbm %s4872_s3, 18432 }
  0x26   : > { %p3171_p7 = scmp.ne.s32.totalorder %s4872_s3, %s3170_s18  ;;  %p3177_p11 = scmp.lt.u32.totalorder %s3170_s18, %s4872_s3 }
  0x28   : > { %p3173_p9 = pnand %p3653_p8, %p3171_p7 }
  0x2a   : > { %p3174_p10 = pneg %p3173_p9 }
  0x2c   : > { %p3179_p12 = pnand %p3177_p11, %p3174_p10 }
  0x2e   : > { %3182 = shalt.err (!%p3179_p12)
}
  0x2f   : > { %s3183_s16 = scalar_lea.vmem %s248_s14, 18432  ;;  %p3191_p5 = scmp.lt.s32.totalorder %s248_s14, %s248_s14 }
  0x30   : > { %p3184_p13 = scmp.ne.s32.totalorder %s248_s14, %s3183_s16  ;;  %p3192_p2 = scmp.lt.s32.totalorder %s3183_s16, %s3183_s16 }
  0x32   : > { %p3186_p0 = pnand %p3184_p13, %p3653_p8  ;;  %p3193_p1 = por %p3192_p2, %p3191_p5 }
  0x34   : > { %p3187_p3 = pneg %p3186_p0 }
  0x36   : > { %p3194_p4 = pnand %p3193_p1, %p3187_p3 }
  0x38   : > { %3197 = shalt.err (!%p3194_p4)
}
  0x39   : > { %s4829_s17 = smov 128   ;;  %s4831_s6 = smov 8  }
  0x3a   : > { %3007 = dma.hbm_to_vmem [thread:$0]  (!%p3641_p6), %s4872_s3, 18432, %s248_s14, [#allocation10], %s4829_s17, %s4829_s17, %s4831_s6  }
  0x3b   : > { %s36_s19 = sadd.s32 1, %s3498_s8  ;;  %s39_s20 = sadd.s32 1, %s3502_s9 }
  0x3c   : > { %p37_p1 = scmp.ge.s32.totalorder %s36_s19, 2  ;;  %p4845_p2 = scmp.eq.s32.totalorder %s3506_s10, 0 }
  0x3d   : > { %s2374_s16 = sshll.u32 %s3498_s8, 3  ;;  %s84_s30 = sadd.s32 1, %s3474_s26 }
  0x3e   : > { %s4948_s19 = smov (%p37_p1, %s36_s19), 0  ;;  %s4950_s20 = smov (!%p37_p1, %s39_s20), %s3502_s9 }
  0x3f   : > { %4874 = sst [smem:[#allocation30_spill]] %s4948_s19  ;;  %s44_s12 = ssub.s32 %s3498_s8, %s4948_s19 }
  0x40   : > { %s2375_s2 = sadd.s32 4294967295, %s2374_s16  ;;  %p41_p4 = scmp.ge.s32.totalorder %s4950_s20, 2 }
  0x41   : > { %p73_p7 = scmp.gt.s32.totalorder %s2375_s2, 0  ;;  %s2376_s14 = sshll.u32 %s4948_s19, 3 }
  0x42   : > { %p91_p9 = scmp.ne.s32.totalorder %s3474_s26, %s3470_s25  ;;  %s4952_s20 = smov (%p41_p4, %s4950_s20), 0 }
  0x43   : > { %4875 = sst [smem:[#allocation31_spill]] %s4952_s20  ;;  %s4954_s2 = smov (!%p73_p7, %s2375_s2), 0 }
  0x44   : > { %s3689_s7 = ssub.s32 %s3502_s9, %s4952_s20  ;;  %s2377_s18 = sadd.s32 4294967295, %s2376_s14 }
  0x45   : > { %4876 = sst [smem:[#allocation32_spill]] %s3689_s7  ;;  %s3692_s17 = sor.u32 %s44_s12, %s3689_s7 }
  0x46   : > { %p77_p10 = scmp.gt.s32.totalorder %s2377_s18, 0  ;;  %p3697_p12 = por %p91_p9, %p4845_p2 }
  0x47   : > { %p97_p13 = scmp.ne.s32.totalorder %s3470_s25, %s3466_s24  ;;  %s3703_s3 = sadd.s32 8, %s2374_s16 }
  0x48   : > { %s4956_s18 = smov (!%p77_p10, %s2377_s18), 0  ;;  %4878 = sst [smem:[#allocation33_spill]] %s3703_s3 }
  0x49   : > { %s80_s20 = ssub.s32 %s4954_s2, %s4956_s18  ;;  %p4879_p3 = scmp.eq.s32.totalorder %s3627_s11, 0 }
  0x4a   : > { %s81_s12 = sor.u32 %s80_s20, %s3689_s7  ;;  %s3713_s21 = sadd.s32 8, %s2376_s14 }
  0x4b   : > { %p3709_p5 = por %p97_p13, %p4879_p3  ;;  %p82_p1 = scmp.eq.s32.totalorder %s81_s12, 0 }
  0x4c   : > { %p4844_p7 = scmp.lt.s32.totalorder %s3506_s10, 4  ;;  %s3721_s16 = sshll.u32 %s3502_s9, 5 }
  0x4d   : > { %s4880_s19 = scalar_select %p3709_p5, 1, 0 }
  0x4e   : > { %s3718_s24 = scalar_select %p82_p1, %s3474_s26, %s84_s30  }
  0x4f   : > { %4881 = sst [smem:[#allocation34_spill]] %s4880_s19  ;;  %s307_s18 = sand.u32 1, %s3506_s10  }
  0x50   : > { %s309_s20 = sand.u32 1, %s3474_s26   ;;  %s2393_s7 = sshll.u32 %s4954_s2, 1 }
  0x51   : > { %s2390_s25 = sshll.u32 %s309_s20, 4  ;;  %s321_s22 = sadd.s32 %s2393_s7, %s3721_s16 }
  0x52   : > { %s2395_s3 = sshll.u32 %s321_s22, 7  ;;  %s311_s19 = scalar_lea.vmem [#allocation6], %s2390_s25 }
  0x53   : > { %s324_s12 = sshll.u32 %s311_s19, 4  ;;  %s4882_s1 = sld [smem:[#allocation37_spill]]  ;;  %s3731_s12 = int_to_ptr.vmem [resolvable:$true] %s324_s12 }
  0x54   : > { %p3737_p9 = pnand %p4844_p7, %p3697_p12  ;;  %s3511_s2 = smov [#allocation11]  }
  0x55   : > { %s261_s22 = sshll.u32 %s3511_s2, 4  ;;  %s3743_s0 = scalar_lea.sflag [#allocation7], %s307_s18  ;;  %s3741_s22 = int_to_ptr.vmem [resolvable:$true] %s261_s22 }
  0x56   : > { %p3200_p13 = pneg %p3737_p9 }
  0x59   : > { %s3729_s14 = scalar_lea.hbm %s4882_s1, %s2395_s3  ;;  %s3203_s6 = scalar_lea.hbm %s4882_s1, 8192 }
  0x5a   : > { %s3198_s3 = scalar_lea.hbm %s3729_s14, 256  ;;  %p3204_p12 = scmp.lt.u32.totalorder %s3729_s14, %s4882_s1 }
  0x5b   : > { %p3199_p10 = scmp.ne.s32.totalorder %s3729_s14, %s3198_s3  ;;  %p3205_p4 = scmp.lt.u32.totalorder %s3203_s6, %s3198_s3 }
  0x5c   : > { %p3207_p7 = scmp.lt.u32.totalorder %s3198_s3, %s3729_s14 }
  0x5d   : > { %p3201_p3 = pnand %p3200_p13, %p3199_p10  ;;  %p3206_p0 = por %p3205_p4, %p3204_p12 }
  0x5f   : > { %p3202_p1 = pneg %p3201_p3  ;;  %p3208_p2 = por %p3207_p7, %p3206_p0 }
  0x61   : > { %p3209_p11 = pnand %p3208_p2, %p3202_p1 }
  0x63   : > { %3212 = shalt.err (!%p3209_p11)
}
  0x64   : > { %s3213_s18 = scalar_lea.vmem %s3731_s12, 256  ;;  %s3512_s20 = smov [#allocation6]  }
  0x65   : > { %p3214_p10 = scmp.ne.s32.totalorder %s3731_s12, %s3213_s18  ;;  %s3218_s2 = sshll.u32 %s3512_s20, 4  ;;  %s3219_s2 = int_to_ptr.vmem [resolvable:$false] %s3218_s2 }
  0x66   : > { %s3220_s23 = scalar_lea.vmem %s3219_s2, 512  ;;  %p3221_p6 = scmp.lt.s32.totalorder %s3731_s12, %s3219_s2 }
  0x67   : > { %p3216_p3 = pnand %p3214_p10, %p3200_p13  ;;  %p3222_p4 = scmp.lt.s32.totalorder %s3220_s23, %s3213_s18 }
  0x69   : > { %p3217_p5 = pneg %p3216_p3  ;;  %p3223_p12 = por %p3222_p4, %p3221_p6 }
  0x6b   : > { %p3224_p0 = pnand %p3223_p12, %p3217_p5 }
  0x6d   : > { %3227 = shalt.err (!%p3224_p0)
}
  0x6e   : > { %s4884_s3 = smov 8   ;;  %s4885_s25 = smov 128  }
  0x6f   : > { %3020 = dma.hbm_to_vmem [thread:$0]  (!%p3737_p9), %s3729_s14, 256, %s3731_s12, %s3743_s0, %s4885_s25, %s4885_s25, %s4884_s3  }
  0x70   : > { %s4886_s4 = sld [smem:[#allocation40_spill]] }
  0x76   : > { %s3228_s7 = scalar_lea.hbm %s4886_s4, 16 }
  0x77   : > { %p3229_p6 = scmp.ne.s32.totalorder %s4886_s4, %s3228_s7  ;;  %p3235_p5 = scmp.lt.u32.totalorder %s3228_s7, %s4886_s4 }
  0x79   : > { %p3231_p2 = pnand %p3229_p6, %p3653_p8 }
  0x7b   : > { %p3232_p11 = pneg %p3231_p2 }
  0x7d   : > { %p3237_p7 = pnand %p3235_p5, %p3232_p11 }
  0x7f   : > { %3240 = shalt.err (!%p3237_p7)
}
  0x80   : > { %s3241_s12 = scalar_lea.vmem %s3741_s22, 16  ;;  %s3248_s14 = scalar_lea.vmem %s3741_s22, 32 }
  0x81   : > { %p3242_p9 = scmp.ne.s32.totalorder %s3741_s22, %s3241_s12  ;;  %p3249_p10 = scmp.lt.s32.totalorder %s3741_s22, %s3741_s22 }
  0x82   : > { %p3250_p3 = scmp.lt.s32.totalorder %s3248_s14, %s3241_s12 }
  0x83   : > { %p3244_p13 = pnand %p3242_p9, %p3653_p8 }
  0x84   : > { %p3251_p4 = por %p3250_p3, %p3249_p10 }
  0x85   : > { %p3245_p1 = pneg %p3244_p13 }
  0x87   : > { %p3252_p12 = pnand %p3251_p4, %p3245_p1 }
  0x89   : > { %3255 = shalt.err (!%p3252_p12)
}
  0x8a   : > { %p4887_p0 = scmp.ne.s32.totalorder %s4871_s15, 0  ;;  %s3513_s19 = smov [#allocation12]  }
  0x8b   : > { %s272_s7 = sshll.u32 %s3513_s19, 4  ;;  %s4888_s5 = sld [smem:[#allocation41_spill]]  ;;  %s273_s7 = int_to_ptr.vmem [resolvable:$true] %s272_s7 }
  0x8c   : > { %3010 = dma.hbm_to_vmem [thread:$0]  (!%p4887_p0), %s4886_s4, 16, %s3741_s22, [#allocation10]  }
  0x91   : > { %s3256_s30 = scalar_lea.hbm %s4888_s5, 16 }
  0x92   : > { %p3257_p6 = scmp.ne.s32.totalorder %s4888_s5, %s3256_s30  ;;  %p3263_p5 = scmp.lt.u32.totalorder %s3256_s30, %s4888_s5 }
  0x94   : > { %p3259_p2 = pnand %p3257_p6, %p3653_p8 }
  0x96   : > { %p3260_p11 = pneg %p3259_p2 }
  0x98   : > { %p3265_p7 = pnand %p3263_p5, %p3260_p11 }
  0x9a   : > { %3268 = shalt.err (!%p3265_p7)
}
  0x9b   : > { %s3269_s22 = scalar_lea.vmem %s273_s7, 16  ;;  %s3276_s23 = scalar_lea.vmem %s273_s7, 32 }
  0x9c   : > { %p3270_p9 = scmp.ne.s32.totalorder %s273_s7, %s3269_s22  ;;  %p3277_p10 = scmp.lt.s32.totalorder %s273_s7, %s273_s7 }
  0x9d   : > { %p3278_p3 = scmp.lt.s32.totalorder %s3276_s23, %s3269_s22 }
  0x9e   : > { %p3272_p13 = pnand %p3270_p9, %p3653_p8 }
  0x9f   : > { %p3279_p4 = por %p3278_p3, %p3277_p10 }
  0xa0   : > { %p3273_p1 = pneg %p3272_p13 }
  0xa2   : > { %p3280_p12 = pnand %p3279_p4, %p3273_p1 }
  0xa4   : > { %3283 = shalt.err (!%p3280_p12)
}
  0xa5   : > { %3013 = dma.hbm_to_vmem [thread:$0]  (!%p4887_p0), %s4888_s5, 16, %s273_s7, [#allocation13]  }
  0xa6   : > { %s2373_s1 = sadd.s32 4294967294, %s3506_s10   ;;  %s48_s15 = sadd.s32 1, %s3486_s29 }
  0xa7   : > { %p4889_p8 = scmp.eq.s32.totalorder %s3692_s17, 0  ;;  %p55_p6 = scmp.ne.s32.totalorder %s3486_s29, %s3482_s28 }
  0xa8   : > { %p61_p2 = scmp.ne.s32.totalorder %s3482_s28, %s3478_s27  ;;  %p228_p11 = scmp.eq.s32.totalorder %s2373_s1, 3 }
  0xa9   : > { %s3821_s13 = scalar_select %p4889_p8, %s3486_s29, %s48_s15  }
  0xaa   : > { %s283_s20 = sand.u32 1, %s3486_s29   ;;  %p4891_p5 = scmp.eq.s32.totalorder %s3506_s10, 0 }
  0xab   : > { %4890 = sst [smem:[#allocation35_spill]] %s3821_s13  ;;  %p4892_p9 = scmp.eq.s32.totalorder %s3627_s11, 0 }
  0xac   : > { %p57_p7 = por %p4891_p5, %p55_p6  ;;  %p4894_p1 = scmp.eq.s32.totalorder %s3627_s11, 3 }
  0xad   : > { %p3832_p13 = por %p4892_p9, %p61_p2  ;;  %p3842_p0 = por %p228_p11, %p61_p2 }
  0xae   : > { %p3838_p10 = por %p4894_p1, %p55_p6  ;;  %s2385_s30 = sshll.u32 %s283_s20, 7 }
  0xaf   : > { %s4896_s17 = scalar_select %p3842_p0, 1, 0 }
  0xb0   : > { %s4895_s7 = scalar_select %p3838_p10, 1, 0 }
  0xb1   : > { %s2418_s18 = sshll.u32 %s3498_s8, 4  ;;  %s287_s14 = scalar_lea.vmem [#allocation3], %s2385_s30 }
  0xb2   : > { %s294_s12 = sadd.s32 %s2418_s18, %s3721_s16  ;;  %s297_s22 = sshll.u32 %s287_s14, 4  ;;  %s3848_s22 = int_to_ptr.vmem [resolvable:$true] %s297_s22 }
  0xb3   : > { %s2389_s23 = sshll.u32 %s294_s12, 7  ;;  %s4897_s1 = sld [smem:[#allocation36_spill]] }
  0xb4   : > { %p4898_p3 = scmp.lt.s32.totalorder %s3506_s10, 4  ;;  %s3861_s30 = scalar_lea.sflag [#allocation4], %s283_s20 }
  0xb6   : > { %p3857_p4 = pnand %p4898_p3, %p57_p7 }
  0xb8   : > { %p3286_p8 = pneg %p3857_p4 }
  0xb9   : > { %s3853_s15 = scalar_lea.hbm %s4897_s1, %s2389_s23  ;;  %s3289_s23 = scalar_lea.hbm %s4897_s1, 8192 }
  0xba   : > { %s3284_s18 = scalar_lea.hbm %s3853_s15, 2048  ;;  %p3290_p11 = scmp.lt.u32.totalorder %s3853_s15, %s4897_s1 }
  0xbb   : > { %p3285_p12 = scmp.ne.s32.totalorder %s3853_s15, %s3284_s18  ;;  %p3291_p5 = scmp.lt.u32.totalorder %s3289_s23, %s3284_s18 }
  0xbc   : > { %p3293_p9 = scmp.lt.u32.totalorder %s3284_s18, %s3853_s15 }
  0xbd   : > { %p3287_p6 = pnand %p3286_p8, %p3285_p12  ;;  %p3292_p7 = por %p3291_p5, %p3290_p11 }
  0xbf   : > { %p3288_p2 = pneg %p3287_p6  ;;  %p3294_p1 = por %p3293_p9, %p3292_p7 }
  0xc1   : > { %p3295_p3 = pnand %p3294_p1, %p3288_p2 }
  0xc3   : > { %3298 = shalt.err (!%p3295_p3)
}
  0xc4   : > { %s3299_s20 = scalar_lea.vmem %s3848_s22, 2048  ;;  %s3514_s12 = smov [#allocation3]  }
  0xc5   : > { %p3300_p12 = scmp.ne.s32.totalorder %s3848_s22, %s3299_s20  ;;  %s3304_s14 = sshll.u32 %s3514_s12, 4  ;;  %s3305_s14 = int_to_ptr.vmem [resolvable:$false] %s3304_s14 }
  0xc6   : > { %s3306_s6 = scalar_lea.vmem %s3305_s14, 4096  ;;  %p3307_p10 = scmp.lt.s32.totalorder %s3848_s22, %s3305_s14 }
  0xc7   : > { %p3302_p6 = pnand %p3300_p12, %p3286_p8  ;;  %p3308_p11 = scmp.lt.s32.totalorder %s3306_s6, %s3299_s20 }
  0xc9   : > { %p3303_p0 = pneg %p3302_p6  ;;  %p3309_p5 = por %p3308_p11, %p3307_p10 }
  0xcb   : > { %p3310_p7 = pnand %p3309_p5, %p3303_p0 }
  0xcd   : > { %3313 = shalt.err (!%p3310_p7)
}
  0xce   : > { %s4900_s18 = sld [smem:[#allocation23_spill]]  ;;  %s4901_s23 = sld [smem:[#allocation33_spill]] }
  0xcf   : > { %s4902_s19 = sld [smem:[#allocation22_spill]]  ;;  %s4904_s20 = sld [smem:[#allocation32_spill]] }
  0xd0   : > { %s4903_s12 = sld [smem:[#allocation21_spill]]  ;;  %p4906_p0 = scmp.lt.s32.totalorder %s3713_s21, 15 }
  0xd1   : > { %3017 = dma.hbm_to_vmem [thread:$0]  (!%p3857_p4), %s3853_s15, 2048, %s3848_s22, %s3861_s30, %s4885_s25, %s4885_s25, %s4884_s3  }
  0xd2   : > { %s4960_s21 = smov (!%p4906_p0, %s3713_s21), 15  ;;  %p4907_p9 = scmp.eq.s32.totalorder %s3506_s10, 0 }
  0xd3   : > { %p4908_p12 = scmp.eq.s32.totalorder %s3627_s11, 0  ;;  %s4910_s13 = sld [smem:[#allocation38_spill]] }
  0xd4   : > { %s120_s4 = sadd.s32 1, %s4900_s18  ;;  %p4905_p10 = scmp.lt.s32.totalorder %s4901_s23, 15 }
  0xd5   : > { %p127_p8 = scmp.ne.s32.totalorder %s4900_s18, %s4902_s19  ;;  %s336_s6 = sand.u32 1, %s4900_s18  }
  0xd6   : > { %s4958_s23 = smov (!%p4905_p10, %s4901_s23), 15  ;;  %p133_p2 = scmp.ne.s32.totalorder %s4902_s19, %s4903_s12 }
  0xd7   : > { %s116_s14 = ssub.s32 %s4958_s23, %s4960_s21  ;;  %p129_p1 = por %p127_p8, %p4907_p9 }
  0xd8   : > { %s117_s1 = sor.u32 %s116_s14, %s4904_s20  ;;  %p3909_p6 = por %p133_p2, %p4908_p12 }
  0xd9   : > { %p118_p3 = scmp.eq.s32.totalorder %s117_s1, 0  ;;  %s2396_s22 = sshll.u32 %s336_s6, 4 }
  0xda   : > { %s4909_s5 = scalar_select %p3909_p6, 1, 0 }
  0xdb   : > { %s2398_s15 = sshll.u32 %s4958_s23, 1  ;;  %s4962_s18 = smov (!%p118_p3, %s4900_s18), %s120_s4 }
  0xdc   : > { %s348_s30 = sadd.s32 %s2398_s15, %s3721_s16  ;;  %s338_s8 = scalar_lea.vmem [#allocation8], %s2396_s22 }
  0xdd   : > { %s2400_s9 = sshll.u32 %s348_s30, 7  ;;  %s351_s19 = sshll.u32 %s338_s8, 4  ;;  %s3922_s19 = int_to_ptr.vmem [resolvable:$true] %s351_s19 }
  0xde   : > { %s3920_s20 = scalar_lea.hbm %s4910_s13, %s2400_s9  ;;  %p4911_p4 = scmp.lt.s32.totalorder %s3506_s10, 4 }
  0xdf   : > { %s3314_s16 = scalar_lea.hbm %s3920_s20, 256  ;;  %s3319_s23 = scalar_lea.hbm %s4910_s13, 8192 }
  0xe0   : > { %p3926_p11 = pnand %p4911_p4, %p129_p1  ;;  %p3315_p5 = scmp.ne.s32.totalorder %s3920_s20, %s3314_s16 }
  0xe1   : > { %p3320_p8 = scmp.lt.u32.totalorder %s3920_s20, %s4910_s13  ;;  %p3321_p2 = scmp.lt.u32.totalorder %s3319_s23, %s3314_s16 }
  0xe2   : > { %p3316_p7 = pneg %p3926_p11  ;;  %p3323_p1 = scmp.lt.u32.totalorder %s3314_s16, %s3920_s20 }
  0xe3   : > { %p3322_p9 = por %p3321_p2, %p3320_p8 }
  0xe4   : > { %p3317_p10 = pnand %p3316_p7, %p3315_p5 }
  0xe5   : > { %p3324_p3 = por %p3323_p1, %p3322_p9 }
  0xe6   : > { %p3318_p0 = pneg %p3317_p10 }
  0xe8   : > { %p3325_p12 = pnand %p3324_p3, %p3318_p0 }
  0xea   : > { %3328 = shalt.err (!%p3325_p12)
}
  0xeb   : > { %s3329_s6 = scalar_lea.vmem %s3922_s19, 256  ;;  %s3515_s22 = smov [#allocation8]  }
  0xec   : > { %p3330_p4 = scmp.ne.s32.totalorder %s3922_s19, %s3329_s6  ;;  %s3334_s15 = sshll.u32 %s3515_s22, 4  ;;  %s3335_s15 = int_to_ptr.vmem [resolvable:$false] %s3334_s15 }
  0xed   : > { %s3336_s30 = scalar_lea.vmem %s3335_s15, 512  ;;  %p3337_p6 = scmp.lt.s32.totalorder %s3922_s19, %s3335_s15 }
  0xee   : > { %p3332_p5 = pnand %p3330_p4, %p3316_p7  ;;  %p3338_p8 = scmp.lt.s32.totalorder %s3336_s30, %s3329_s6 }
  0xf0   : > { %p3333_p10 = pneg %p3332_p5  ;;  %p3339_p2 = por %p3338_p8, %p3337_p6 }
  0xf2   : > { %p3340_p9 = pnand %p3339_p2, %p3333_p10 }
  0xf4   : > { %3343 = shalt.err (!%p3340_p9)
}
  0xf5   : > { %3023 = dma.hbm_to_vmem [thread:$0]  (!%p3926_p11), %s3920_s20, 256, %s3922_s19, %s3743_s0, %s4885_s25, %s4885_s25, %s4884_s3  }
  0xf6   : > { %s4913_s12 = sld [smem:[#allocation29_spill]] }
  0xfc   : > { %p4914_p7 = scmp.ne.s32.totalorder %s4913_s12, 0 }
  0xfd   : > { %s3962_s21 = sand.u32 (!%p4914_p7), 1, %s3482_s28  }
  0xfe   : > { %363 = sbr.rel (%p4914_p7) target bundleno = 818 (0x332), region = 44  ;;  %s2402_s16 = sshll.u32 (!%p4914_p7), %s3962_s21, 7 }
  0xff   : > { %s366_s8 = scalar_lea.sflag (!%p4914_p7), [#allocation4], %s3962_s21  ;;  %s3968_s1 = scalar_lea.vmem (!%p4914_p7), [#allocation3], %s2402_s16 }
 0x105   : > { %3429 = dma.done.wait (%p3832_p13), %s366_s8, 2048  }
 0x106   : > { %3431 = vsyncadd (%p3832_p13), %s366_s8, 4294965248  ;;  %s4915_s0 = sld [smem:[#allocation24_spill]]  ;;  %s4916_s3 = sld [smem:[#allocation34_spill]] }
 0x107   : > { %s374_s25 = sand.u32 1, %s3627_s11  }
 0x108   : > { %s375_s9 = scalar_lea.sflag [#allocation7], %s374_s25 }
 0x10c   : > { %s376_s19 = sand.u32 1, %s4915_s0   ;;  %p4917_p6 = scmp.ne.s32.totalorder %s4916_s3, 0 }
 0x10d   : > { %s3976_s20 = sshll.u32 %s376_s19, 4 }
 0x10e   : > { %s378_s23 = scalar_lea.vmem [#allocation6], %s3976_s20 }
 0x10f   : > { %3433 = dma.done.wait (%p4917_p6), %s375_s9, 256  }
 0x110   : > { %3435 = vsyncadd (%p4917_p6), %s375_s9, 4294967040  ;;  %s4918_s4 = sld [smem:[#allocation22_spill]]  ;;  %p4919_p13 = scmp.ne.s32.totalorder %s4909_s5, 0 }
 0x116   : > { %s385_s14 = sand.u32 1, %s4918_s4  }
 0x117   : > { %s3984_s2 = sshll.u32 %s385_s14, 4 }
 0x118   : > { %s387_s6 = scalar_lea.vmem [#allocation8], %s3984_s2 }
 0x119   : > { %3437 = dma.done.wait (%p4919_p13), %s375_s9, 256  }
 0x11a   : > { %3439 = vsyncadd (%p4919_p13), %s375_s9, 4294967040  ;;  %p4920_p11 = scmp.eq.s32.totalorder %s3627_s11, 0 }
 0x11c   : > { %3441 = dma.done.wait (%p4920_p11), [#allocation10], 18448   ;;  %p4921_p0 = pmov %p4920_p11 }
 0x11e   : > { %3443 = vsyncadd (%p4921_p0), [#allocation10], 4294948848  ;;  %p4922_p1 = pmov %p4921_p0 }
 0x11f   : > { %p4923_p3 = pmov %p4921_p0 }
 0x120   : > { %3445 = dma.done.wait (%p4922_p1), [#allocation13], 16  }
 0x121   : > { %3447 = vsyncadd (%p4923_p3), [#allocation13], 4294967280  ;;  %s4924_s22 = sld [smem:[#allocation25_spill]]  ;;  %v3516_v0 = vmov 0.0|0.0   ;;  %v3517_v1 = vmov 0.0   ;;  %v595_v2 = vld [vmem:[#allocation9] sm:$0xff] }
 0x122   : > { %2744 = vmatprep.subr.bf16.mxu0 %v3516_v0  ;;  %450 = vst [vmem:[#allocation2 + $0x30] sm:$0x3] %v3517_v1  ;;  %448 = vst [vmem:[#allocation2] sm:$0x3] %v3517_v1  ;;  %v596_v3 = vld [vmem:[#allocation9 + $0x8] sm:$0xff]  ;;  %v627_v4 = vld [vmem:[#allocation9 + $0x100] sm:$0xff] }
 0x123   : > { %449 = vst [vmem:[#allocation2 + $0x18] sm:$0x3] %v3517_v1  ;;  %451 = vst [vmem:[#allocation2 + $0x48] sm:$0x3] %v3517_v1  ;;  %v2745_v5 = vpack.c.bf16 %v596_v3, %v595_v2  ;;  %v628_v6 = vld [vmem:[#allocation9 + $0x108] sm:$0xff]  ;;  %v597_v7 = vld [vmem:[#allocation9 + $0x10] sm:$0xff] }
 0x124   : > { %452 = vst [vmem:[#allocation2 + $0x60] sm:$0x3] %v3517_v1  ;;  %453 = vst [vmem:[#allocation2 + $0x78] sm:$0x3] %v3517_v1  ;;  %v598_v8 = vld [vmem:[#allocation9 + $0x18] sm:$0xff]  ;;  %v2792_v9 = vpack.c.bf16 %v628_v6, %v627_v4  ;;  %v629_v10 = vld [vmem:[#allocation9 + $0x110] sm:$0xff] }
 0x125   : > { %454 = vst [vmem:[#allocation2 + $0x90] sm:$0x3] %v3517_v1  ;;  %455 = vst [vmem:[#allocation2 + $0xa8] sm:$0x3] %v3517_v1  ;;  %v630_v11 = vld [vmem:[#allocation9 + $0x118] sm:$0xff]  ;;  %2746 = vmatpush1.bf16.msra.mxu0 %v2745_v5  ;;  %v2748_v12 = vpack.c.bf16 %v598_v8, %v597_v7  ;;  %v631_v14 = vld [vmem:[#allocation9 + $0x120] sm:$0xff] }
 0x126   : > { %456 = vst [vmem:[#allocation2 + $0xc0] sm:$0x3] %v3517_v1  ;;  %457 = vst [vmem:[#allocation2 + $0xd8] sm:$0x3] %v3517_v1  ;;  %v2796_v13 = vpack.c.bf16 %v630_v11, %v629_v10  ;;  %v632_v15 = vld [vmem:[#allocation9 + $0x128] sm:$0xff]  ;;  %2793 = vmatprep.subr.bf16.mxu1 %v2792_v9  ;;  %2747 = vmatprep.subr.bf16.mxu0 %v3516_v0  ;;  %v599_v16 = vld [vmem:[#allocation9 + $0x20] sm:$0xff] }
 0x127   : > { %p501_p12 = scmp.gt.s32.totalorder %s4924_s22, 0  ;;  %p509_p4 = scmp.lt.s32.totalorder %s4924_s22, 1  ;;  %458 = vst [vmem:[#allocation2 + $0x12] sm:$0x3f] %v3517_v1  ;;  %459 = vst [vmem:[#allocation2 + $0x2a] sm:$0x3f] %v3517_v1  ;;  %2795 = vmatpush3.bf16.msra.mxu1 %v2792_v9  ;;  %v2800_v18 = vpack.c.bf16 %v632_v15, %v631_v14 }
 0x128   : > { %460 = vst [vmem:[#allocation2 + $0x42] sm:$0x3f] %v3517_v1  ;;  %461 = vst [vmem:[#allocation2 + $0x5a] sm:$0x3f] %v3517_v1  ;;  %v600_v17 = vld [vmem:[#allocation9 + $0x28] sm:$0xff]  ;;  %2797 = vmatprep.subr.bf16.mxu1 %v2796_v13  ;;  %v633_v20 = vld [vmem:[#allocation9 + $0x130] sm:$0xff] }
 0x129   : > { %462 = vst [vmem:[#allocation2 + $0x72] sm:$0x3f] %v3517_v1  ;;  %463 = vst [vmem:[#allocation2 + $0x8a] sm:$0x3f] %v3517_v1  ;;  %2749 = vmatpush1.bf16.msra.mxu0 %v2748_v12  ;;  %v2751_v19 = vpack.c.bf16 %v600_v17, %v599_v16  ;;  %v634_v21 = vld [vmem:[#allocation9 + $0x138] sm:$0xff]  ;;  %v601_v22 = vld [vmem:[#allocation9 + $0x30] sm:$0xff] }
 0x12a   : > { %464 = vst [vmem:[#allocation2 + $0xa2] sm:$0x3f] %v3517_v1  ;;  %465 = vst [vmem:[#allocation2 + $0xba] sm:$0x3f] %v3517_v1  ;;  %2750 = vmatprep.subr.bf16.mxu0 %v3516_v0  ;;  %v602_v23 = vld [vmem:[#allocation9 + $0x38] sm:$0xff]  ;;  %v2804_v24 = vpack.c.bf16 %v634_v21, %v633_v20  ;;  %v470_v25 = vld [vmem:[%s3968_s1 + $0x10] sm:$0xff] }
 0x12b   : > { %466 = vst [vmem:[#allocation2 + $0xd2] sm:$0x3f] %v3517_v1  ;;  %467 = vst [vmem:[#allocation2 + $0xea] sm:$0x3f] %v3517_v1  ;;  %2799 = vmatpush3.bf16.msra.mxu1 %v2796_v13  ;;  %v2754_v26 = vpack.c.bf16 %v602_v23, %v601_v22  ;;  %v635_v27 = vld [vmem:[#allocation9 + $0x140] sm:$0xff]  ;;  %v636_v28 = vld [vmem:[#allocation9 + $0x148] sm:$0xff] }
 0x12c   : > { %2801 = vmatprep.subr.bf16.mxu1 %v2800_v18  ;;  %487 = vst [vmem:[#allocation2 + $0x32] sm:$0xff] %v470_v25  ;;  %v471_v29 = vld [vmem:[%s3968_s1 + $0x18] sm:$0xff]  ;;  %v603_v30 = vld [vmem:[#allocation9 + $0x40] sm:$0xff]  ;;  %v604_v31 = vld [vmem:[#allocation9 + $0x48] sm:$0xff]  ;;  %v2808_v32 = vpack.c.bf16 %v636_v28, %v635_v27  ;;  %s3158_s5 = scalar_select %p501_p12, 255, 0 }
 0x12d   : > { %2752 = vmatpush1.bf16.msra.mxu0 %v2751_v19  ;;  %488 = vst [vmem:[#allocation2 + $0x3a] sm:$0xff] %v471_v29  ;;  %v2757_v33 = vpack.c.bf16 %v604_v31, %v603_v30  ;;  %v637_v34 = vld [vmem:[#allocation9 + $0x150] sm:$0xff]  ;;  %v638_v35 = vld [vmem:[#allocation9 + $0x158] sm:$0xff]  ;;  %v639_v41 = vld [vmem:[#allocation9 + $0x160] sm:$0xff]  ;;  %s3164_s11 = scalar_select %p509_p4, 255, 0 }
 0x12e   : > { %2753 = vmatprep.subr.bf16.mxu0 %v3516_v0  ;;  %v605_v36 = vld [vmem:[#allocation9 + $0x50] sm:$0xff]  ;;  %v606_v37 = vld [vmem:[#allocation9 + $0x58] sm:$0xff]  ;;  %v2812_v38 = vpack.c.bf16 %v638_v35, %v637_v34  ;;  %v640_v42 = vld [vmem:[#allocation9 + $0x168] sm:$0xff]  ;;  %vm1456_vm0 = vcmask 1046528   ;;  %vm1988_vm1 = vcmask 1045504   ;;  %s4611_s15 = scalar_lea.vmem [#allocation14], %s2402_s16 }
 0x12f   : > { %2803 = vmatpush3.bf16.msra.mxu1 %v2800_v18  ;;  %v2760_v40 = vpack.c.bf16 %v606_v37, %v605_v36  ;;  %v472_v43 = vld [vmem:[%s3968_s1 + $0x20] sm:$0xff]  ;;  %v608_v45 = vld [vmem:[#allocation9 + $0x68] sm:$0xff]  ;;  %v2816_v47 = vpack.c.bf16 %v640_v42, %v639_v41  ;;  %v609_v48 = vld [vmem:[#allocation9 + $0x70] sm:$0xff]  ;;  %s4925_s30 = sld [smem:[#allocation26_spill]]  ;;  %s2419_s12 = sshll.u32 %s4924_s22, 4 }
 0x130   : > { %2805 = vmatprep.subr.bf16.mxu1 %v2804_v24  ;;  %v607_v44 = vld [vmem:[#allocation9 + $0x60] sm:$0xff]  ;;  %489 = vst [vmem:[#allocation2 + $0x4a] sm:$0xff] %v472_v43  ;;  %v473_v46 = vld [vmem:[%s3968_s1 + $0x28] sm:$0xff]  ;;  %v474_v49 = vld [vmem:[%s3968_s1 + $0x30] sm:$0xff]  ;;  %s2204_s0 = sshll.u32 %s4611_s15, 4  ;;  %s4926_s19 = sld [smem:[#allocation42_spill]]  ;;  %s4736_s0 = int_to_ptr.vmem [resolvable:$true] %s2204_s0 }
 0x131   : > { %2755 = vmatpush1.bf16.msra.mxu0 %v2754_v26  ;;  %490 = vst [vmem:[#allocation2 + $0x52] sm:$0xff] %v473_v46  ;;  %v2763_v50 = vpack.c.bf16 %v608_v45, %v607_v44  ;;  %v641_v51 = vld [vmem:[#allocation9 + $0x170] sm:$0xff]  ;;  %v642_v52 = vld [vmem:[#allocation9 + $0x178] sm:$0xff]  ;;  %491 = vst [vmem:[#allocation2 + $0x62] sm:$0xff] %v474_v49  ;;  %s2188_s9 = scalar_lea.sflag [#allocation5], %s3962_s21  ;;  %p4927_p10 = scmp.ne.s32.totalorder %s4895_s7, 0 }
 0x132   : > { %2756 = vmatprep.subr.bf16.mxu0 %v3516_v0  ;;  %v475_v53 = vld [vmem:[%s3968_s1 + $0x38] sm:$0xff]  ;;  %v468_v55 = vld [vmem:[%s3968_s1] sm:$0xff]  ;;  %v2820_v58 = vpack.c.bf16 %v642_v52, %v641_v51  ;;  %v469_v59 = vld [vmem:[%s3968_s1 + $0x8] sm:$0xff]  ;;  %s3518_s4 = smov [#allocation14]  }
 0x133   : > { %2807 = vmatpush3.bf16.msra.mxu1 %v2804_v24  ;;  %v4008_v39 = vld [vmem:[#allocation2 + $0x30] sm:$0xff]  ;;  %v610_v54 = vld [vmem:[#allocation9 + $0x78] sm:$0xff]  ;;  %492 = vst [vmem:[#allocation2 + $0x6a] sm:$0xff] %v475_v53  ;;  %485 = vst [vmem:[#allocation2 + $0x1a] sm:$0xff] %v468_v55  ;;  %s3348_s14 = sshll.u32 %s3518_s4, 4  ;;  %s3349_s14 = int_to_ptr.vmem [resolvable:$false] %s3348_s14 }
 0x134   : > { %2809 = vmatprep.subr.bf16.mxu1 %v2808_v32  ;;  %2572 = vmatprep.mubr.f32.mxu1 %v4008_v39  ;;  %v3159_v56 = vld [vmem:[%s378_s23] sm:%s3158_s5]  ;;  %v3162_v60 = vld [vmem:[%s378_s23 + $0x8] sm:%s3158_s5]  ;;  %v2766_v62 = vpack.c.bf16 %v610_v54, %v609_v48  ;;  %486 = vst [vmem:[#allocation2 + $0x22] sm:$0xff] %v469_v59  ;;  %s3344_s23 = scalar_lea.vmem %s4736_s0, 2048  ;;  %s3350_s2 = scalar_lea.vmem %s3349_s14, 4096 }
 0x135   : > { %2758 = vmatpush1.bf16.msra.mxu0 %v2757_v33  ;;  %517 = vst [vmem:[#allocation2 + $0x2] sm:$0xff] %v3159_v56  ;;  %v476_v57 = vld [vmem:[%s3968_s1 + $0x40] sm:$0xff]  ;;  %v477_v61 = vld [vmem:[%s3968_s1 + $0x48] sm:$0xff]  ;;  %518 = vst [vmem:[#allocation2 + $0xa] sm:$0xff] %v3162_v60  ;;  %s2414_s16 = sshll.u32 %s4925_s30, 5  ;;  %p3345_p5 = scmp.ne.s32.totalorder %s4736_s0, %s3344_s23 }
 0x136   : > { %2759 = vmatprep.subr.bf16.mxu0 %v3516_v0  ;;  %493 = vst [vmem:[#allocation2 + $0x7a] sm:$0xff] %v476_v57  ;;  %494 = vst [vmem:[#allocation2 + $0x82] sm:$0xff] %v477_v61  ;;  %v611_v63 = vld [vmem:[#allocation9 + $0x80] sm:$0xff]  ;;  %v612_v1 = vld [vmem:[#allocation9 + $0x88] sm:$0xff]  ;;  %s2201_s8 = sadd.s32 %s2419_s12, %s2414_s16  ;;  %p3351_p9 = scmp.lt.s32.totalorder %s4736_s0, %s3349_s14 }
 0x137   : > { %2811 = vmatpush3.bf16.msra.mxu1 %v2808_v32  ;;  %v478_v2 = vld [vmem:[%s3968_s1 + $0x50] sm:$0xff]  ;;  %v479_v3 = vld [vmem:[%s3968_s1 + $0x58] sm:$0xff]  ;;  %v1014_v4 = vld [vmem:[#allocation9 + $0x180] sm:$0xff]  ;;  %v2769_v7 = vpack.c.bf16 %v612_v1, %v611_v63  ;;  %p3346_p8 = pnand %p3345_p5, %p4927_p10  ;;  %p3352_p7 = scmp.lt.s32.totalorder %s3350_s2, %s3344_s23 }
 0x138   : > { %2813 = vmatprep.subr.bf16.mxu1 %v2812_v38  ;;  %495 = vst [vmem:[#allocation2 + $0x92] sm:$0xff] %v478_v2  ;;  %v1015_v5 = vld [vmem:[#allocation9 + $0x188] sm:$0xff]  ;;  %496 = vst [vmem:[#allocation2 + $0x9a] sm:$0xff] %v479_v3  ;;  %v480_v6 = vld [vmem:[%s3968_s1 + $0x60] sm:$0xff] }
 0x139   : > { %2761 = vmatpush1.bf16.msra.mxu0 %v2760_v40  ;;  %v613_v8 = vld [vmem:[#allocation9 + $0x90] sm:$0xff]  ;;  %497 = vst [vmem:[#allocation2 + $0xaa] sm:$0xff] %v480_v6  ;;  %v614_v9 = vld [vmem:[#allocation9 + $0x98] sm:$0xff]  ;;  %v481_v11 = vld [vmem:[%s3968_s1 + $0x68] sm:$0xff]  ;;  %v2825_v13 = vpack.c.bf16 %v1015_v5, %v1014_v4  ;;  %p3347_p2 = pneg %p3346_p8  ;;  %p3353_p6 = por %p3352_p7, %p3351_p9 }
 0x13a   : > { %2762 = vmatprep.subr.bf16.mxu0 %v3516_v0  ;;  %v4032_v10 = vld [vmem:[#allocation2 + $0x18] sm:$0xff]  ;;  %498 = vst [vmem:[#allocation2 + $0xb2] sm:$0xff] %v481_v11  ;;  %v1016_v14 = vld [vmem:[#allocation9 + $0x190] sm:$0xff]  ;;  %v1017_v15 = vld [vmem:[#allocation9 + $0x198] sm:$0xff]  ;;  %v2772_v17 = vpack.c.bf16 %v614_v9, %v613_v8 }
 0x13b   : > { %2815 = vmatpush3.bf16.msra.mxu1 %v2812_v38  ;;  %v4035_v12 = vld [vmem:[#allocation2 + $0x38] sm:$0xff]  ;;  %707 = vmatprep.mubr.f32.mxu0 %v4032_v10  ;;  %v4039_v16 = vld [vmem:[#allocation2 + $0x40] sm:$0xff]  ;;  %v615_v18 = vld [vmem:[#allocation9 + $0xa0] sm:$0xff]  ;;  %v2828_v22 = vpack.c.bf16 %v1017_v15, %v1016_v14  ;;  %p3354_p13 = pnand %p3353_p6, %p3347_p2 }
 0x13c   : > { %2817 = vmatprep.subr.bf16.mxu1 %v2816_v47  ;;  %v616_v19 = vld [vmem:[#allocation9 + $0xa8] sm:$0xff]  ;;  %v482_v20 = vld [vmem:[%s3968_s1 + $0x70] sm:$0xff]  ;;  %v483_v21 = vld [vmem:[%s3968_s1 + $0x78] sm:$0xff]  ;;  %s2415_s1 = sshll.u32 %s2201_s8, 7 }
 0x13d   : > { %2764 = vmatpush1.bf16.msra.mxu0 %v2763_v50  ;;  %v1018_v23 = vld [vmem:[#allocation9 + $0x1a0] sm:$0xff]  ;;  %v4048_v24 = vld [vmem:[#allocation2 + $0x48] sm:$0xff]  ;;  %499 = vst [vmem:[#allocation2 + $0xc2] sm:$0xff] %v482_v20  ;;  %500 = vst [vmem:[#allocation2 + $0xca] sm:$0xff] %v483_v21  ;;  %v2775_v28 = vpack.c.bf16 %v616_v19, %v615_v18  ;;  %s4734_s20 = scalar_lea.hbm %s4926_s19, %s2415_s1 }
 0x13e   : > { %2765 = vmatprep.subr.bf16.mxu0 %v3516_v0  ;;  %v1019_v25 = vld [vmem:[#allocation9 + $0x1a8] sm:$0xff]  ;;  %v4051_v26 = vld [vmem:[#allocation2 + $0x50] sm:$0xff]  ;;  %v617_v30 = vld [vmem:[#allocation9 + $0xb0] sm:$0xff] }
 0x13f   : > { %2819 = vmatpush3.bf16.msra.mxu1 %v2816_v47  ;;  %v3165_v27 = vld [vmem:[%s387_s6] sm:%s3164_s11]  ;;  %v3168_v29 = vld [vmem:[%s387_s6 + $0x8] sm:%s3164_s11]  ;;  %v2831_v32 = vpack.c.bf16 %v1019_v25, %v1018_v23 }
 0x140   : > { %2821 = vmatprep.subr.bf16.mxu1 %v2820_v58  ;;  %520 = vst [vmem:[#allocation2 + $0xda] sm:$0xff] %v3165_v27  ;;  %v618_v31 = vld [vmem:[#allocation9 + $0xb8] sm:$0xff]  ;;  %521 = vst [vmem:[#allocation2 + $0xe2] sm:$0xff] %v3168_v29  ;;  %v4060_v33 = vld [vmem:[#allocation2 + $0x58] sm:$0xff] }
 0x141   : > { %2767 = vmatpush1.bf16.msra.mxu0 %v2766_v62  ;;  %v1020_v34 = vld [vmem:[#allocation9 + $0x1b0] sm:$0xff]  ;;  %v1021_v35 = vld [vmem:[#allocation9 + $0x1b8] sm:$0xff]  ;;  %v2778_v37 = vpack.c.bf16 %v618_v31, %v617_v30  ;;  %v619_v38 = vld [vmem:[#allocation9 + $0xc0] sm:$0xff] }
 0x142   : > { %2768 = vmatprep.subr.bf16.mxu0 %v3516_v0  ;;  %v4063_v36 = vld [vmem:[#allocation2 + $0x60] sm:$0xff]  ;;  %v620_v40 = vld [vmem:[#allocation9 + $0xc8] sm:$0xff]  ;;  %v2834_v41 = vpack.c.bf16 %v1021_v35, %v1020_v34  ;;  %v4068_v42 = vld [vmem:[#allocation2 + $0x68] sm:$0xff] }
 0x143   : > { %2823 = vmatpush3.bf16.msra.mxu1 %v2820_v58  ;;  %v1022_v43 = vld [vmem:[#allocation9 + $0x1c0] sm:$0xff]  ;;  %v1023_v44 = vld [vmem:[#allocation9 + $0x1c8] sm:$0xff]  ;;  %v2781_v46 = vpack.c.bf16 %v620_v40, %v619_v38  ;;  %v621_v47 = vld [vmem:[#allocation9 + $0xd0] sm:$0xff] }
 0x144   : > { %2824 = vmatprep.subr.bf16.mxu1 %v3516_v0  ;;  %v4071_v45 = vld [vmem:[#allocation2 + $0x70] sm:$0xff]  ;;  %v622_v48 = vld [vmem:[#allocation9 + $0xd8] sm:$0xff]  ;;  %v2837_v49 = vpack.c.bf16 %v1023_v44, %v1022_v43  ;;  %v4076_v50 = vld [vmem:[#allocation2 + $0x78] sm:$0xff] }
 0x145   : > { %2770 = vmatpush1.bf16.msra.mxu0 %v2769_v7  ;;  %v1024_v51 = vld [vmem:[#allocation9 + $0x1d0] sm:$0xff]  ;;  %v1025_v52 = vld [vmem:[#allocation9 + $0x1d8] sm:$0xff]  ;;  %v2784_v54 = vpack.c.bf16 %v622_v48, %v621_v47  ;;  %v623_v55 = vld [vmem:[#allocation9 + $0xe0] sm:$0xff] }
 0x146   : > { %2573 = vmatmul.mubr.f32.vlgmr.msra.gmra.mrb[0].mxu1 %v4035_v12  ;;  %2771 = vmatprep.subr.bf16.mxu0 %v3516_v0  ;;  %v4079_v53 = vld [vmem:[#allocation2 + $0x80] sm:$0xff]  ;;  %v624_v56 = vld [vmem:[#allocation9 + $0xe8] sm:$0xff]  ;;  %v2840_v57 = vpack.c.bf16 %v1025_v52, %v1024_v51  ;;  %v4084_v58 = vld [vmem:[#allocation2 + $0x88] sm:$0xff] }
 0x147   : > { %2826 = vmatpush1.bf16.msra.mxu1 %v2825_v13  ;;  %2575 = vmatprep.mubr.f32.mxu1 %v4039_v16  ;;  %v1026_v59 = vld [vmem:[#allocation9 + $0x1e0] sm:$0xff]  ;;  %v1027_v60 = vld [vmem:[#allocation9 + $0x1e8] sm:$0xff]  ;;  %v2787_v62 = vpack.c.bf16 %v624_v56, %v623_v55  ;;  %v625_v63 = vld [vmem:[#allocation9 + $0xf0] sm:$0xff] }
 0x148   : > { %2827 = vmatprep.subr.bf16.mxu1 %v3516_v0  ;;  %v4087_v61 = vld [vmem:[#allocation2 + $0x90] sm:$0xff]  ;;  %v626_v1 = vld [vmem:[#allocation9 + $0xf8] sm:$0xff]  ;;  %v2843_v2 = vpack.c.bf16 %v1027_v60, %v1026_v59  ;;  %v4092_v3 = vld [vmem:[#allocation2 + $0x98] sm:$0xff] }
 0x149   : > { %2773 = vmatpush1.bf16.msra.mxu0 %v2772_v17  ;;  %v1046_v4 = vld [vmem:[#allocation9 + $0x280] sm:$0xff]  ;;  %v1047_v5 = vld [vmem:[#allocation9 + $0x288] sm:$0xff]  ;;  %v1028_v6 = vld [vmem:[#allocation9 + $0x1f0] sm:$0xff]  ;;  %v2790_v9 = vpack.c.bf16 %v626_v1, %v625_v63 }
 0x14a   : > { %2774 = vmatprep.subr.bf16.mxu0 %v3516_v0  ;;  %2576 = vmatmul.mubr.f32.gmra.mrb[2].mxu1 %v4048_v24  ;;  %v1029_v7 = vld [vmem:[#allocation9 + $0x1f8] sm:$0xff]  ;;  %v4095_v8 = vld [vmem:[#allocation2 + $0xa0] sm:$0xff]  ;;  %v2872_v11 = vpack.c.bf16 %v1047_v5, %v1046_v4  ;;  %v1030_v18 = vld [vmem:[#allocation9 + $0x200] sm:$0xff] }
 0x14b   : > { %2829 = vmatpush1.bf16.msra.mxu1 %v2828_v22  ;;  %2578 = vmatprep.mubr.f32.mxu1 %v4051_v26  ;;  %v2846_v13 = vpack.c.bf16 %v1029_v7, %v1028_v6  ;;  %v4100_v14 = vld [vmem:[#allocation2 + $0xa8] sm:$0xff]  ;;  %v1048_v15 = vld [vmem:[#allocation9 + $0x290] sm:$0xff]  ;;  %v1031_v19 = vld [vmem:[#allocation9 + $0x208] sm:$0xff] }
 0x14c   : > { %2830 = vmatprep.subr.bf16.mxu1 %v3516_v0  ;;  %v1049_v17 = vld [vmem:[#allocation9 + $0x298] sm:$0xff]  ;;  %v4103_v20 = vld [vmem:[#allocation2 + $0xb0] sm:$0xff]  ;;  %v4105_v21 = vld [vmem:[#allocation2] sm:$0xff]  ;;  %v2849_v25 = vpack.c.bf16 %v1031_v19, %v1030_v18 }
 0x14d   : > { %2776 = vmatpush1.bf16.msra.mxu0 %v2775_v28  ;;  %v4107_v22 = vld [vmem:[#allocation2 + $0x20] sm:$0xff]  ;;  %v2876_v23 = vpack.c.bf16 %v1049_v17, %v1048_v15  ;;  %v4111_v27 = vld [vmem:[#allocation2 + $0xb8] sm:$0xff]  ;;  %v1050_v28 = vld [vmem:[#allocation9 + $0x2a0] sm:$0xff] }
 0x14e   : > { %2777 = vmatprep.subr.bf16.mxu0 %v3516_v0  ;;  %2579 = vmatmul.mubr.f32.gmra.mrb[4].mxu1 %v4060_v33  ;;  %v1051_v29 = vld [vmem:[#allocation9 + $0x2a8] sm:$0xff]  ;;  %v1032_v30 = vld [vmem:[#allocation9 + $0x210] sm:$0xff]  ;;  %v1033_v31 = vld [vmem:[#allocation9 + $0x218] sm:$0xff] }
 0x14f   : > { %2832 = vmatpush1.bf16.msra.mxu1 %v2831_v32  ;;  %2581 = vmatprep.mubr.f32.mxu1 %v4063_v36  ;;  %v4115_v32 = vld [vmem:[#allocation2 + $0xc0] sm:$0xff]  ;;  %v4118_v34 = vld [vmem:[#allocation2 + $0x8] sm:$0xff]  ;;  %v2852_v38 = vpack.c.bf16 %v1033_v31, %v1032_v30  ;;  %v1034_v44 = vld [vmem:[#allocation9 + $0x220] sm:$0xff] }
 0x150   : > { %2833 = vmatprep.subr.bf16.mxu1 %v3516_v0  ;;  %v4120_v35 = vld [vmem:[#allocation2 + $0x28] sm:$0xff]  ;;  %v4128_v47 = vld [vmem:[#allocation2 + $0xd0] sm:$0xff]  ;;  %v4135_v52 = vld [vmem:[#allocation2 + $0xd8] sm:$0xff] }
 0x151   : > { %2779 = vmatpush1.bf16.msra.mxu0 %v2778_v37  ;;  %v2880_v37 = vpack.c.bf16 %v1051_v29, %v1050_v28  ;;  %v4124_v40 = vld [vmem:[#allocation2 + $0xc8] sm:$0xff]  ;;  %v4131_v48 = vld [vmem:[#allocation2 + $0x10] sm:$0xff]  ;;  %v1055_v55 = vld [vmem:[#allocation9 + $0x2c8] sm:$0xff] }
 0x152   : > { %2780 = vmatprep.subr.bf16.mxu0 %v3516_v0  ;;  %2582 = vmatmul.mubr.f32.gmra.mrb[6].mxu1 %v4068_v42  ;;  %v1053_v43 = vld [vmem:[#allocation9 + $0x2b8] sm:$0xff]  ;;  %v1036_v56 = vld [vmem:[#allocation9 + $0x230] sm:$0xff]  ;;  %v1038_v4 = vld [vmem:[#allocation9 + $0x240] sm:$0xff] }
 0x153   : > { %2835 = vmatpush1.bf16.msra.mxu1 %v2834_v41  ;;  %2584 = vmatprep.mubr.f32.mxu1 %v4071_v45  ;;  %v1052_v41 = vld [vmem:[#allocation9 + $0x2b0] sm:$0xff]  ;;  %v4144_v63 = vld [vmem:[#allocation2 + $0xe8] sm:$0xff]  ;;  %v1039_v5 = vld [vmem:[#allocation9 + $0x248] sm:$0xff] }
 0x154   : > { %2836 = vmatprep.subr.bf16.mxu1 %v3516_v0  ;;  %v4139_v59 = vld [vmem:[#allocation2 + $0xe0] sm:$0xff]  ;;  %v2861_v7 = vpack.c.bf16 %v1039_v5, %v1038_v4  ;;  %v1041_v15 = vld [vmem:[#allocation9 + $0x258] sm:$0xff]  ;;  %v1043_v28 = vld [vmem:[#allocation9 + $0x268] sm:$0xff] }
 0x155   : > { %2782 = vmatpush1.bf16.msra.mxu0 %v2781_v46  ;;  %v1035_v46 = vld [vmem:[#allocation9 + $0x228] sm:$0xff]  ;;  %v1056_v1 = vld [vmem:[#allocation9 + $0x2d0] sm:$0xff]  ;;  %v1578_v31 = vld [vmem:[#allocation9 + $0x400] sm:$0xff] }
 0x156   : > { %2783 = vmatprep.subr.bf16.mxu0 %v3516_v0  ;;  %2585 = vmatmul.mubr.f32.gmra.mrb[8].mxu1 %v4076_v50  ;;  %v2855_v51 = vpack.c.bf16 %v1035_v46, %v1034_v44  ;;  %v1060_v19 = vld [vmem:[#allocation9 + $0x2f0] sm:$0xff]  ;;  %v1546_v46 = vld [vmem:[#allocation9 + $0x300] sm:$0xff] }
 0x157   : > { %2838 = vmatpush1.bf16.msra.mxu1 %v2837_v49  ;;  %2587 = vmatprep.mubr.f32.mxu1 %v4079_v53  ;;  %v2884_v49 = vpack.c.bf16 %v1053_v43, %v1052_v41  ;;  %v1045_v41 = vld [vmem:[#allocation9 + $0x278] sm:$0xff]  ;;  %v1554_v5 = vld [vmem:[#allocation9 + $0x340] sm:$0xff] }
 0x158   : > { %2839 = vmatprep.subr.bf16.mxu1 %v3516_v0 }
 0x159   : > { %2785 = vmatpush1.bf16.msra.mxu0 %v2784_v54  ;;  %v1054_v54 = vld [vmem:[#allocation9 + $0x2c0] sm:$0xff] }
 0x15a   : > { %2786 = vmatprep.subr.bf16.mxu0 %v3516_v0  ;;  %2588 = vmatmul.mubr.f32.gmra.mrb[10].mxu1 %v4084_v58  ;;  %v2888_v60 = vpack.c.bf16 %v1055_v55, %v1054_v54  ;;  %v1548_v54 = vld [vmem:[#allocation9 + $0x310] sm:$0xff]  ;;  %v1549_v55 = vld [vmem:[#allocation9 + $0x318] sm:$0xff] }
 0x15b   : > { %2841 = vmatpush1.bf16.msra.mxu1 %v2840_v57  ;;  %2590 = vmatprep.mubr.f32.mxu1 %v4087_v61  ;;  %v1037_v57 = vld [vmem:[#allocation9 + $0x238] sm:$0xff] }
 0x15c   : > { %2842 = vmatprep.subr.bf16.mxu1 %v3516_v0 }
 0x15d   : > { %2788 = vmatpush1.bf16.msra.mxu0 %v2787_v62  ;;  %v2858_v62 = vpack.c.bf16 %v1037_v57, %v1036_v56  ;;  %v2908_v56 = vpack.c.bf16 %v1549_v55, %v1548_v54  ;;  %v1550_v57 = vld [vmem:[#allocation9 + $0x320] sm:$0xff] }
 0x15e   : > { %2789 = vmatprep.subr.bf16.mxu0 %v3516_v0  ;;  %2591 = vmatmul.mubr.f32.gmra.mrb[12].mxu1 %v4092_v3  ;;  %v1570_v55 = vld [vmem:[#allocation9 + $0x3c0] sm:$0xff] }
 0x15f   : > { %2844 = vmatpush1.bf16.msra.mxu1 %v2843_v2  ;;  %2593 = vmatprep.mubr.f32.mxu1 %v4095_v8  ;;  %v1057_v2 = vld [vmem:[#allocation9 + $0x2d8] sm:$0xff] }
 0x160   : > { %2845 = vmatprep.subr.bf16.mxu1 %v3516_v0  ;;  %v2892_v6 = vpack.c.bf16 %v1057_v2, %v1056_v1  ;;  %v1552_v1 = vld [vmem:[#allocation9 + $0x330] sm:$0xff]  ;;  %v1553_v2 = vld [vmem:[#allocation9 + $0x338] sm:$0xff] }
 0x161   : > { %2791 = vmatpush1.bf16.msra.mxu0 %v2790_v9  ;;  %v1058_v9 = vld [vmem:[#allocation9 + $0x2e0] sm:$0xff]  ;;  %v2914_v4 = vpack.c.bf16 %v1553_v2, %v1552_v1 }
 0x162   : > { %2594 = vmatmul.mubr.f32.gmra.mrb[14].mxu1 %v4100_v14  ;;  %2873 = vmatprep.subr.bf16.mxu0 %v2872_v11  ;;  %v1574_v2 = vld [vmem:[#allocation9 + $0x3e0] sm:$0xff] }
 0x163   : > { %2847 = vmatpush1.bf16.msra.mxu1 %v2846_v13  ;;  %2596 = vmatprep.mubr.f32.mxu1 %v4103_v20  ;;  %v1040_v13 = vld [vmem:[#allocation9 + $0x250] sm:$0xff] }
 0x164   : > { %708 = vmatmul.mubr.f32.vlgmr.msra.gmra.mrb[0].mxu0 %v4105_v21  ;;  %2848 = vmatprep.subr.bf16.mxu1 %v3516_v0  ;;  %v2864_v18 = vpack.c.bf16 %v1041_v15, %v1040_v13  ;;  %v1558_v15 = vld [vmem:[#allocation9 + $0x360] sm:$0xff] }
 0x165   : > { %712 = vmatprep.mubr.f32.mxu0 %v4107_v22  ;;  %2875 = vmatpush3.bf16.msra.mxu0 %v2872_v11  ;;  %v1059_v11 = vld [vmem:[#allocation9 + $0x2e8] sm:$0xff] }
 0x166   : > { %2597 = vmatmul.mubr.f32.gmra.mrb[16].mxu1 %v4111_v27  ;;  %2877 = vmatprep.subr.bf16.mxu0 %v2876_v23  ;;  %v2896_v17 = vpack.c.bf16 %v1059_v11, %v1058_v9  ;;  %v1556_v9 = vld [vmem:[#allocation9 + $0x350] sm:$0xff]  ;;  %v1557_v11 = vld [vmem:[#allocation9 + $0x358] sm:$0xff] }
 0x167   : > { %2850 = vmatpush1.bf16.msra.mxu1 %v2849_v25  ;;  %2599 = vmatprep.mubr.f32.mxu1 %v4115_v32  ;;  %v1042_v25 = vld [vmem:[#allocation9 + $0x260] sm:$0xff]  ;;  %v2920_v13 = vpack.c.bf16 %v1557_v11, %v1556_v9  ;;  %v1580_v9 = vld [vmem:[#allocation9 + $0x410] sm:$0xff]  ;;  %v1581_v11 = vld [vmem:[#allocation9 + $0x418] sm:$0xff] }
 0x168   : > { %713 = vmatmul.mubr.f32.gmra.mrb[2].mxu0 %v4118_v34  ;;  %2851 = vmatprep.subr.bf16.mxu1 %v3516_v0  ;;  %v2867_v30 = vpack.c.bf16 %v1043_v28, %v1042_v25  ;;  %v1562_v28 = vld [vmem:[#allocation9 + $0x380] sm:$0xff] }
 0x169   : > { %717 = vmatprep.mubr.f32.mxu0 %v4120_v35  ;;  %2879 = vmatpush3.bf16.msra.mxu0 %v2876_v23  ;;  %v1061_v23 = vld [vmem:[#allocation9 + $0x2f8] sm:$0xff] }
 0x16a   : > { %2600 = vmatmul.mubr.f32.gmra.mrb[18].mxu1 %v4124_v40  ;;  %2881 = vmatprep.subr.bf16.mxu0 %v2880_v37  ;;  %v2900_v29 = vpack.c.bf16 %v1061_v23, %v1060_v19  ;;  %v1560_v19 = vld [vmem:[#allocation9 + $0x370] sm:$0xff]  ;;  %v1561_v23 = vld [vmem:[#allocation9 + $0x378] sm:$0xff] }
 0x16b   : > { %2853 = vmatpush1.bf16.msra.mxu1 %v2852_v38  ;;  %2602 = vmatprep.mubr.f32.mxu1 %v4128_v47  ;;  %v1044_v38 = vld [vmem:[#allocation9 + $0x270] sm:$0xff]  ;;  %v2926_v25 = vpack.c.bf16 %v1561_v23, %v1560_v19  ;;  %v1585_v19 = vld [vmem:[#allocation9 + $0x438] sm:$0xff] }
 0x16c   : > { %718 = vmatmul.mubr.f32.gmra.mrb[4].mxu0 %v4131_v48  ;;  %2854 = vmatprep.subr.bf16.mxu1 %v3516_v0  ;;  %v2870_v44 = vpack.c.bf16 %v1045_v41, %v1044_v38  ;;  %v1566_v41 = vld [vmem:[#allocation9 + $0x3a0] sm:$0xff] }
 0x16d   : > { %722 = vmatprep.mubr.f32.mxu0 %v4008_v39  ;;  %2883 = vmatpush3.bf16.msra.mxu0 %v2880_v37  ;;  %v1579_v37 = vld [vmem:[#allocation9 + $0x408] sm:$0xff] }
 0x16e   : > { %2603 = vmatmul.mubr.f32.gmra.mrb[20].mxu1 %v4135_v52  ;;  %2885 = vmatprep.subr.bf16.mxu0 %v2884_v49  ;;  %v4160_v43 = vpack.c.bf16 %v1579_v37, %v1578_v31  ;;  %v1564_v31 = vld [vmem:[#allocation9 + $0x390] sm:$0xff]  ;;  %v1565_v37 = vld [vmem:[#allocation9 + $0x398] sm:$0xff] }
 0x16f   : > { %2856 = vmatpush1.bf16.msra.mxu1 %v2855_v51  ;;  %2605 = vmatprep.mubr.f32.mxu1 %v4139_v59  ;;  %v2932_v38 = vpack.c.bf16 %v1565_v37, %v1564_v31  ;;  %v1590_v37 = vld [vmem:[#allocation9 + $0x460] sm:$0xff] }
 0x170   : > { %723 = vmatmul.mubr.f32.gmra.mrb[6].mxu0 %v4032_v10  ;;  %2857 = vmatprep.subr.bf16.mxu1 %v3516_v0 }
 0x171   : > { %727 = vmatprep.mubr.f32.mxu0 %v4035_v12  ;;  %2887 = vmatpush3.bf16.msra.mxu0 %v2884_v49  ;;  %v1547_v49 = vld [vmem:[#allocation9 + $0x308] sm:$0xff] }
 0x172   : > { %2606 = vmatmul.mubr.f32.gmra.mrb[22].mxu1 %v4144_v63  ;;  %2889 = vmatprep.subr.bf16.mxu0 %v2888_v60  ;;  %v2905_v51 = vpack.c.bf16 %v1547_v49, %v1546_v46  ;;  %v1568_v49 = vld [vmem:[#allocation9 + $0x3b0] sm:$0xff] }
 0x173   : > { %2859 = vmatpush1.bf16.msra.mxu1 %v2858_v62  ;;  %1126 = vmatprep.mubr.f32.mxu1 %v4032_v10 }
 0x174   : > { %728 = vmatmul.mubr.f32.gmra.mrb[8].mxu0 %v4107_v22  ;;  %2860 = vmatprep.subr.bf16.mxu1 %v3516_v0 }
 0x175   : > { %732 = vmatprep.mubr.f32.mxu0 %v4039_v16  ;;  %2891 = vmatpush3.bf16.msra.mxu0 %v2888_v60  ;;  %v1551_v60 = vld [vmem:[#allocation9 + $0x328] sm:$0xff] }
 0x176   : > { %2893 = vmatprep.subr.bf16.mxu0 %v2892_v6  ;;  %v2911_v62 = vpack.c.bf16 %v1551_v60, %v1550_v57  ;;  %v1572_v60 = vld [vmem:[#allocation9 + $0x3d0] sm:$0xff] }
 0x177   : > { %2862 = vmatpush1.bf16.msra.mxu1 %v2861_v7 }
 0x178   : > { %733 = vmatmul.mubr.f32.gmra.mrb[10].mxu0 %v4120_v35  ;;  %2863 = vmatprep.subr.bf16.mxu1 %v3516_v0 }
 0x179   : > { %737 = vmatprep.mubr.f32.mxu0 %v4048_v24  ;;  %2895 = vmatpush3.bf16.msra.mxu0 %v2892_v6  ;;  %v1555_v6 = vld [vmem:[#allocation9 + $0x348] sm:$0xff] }
 0x17a   : > { %2897 = vmatprep.subr.bf16.mxu0 %v2896_v17  ;;  %v2917_v7 = vpack.c.bf16 %v1555_v6, %v1554_v5  ;;  %v1576_v6 = vld [vmem:[#allocation9 + $0x3f0] sm:$0xff] }
 0x17b   : > { %2865 = vmatpush1.bf16.msra.mxu1 %v2864_v18 }
 0x17c   : > { %738 = vmatmul.mubr.f32.gmra.mrb[12].mxu0 %v4008_v39  ;;  %2866 = vmatprep.subr.bf16.mxu1 %v3516_v0 }
 0x17d   : > { %742 = vmatprep.mubr.f32.mxu0 %v4051_v26  ;;  %2899 = vmatpush3.bf16.msra.mxu0 %v2896_v17  ;;  %v1559_v17 = vld [vmem:[#allocation9 + $0x368] sm:$0xff] }
 0x17e   : > { %2901 = vmatprep.subr.bf16.mxu0 %v2900_v29  ;;  %v2923_v18 = vpack.c.bf16 %v1559_v17, %v1558_v15  ;;  %v2956_v15 = vpack.c.bf16 %v1581_v11, %v1580_v9  ;;  %v1582_v17 = vld [vmem:[#allocation9 + $0x420] sm:$0xff] }
 0x17f   : > { %2868 = vmatpush1.bf16.msra.mxu1 %v2867_v30 }
 0x180   : > { %743 = vmatmul.mubr.f32.gmra.mrb[14].mxu0 %v4035_v12  ;;  %2869 = vmatprep.subr.bf16.mxu1 %v3516_v0 }
 0x181   : > { %747 = vmatprep.mubr.f32.mxu0 %v4060_v33  ;;  %2903 = vmatpush3.bf16.msra.mxu0 %v2900_v29  ;;  %v1563_v29 = vld [vmem:[#allocation9 + $0x388] sm:$0xff] }
 0x182   : > { %2953 = vmatprep.subr.bf16.mxu0 %v4160_v43  ;;  %v2929_v30 = vpack.c.bf16 %v1563_v29, %v1562_v28  ;;  %v1588_v29 = vld [vmem:[#allocation9 + $0x450] sm:$0xff] }
 0x183   : > { %2871 = vmatpush1.bf16.msra.mxu1 %v2870_v44  ;;  %v1567_v44 = vld [vmem:[#allocation9 + $0x3a8] sm:$0xff] }
 0x184   : > { %748 = vmatmul.mubr.f32.gmra.mrb[16].mxu0 %v4039_v16  ;;  %2904 = vmatprep.subr.bf16.mxu1 %v3516_v0  ;;  %v2935_v46 = vpack.c.bf16 %v1567_v44, %v1566_v41  ;;  %v1592_v44 = vld [vmem:[#allocation9 + $0x470] sm:$0xff] }
 0x185   : > { %752 = vmatprep.mubr.f32.mxu0 %v4063_v36 }
 0x186   : > { %1127 = vmatmul.mubr.f32.vlgmr.msra.gmra.mrb[24].mxu1 %v4105_v21 }
 0x187   : > { %2906 = vmatpush1.bf16.msra.mxu1 %v2905_v51  ;;  %1131 = vmatprep.mubr.f32.mxu1 %v4107_v22  ;;  %v1569_v51 = vld [vmem:[#allocation9 + $0x3b8] sm:$0xff] }
 0x188   : > { %753 = vmatmul.mubr.f32.gmra.mrb[18].mxu0 %v4048_v24  ;;  %2907 = vmatprep.subr.bf16.mxu1 %v3516_v0  ;;  %v2938_v54 = vpack.c.bf16 %v1569_v51, %v1568_v49  ;;  %v3169_v51 = vld [vmem:[#allocation2 + $0x30] sm:$0xff] }
 0x189   : > { %757 = vmatprep.mubr.f32.mxu0 %v4068_v42 }
 0x18a   : > { %1132 = vmatmul.mubr.f32.gmra.mrb[26].mxu1 %v4118_v34 }
 0x18b   : > { %1136 = vmatprep.mubr.f32.mxu1 %v4120_v35  ;;  %2909 = vmatpush1.bf16.msra.mxu1 %v2908_v56  ;;  %v1571_v56 = vld [vmem:[#allocation9 + $0x3c8] sm:$0xff] }
 0x18c   : > { %758 = vmatmul.mubr.f32.gmra.mrb[20].mxu0 %v4051_v26  ;;  %2910 = vmatprep.subr.bf16.mxu1 %v3516_v0  ;;  %v2941_v57 = vpack.c.bf16 %v1571_v56, %v1570_v55 }
 0x18d   : > { %762 = vmatprep.mubr.f32.mxu0 %v4071_v45 }
 0x18e   : > { %1137 = vmatmul.mubr.f32.gmra.mrb[28].mxu1 %v4131_v48 }
 0x18f   : > { %1141 = vmatprep.mubr.f32.mxu1 %v4008_v39  ;;  %2912 = vmatpush1.bf16.msra.mxu1 %v2911_v62  ;;  %v1573_v62 = vld [vmem:[#allocation9 + $0x3d8] sm:$0xff] }
 0x190   : > { %763 = vmatmul.mubr.f32.gmra.mrb[22].mxu0 %v4060_v33  ;;  %2913 = vmatprep.subr.bf16.mxu1 %v3516_v0  ;;  %v2944_v1 = vpack.c.bf16 %v1573_v62, %v1572_v60 }
 0x191   : > { %767 = vmatprep.mubr.f32.mxu0 %v4076_v50 }
 0x192   : > { %1142 = vmatmul.mubr.f32.gmra.mrb[30].mxu1 %v4032_v10 }
 0x193   : > { %1146 = vmatprep.mubr.f32.mxu1 %v4035_v12  ;;  %2915 = vmatpush1.bf16.msra.mxu1 %v2914_v4  ;;  %v1575_v4 = vld [vmem:[#allocation9 + $0x3e8] sm:$0xff] }
 0x194   : > { %768 = vmatmul.mubr.f32.gmra.mrb[24].mxu0 %v4063_v36  ;;  %2916 = vmatprep.subr.bf16.mxu1 %v3516_v0  ;;  %v2947_v5 = vpack.c.bf16 %v1575_v4, %v1574_v2 }
 0x195   : > { %772 = vmatprep.mubr.f32.mxu0 %v4079_v53 }
 0x196   : > { %1147 = vmatmul.mubr.f32.gmra.mrb[32].mxu1 %v4107_v22 }
 0x197   : > { %1151 = vmatprep.mubr.f32.mxu1 %v4039_v16  ;;  %2918 = vmatpush1.bf16.msra.mxu1 %v2917_v7  ;;  %v1577_v7 = vld [vmem:[#allocation9 + $0x3f8] sm:$0xff] }
 0x198   : > { %773 = vmatmul.mubr.f32.gmra.mrb[26].mxu0 %v4068_v42  ;;  %2919 = vmatprep.subr.bf16.mxu1 %v3516_v0 }
 0x199   : > { %777 = vmatprep.mubr.f32.mxu0 %v4084_v58 }
 0x19a   : > { %1152 = vmatmul.mubr.f32.gmra.mrb[34].mxu1 %v4120_v35 }
 0x19b   : > { %1156 = vmatprep.mubr.f32.mxu1 %v4048_v24  ;;  %2921 = vmatpush1.bf16.msra.mxu1 %v2920_v13  ;;  %v2950_v13 = vpack.c.bf16 %v1577_v7, %v1576_v6 }
 0x19c   : > { %778 = vmatmul.mubr.f32.gmra.mrb[28].mxu0 %v4071_v45  ;;  %2922 = vmatprep.subr.bf16.mxu1 %v3516_v0 }
 0x19d   : > { %782 = vmatprep.mubr.f32.mxu0 %v4087_v61 }
 0x19e   : > { %1157 = vmatmul.mubr.f32.gmra.mrb[36].mxu1 %v4008_v39 }
 0x19f   : > { %1161 = vmatprep.mubr.f32.mxu1 %v4051_v26  ;;  %2924 = vmatpush1.bf16.msra.mxu1 %v2923_v18  ;;  %v1583_v18 = vld [vmem:[#allocation9 + $0x428] sm:$0xff] }
 0x1a0   : > { %783 = vmatmul.mubr.f32.gmra.mrb[30].mxu0 %v4076_v50  ;;  %2925 = vmatprep.subr.bf16.mxu1 %v3516_v0 }
 0x1a1   : > { %787 = vmatprep.mubr.f32.mxu0 %v4092_v3 }
 0x1a2   : > { %1162 = vmatmul.mubr.f32.gmra.mrb[38].mxu1 %v4035_v12 }
 0x1a3   : > { %1166 = vmatprep.mubr.f32.mxu1 %v4060_v33  ;;  %2927 = vmatpush1.bf16.msra.mxu1 %v2926_v25  ;;  %v1587_v25 = vld [vmem:[#allocation9 + $0x448] sm:$0xff] }
 0x1a4   : > { %788 = vmatmul.mubr.f32.gmra.mrb[32].mxu0 %v4079_v53  ;;  %2928 = vmatprep.subr.bf16.mxu1 %v3516_v0 }
 0x1a5   : > { %792 = vmatprep.mubr.f32.mxu0 %v4095_v8 }
 0x1a6   : > { %1167 = vmatmul.mubr.f32.gmra.mrb[40].mxu1 %v4039_v16 }
 0x1a7   : > { %1171 = vmatprep.mubr.f32.mxu1 %v4063_v36  ;;  %2930 = vmatpush1.bf16.msra.mxu1 %v2929_v30  ;;  %v1589_v30 = vld [vmem:[#allocation9 + $0x458] sm:$0xff] }
 0x1a8   : > { %793 = vmatmul.mubr.f32.gmra.mrb[34].mxu0 %v4084_v58  ;;  %2931 = vmatprep.subr.bf16.mxu1 %v3516_v0  ;;  %v2972_v31 = vpack.c.bf16 %v1589_v30, %v1588_v29 }
 0x1a9   : > { %797 = vmatprep.mubr.f32.mxu0 %v4100_v14 }
 0x1aa   : > { %1172 = vmatmul.mubr.f32.gmra.mrb[42].mxu1 %v4048_v24 }
 0x1ab   : > { %1176 = vmatprep.mubr.f32.mxu1 %v4068_v42  ;;  %2933 = vmatpush1.bf16.msra.mxu1 %v2932_v38  ;;  %v1591_v38 = vld [vmem:[#allocation9 + $0x468] sm:$0xff] }
 0x1ac   : > { %798 = vmatmul.mubr.f32.gmra.mrb[36].mxu0 %v4087_v61  ;;  %2934 = vmatprep.subr.bf16.mxu1 %v3516_v0  ;;  %v2976_v41 = vpack.c.bf16 %v1591_v38, %v1590_v37 }
 0x1ad   : > { %802 = vmatprep.mubr.f32.mxu0 %v4103_v20 }
 0x1ae   : > { %1177 = vmatmul.mubr.f32.gmra.mrb[44].mxu1 %v4051_v26 }
 0x1af   : > { %1181 = vmatprep.mubr.f32.mxu1 %v4071_v45  ;;  %2936 = vmatpush1.bf16.msra.mxu1 %v2935_v46  ;;  %v1593_v46 = vld [vmem:[#allocation9 + $0x478] sm:$0xff] }
 0x1b0   : > { %803 = vmatmul.mubr.f32.gmra.mrb[38].mxu0 %v4092_v3  ;;  %2937 = vmatprep.subr.bf16.mxu1 %v3516_v0  ;;  %v2980_v49 = vpack.c.bf16 %v1593_v46, %v1592_v44 }
 0x1b1   : > { %807 = vmatprep.mubr.f32.mxu0 %v4111_v27 }
 0x1b2   : > { %1182 = vmatmul.mubr.f32.gmra.mrb[46].mxu1 %v4060_v33 }
 0x1b3   : > { %1186 = vmatprep.mubr.f32.mxu1 %v4076_v50  ;;  %2939 = vmatpush1.bf16.msra.mxu1 %v2938_v54 }
 0x1b4   : > { %808 = vmatmul.mubr.f32.gmra.mrb[40].mxu0 %v4095_v8  ;;  %2940 = vmatprep.subr.bf16.mxu1 %v3516_v0 }
 0x1b5   : > { %812 = vmatprep.mubr.f32.mxu0 %v4115_v32 }
 0x1b6   : > { %1187 = vmatmul.mubr.f32.gmra.mrb[48].mxu1 %v4063_v36 }
 0x1b7   : > { %1191 = vmatprep.mubr.f32.mxu1 %v4079_v53  ;;  %2942 = vmatpush1.bf16.msra.mxu1 %v2941_v57 }
 0x1b8   : > { %813 = vmatmul.mubr.f32.gmra.mrb[42].mxu0 %v4100_v14  ;;  %2943 = vmatprep.subr.bf16.mxu1 %v3516_v0 }
 0x1b9   : > { %817 = vmatprep.mubr.f32.mxu0 %v4124_v40 }
 0x1ba   : > { %1192 = vmatmul.mubr.f32.gmra.mrb[50].mxu1 %v4068_v42 }
 0x1bb   : > { %1196 = vmatprep.mubr.f32.mxu1 %v4084_v58  ;;  %2945 = vmatpush1.bf16.msra.mxu1 %v2944_v1 }
 0x1bc   : > { %818 = vmatmul.mubr.f32.gmra.mrb[44].mxu0 %v4103_v20  ;;  %2946 = vmatprep.subr.bf16.mxu1 %v3516_v0 }
 0x1bd   : > { %822 = vmatprep.mubr.f32.mxu0 %v4128_v47 }
 0x1be   : > { %1197 = vmatmul.mubr.f32.gmra.mrb[52].mxu1 %v4071_v45 }
 0x1bf   : > { %1201 = vmatprep.mubr.f32.mxu1 %v4087_v61  ;;  %2948 = vmatpush1.bf16.msra.mxu1 %v2947_v5 }
 0x1c0   : > { %823 = vmatmul.mubr.f32.gmra.mrb[46].mxu0 %v4111_v27  ;;  %2949 = vmatprep.subr.bf16.mxu1 %v3516_v0  ;;  %v2960_v0 = vpack.c.bf16 %v1583_v18, %v1582_v17 }
 0x1c1   : > { %2640 = vmatprep.mubr.f32.mxu0 %v4008_v39  ;;  %v1584_v39 = vld [vmem:[#allocation9 + $0x430] sm:$0xff] }
 0x1c2   : > { %1202 = vmatmul.mubr.f32.gmra.mrb[54].mxu1 %v4076_v50  ;;  %v2964_v23 = vpack.c.bf16 %v1585_v19, %v1584_v39 }
 0x1c3   : > { %1206 = vmatprep.mubr.f32.mxu1 %v4092_v3  ;;  %2951 = vmatpush1.bf16.msra.mxu1 %v2950_v13 }
 0x1c4   : > { %2641 = vmatmul.mubr.f32.vlgmr.msra.gmra.mrb[48].mxu0 %v4035_v12 }
 0x1c5   : > { %2643 = vmatprep.mubr.f32.mxu0 %v4039_v16  ;;  %2955 = vmatpush3.bf16.msra.mxu0 %v4160_v43  ;;  %v1586_v43 = vld [vmem:[#allocation9 + $0x440] sm:$0xff] }
 0x1c6   : > { %1207 = vmatmul.mubr.f32.gmra.mrb[56].mxu1 %v4079_v53  ;;  %2957 = vmatprep.subr.bf16.mxu0 %v2956_v15  ;;  %v2968_v28 = vpack.c.bf16 %v1587_v25, %v1586_v43 }
 0x1c7   : > { %1211 = vmatprep.mubr.f32.mxu1 %v4095_v8 }
 0x1c8   : > { %2644 = vmatmul.mubr.f32.gmra.mrb[50].mxu0 %v4048_v24 }
 0x1c9   : > { %2646 = vmatprep.mubr.f32.mxu0 %v4051_v26  ;;  %2959 = vmatpush3.bf16.msra.mxu0 %v2956_v15 }
 0x1ca   : > { %1212 = vmatmul.mubr.f32.gmra.mrb[58].mxu1 %v4084_v58  ;;  %2961 = vmatprep.subr.bf16.mxu0 %v2960_v0 }
 0x1cb   : > { %1216 = vmatprep.mubr.f32.mxu1 %v4100_v14 }
 0x1cc   : > { %2647 = vmatmul.mubr.f32.gmra.mrb[52].mxu0 %v4060_v33 }
 0x1cd   : > { %2649 = vmatprep.mubr.f32.mxu0 %v4063_v36  ;;  %2963 = vmatpush3.bf16.msra.mxu0 %v2960_v0 }
 0x1ce   : > { %1217 = vmatmul.mubr.f32.gmra.mrb[60].mxu1 %v4087_v61  ;;  %2965 = vmatprep.subr.bf16.mxu0 %v2964_v23 }
 0x1cf   : > { %1221 = vmatprep.mubr.f32.mxu1 %v4103_v20 }
 0x1d0   : > { %2650 = vmatmul.mubr.f32.gmra.mrb[54].mxu0 %v4068_v42 }
 0x1d1   : > { %2652 = vmatprep.mubr.f32.mxu0 %v4071_v45  ;;  %2967 = vmatpush3.bf16.msra.mxu0 %v2964_v23 }
 0x1d2   : > { %1222 = vmatmul.mubr.f32.gmra.mrb[62].mxu1 %v4092_v3  ;;  %2969 = vmatprep.subr.bf16.mxu0 %v2968_v28 }
 0x1d3   : > { %1226 = vmatprep.mubr.f32.mxu1 %v4111_v27 }
 0x1d4   : > { %2653 = vmatmul.mubr.f32.gmra.mrb[56].mxu0 %v4076_v50 }
 0x1d5   : > { %2655 = vmatprep.mubr.f32.mxu0 %v4079_v53  ;;  %2971 = vmatpush3.bf16.msra.mxu0 %v2968_v28 }
 0x1d6   : > { %1227 = vmatmul.mubr.f32.gmra.mrb[64].mxu1 %v4095_v8  ;;  %2973 = vmatprep.subr.bf16.mxu0 %v2972_v31 }
 0x1d7   : > { %1231 = vmatprep.mubr.f32.mxu1 %v4115_v32 }
 0x1d8   : > { %2656 = vmatmul.mubr.f32.gmra.mrb[58].mxu0 %v4084_v58 }
 0x1d9   : > { %2658 = vmatprep.mubr.f32.mxu0 %v4087_v61  ;;  %2975 = vmatpush3.bf16.msra.mxu0 %v2972_v31 }
 0x1da   : > { %1232 = vmatmul.mubr.f32.gmra.mrb[66].mxu1 %v4100_v14  ;;  %2977 = vmatprep.subr.bf16.mxu0 %v2976_v41 }
 0x1db   : > { %1236 = vmatprep.mubr.f32.mxu1 %v4124_v40 }
 0x1dc   : > { %2659 = vmatmul.mubr.f32.gmra.mrb[60].mxu0 %v4092_v3 }
 0x1dd   : > { %2661 = vmatprep.mubr.f32.mxu0 %v4095_v8  ;;  %2979 = vmatpush3.bf16.msra.mxu0 %v2976_v41 }
 0x1de   : > { %1237 = vmatmul.mubr.f32.gmra.mrb[68].mxu1 %v4103_v20  ;;  %2981 = vmatprep.subr.bf16.mxu0 %v2980_v49 }
 0x1df   : > { %1241 = vmatprep.mubr.f32.mxu1 %v4128_v47 }
 0x1e0   : > { %2662 = vmatmul.mubr.f32.gmra.mrb[62].mxu0 %v4100_v14 }
 0x1e1   : > { %2664 = vmatprep.mubr.f32.mxu0 %v4103_v20  ;;  %2983 = vmatpush3.bf16.msra.mxu0 %v2980_v49 }
 0x1e2   : > { %1242 = vmatmul.mubr.f32.gmra.mrb[70].mxu1 %v4111_v27 }
 0x1e3   : > { %1658 = vmatprep.mubr.f32.mxu1 %v4032_v10 }
 0x1e4   : > { %2665 = vmatmul.mubr.f32.gmra.mrb[64].mxu0 %v4111_v27 }
 0x1e5   : > { %2667 = vmatprep.mubr.f32.mxu0 %v4115_v32 }
 0x1e6   : > { %1659 = vmatmul.mubr.f32.vlgmr.msra.gmra.mrb[72].mxu1 %v4105_v21 }
 0x1e7   : > { %1663 = vmatprep.mubr.f32.mxu1 %v4107_v22 }
 0x1e8   : > { %2668 = vmatmul.mubr.f32.gmra.mrb[66].mxu0 %v4124_v40 }
 0x1e9   : > { %2670 = vmatprep.mubr.f32.mxu0 %v4128_v47 }
 0x1ea   : > { %1664 = vmatmul.mubr.f32.gmra.mrb[74].mxu1 %v4118_v34 }
 0x1eb   : > { %1668 = vmatprep.mubr.f32.mxu1 %v4120_v35 }
 0x1ec   : > { %2671 = vmatmul.mubr.f32.gmra.mrb[68].mxu0 %v4135_v52 }
 0x1ed   : > { %2673 = vmatprep.mubr.f32.mxu0 %v4139_v59 }
 0x1ee   : > { %1669 = vmatmul.mubr.f32.gmra.mrb[76].mxu1 %v4131_v48 }
 0x1ef   : > { %1673 = vmatprep.mubr.f32.mxu1 %v3169_v51 }
 0x1f0   : > { %2674 = vmatmul.mubr.f32.gmra.mrb[70].mxu0 %v4144_v63 }
 0x1f1   : > { %2708 = vmatprep.mubr.f32.mxu0 %v3169_v51 }
 0x1f2   : > { %1674 = vmatmul.mubr.f32.gmra.mrb[78].mxu1 %v4032_v10 }
 0x1f3   : > { %1678 = vmatprep.mubr.f32.mxu1 %v4035_v12 }
 0x1f4   : > { %2709 = vmatmul.mubr.f32.vlgmr.msra.gmra.mrb[72].mxu0 %v4035_v12 }
 0x1f5   : > { %2711 = vmatprep.mubr.f32.mxu0 %v4039_v16 }
 0x1f6   : > { %1679 = vmatmul.mubr.f32.gmra.mrb[80].mxu1 %v4107_v22 }
 0x1f7   : > { %1683 = vmatprep.mubr.f32.mxu1 %v4039_v16 }
 0x1f8   : > { %2712 = vmatmul.mubr.f32.gmra.mrb[74].mxu0 %v4048_v24 }
 0x1f9   : > { %2714 = vmatprep.mubr.f32.mxu0 %v4051_v26 }
 0x1fa   : > { %1684 = vmatmul.mubr.f32.gmra.mrb[82].mxu1 %v4120_v35 }
 0x1fb   : > { %1688 = vmatprep.mubr.f32.mxu1 %v4048_v24 }
 0x1fc   : > { %2715 = vmatmul.mubr.f32.gmra.mrb[76].mxu0 %v4060_v33 }
 0x1fd   : > { %2717 = vmatprep.mubr.f32.mxu0 %v4063_v36 }
 0x1fe   : > { %1689 = vmatmul.mubr.f32.gmra.mrb[84].mxu1 %v3169_v51 }
 0x1ff   : > { %1693 = vmatprep.mubr.f32.mxu1 %v4051_v26 }
 0x200   : > { %2718 = vmatmul.mubr.f32.gmra.mrb[78].mxu0 %v4068_v42 }
 0x201   : > { %2720 = vmatprep.mubr.f32.mxu0 %v4071_v45 }
 0x202   : > { %1694 = vmatmul.mubr.f32.gmra.mrb[86].mxu1 %v4035_v12 }
 0x203   : > { %1698 = vmatprep.mubr.f32.mxu1 %v4060_v33 }
 0x204   : > { %2721 = vmatmul.mubr.f32.gmra.mrb[80].mxu0 %v4076_v50 }
 0x205   : > { %2723 = vmatprep.mubr.f32.mxu0 %v4079_v53 }
 0x206   : > { %1699 = vmatmul.mubr.f32.gmra.mrb[88].mxu1 %v4039_v16 }
 0x207   : > { %1703 = vmatprep.mubr.f32.mxu1 %v4063_v36 }
 0x208   : > { %2724 = vmatmul.mubr.f32.gmra.mrb[82].mxu0 %v4084_v58 }
 0x209   : > { %2726 = vmatprep.mubr.f32.mxu0 %v4087_v61 }
 0x20a   : > { %1704 = vmatmul.mubr.f32.gmra.mrb[90].mxu1 %v4048_v24 }
 0x20b   : > { %1708 = vmatprep.mubr.f32.mxu1 %v4068_v42 }
 0x20c   : > { %2727 = vmatmul.mubr.f32.gmra.mrb[84].mxu0 %v4092_v3 }
 0x20d   : > { %2729 = vmatprep.mubr.f32.mxu0 %v4095_v8 }
 0x20e   : > { %1709 = vmatmul.mubr.f32.gmra.mrb[92].mxu1 %v4051_v26 }
 0x20f   : > { %1713 = vmatprep.mubr.f32.mxu1 %v4071_v45 }
 0x210   : > { %2730 = vmatmul.mubr.f32.gmra.mrb[86].mxu0 %v4100_v14 }
 0x211   : > { %2732 = vmatprep.mubr.f32.mxu0 %v4103_v20 }
 0x212   : > { %1714 = vmatmul.mubr.f32.gmra.mrb[94].mxu1 %v4060_v33 }
 0x213   : > { %1718 = vmatprep.mubr.f32.mxu1 %v4076_v50 }
 0x214   : > { %2733 = vmatmul.mubr.f32.gmra.mrb[88].mxu0 %v4111_v27 }
 0x215   : > { %2735 = vmatprep.mubr.f32.mxu0 %v4115_v32 }
 0x216   : > { %1719 = vmatmul.mubr.f32.gmra.mrb[96].mxu1 %v4063_v36 }
 0x217   : > { %1723 = vmatprep.mubr.f32.mxu1 %v4079_v53 }
 0x218   : > { %2736 = vmatmul.mubr.f32.gmra.mrb[90].mxu0 %v4124_v40 }
 0x219   : > { %v2574_v10 = vpop.f32.mrb[0].mxu1  ;;  %2738 = vmatprep.mubr.f32.mxu0 %v4128_v47 }
 0x21a   : > { %v894_v12 = vpop.f32.mrb[1].mxu1  ;;  %1724 = vmatmul.mubr.f32.gmra.mrb[98].mxu1 %v4068_v42 }
 0x21b   : > { %1728 = vmatprep.mubr.f32.mxu1 %v4084_v58 }
 0x21c   : > { %2739 = vmatmul.mubr.f32.gmra.mrb[92].mxu0 %v4135_v52 }
 0x21d   : > { %v2577_v16 = vpop.f32.mrb[2].mxu1  ;;  %2741 = vmatprep.mubr.f32.mxu0 %v4139_v59 }
 0x21e   : > { %1729 = vmatmul.mubr.f32.gmra.mrb[100].mxu1 %v4071_v45  ;;  %v904_v24 = vpop.f32.mrb[3].mxu1 }
 0x21f   : > { %1733 = vmatprep.mubr.f32.mxu1 %v4087_v61 }
 0x220   : > { %2742 = vmatmul.mubr.f32.gmra.mrb[94].mxu0 %v4144_v63 }
 0x221   : > { %v2580_v26 = vpop.f32.mrb[4].mxu1 }
 0x222   : > { %1734 = vmatmul.mubr.f32.gmra.mrb[102].mxu1 %v4076_v50  ;;  %v914_v33 = vpop.f32.mrb[5].mxu1 }
 0x223   : > { %1738 = vmatprep.mubr.f32.mxu1 %v4092_v3 }
 0x225   : > { %v2583_v36 = vpop.f32.mrb[6].mxu1 }
 0x226   : > { %1739 = vmatmul.mubr.f32.gmra.mrb[104].mxu1 %v4079_v53  ;;  %v924_v42 = vpop.f32.mrb[7].mxu1 }
 0x227   : > { %1743 = vmatprep.mubr.f32.mxu1 %v4095_v8 }
 0x229   : > { %v2586_v21 = vpop.f32.mrb[8].mxu1 }
 0x22a   : > { %1744 = vmatmul.mubr.f32.gmra.mrb[106].mxu1 %v4084_v58  ;;  %v934_v45 = vpop.f32.mrb[9].mxu1 }
 0x22b   : > { %1748 = vmatprep.mubr.f32.mxu1 %v4100_v14 }
 0x22d   : > { %v4343_v22 = vpop.f32.mrb[10].mxu1 }
 0x22e   : > { %1749 = vmatmul.mubr.f32.gmra.mrb[108].mxu1 %v4087_v61  ;;  %v944_v50 = vpop.f32.mrb[11].mxu1 }
 0x22f   : > { %1753 = vmatprep.mubr.f32.mxu1 %v4103_v20 }
 0x231   : > { %v4347_v34 = vpop.f32.mrb[12].mxu1 }
 0x232   : > { %1754 = vmatmul.mubr.f32.gmra.mrb[110].mxu1 %v4092_v3  ;;  %v4350_v53 = vpop.f32.mrb[13].mxu1 }
 0x233   : > { %1758 = vmatprep.mubr.f32.mxu1 %v4111_v27 }
 0x235   : > { %v4353_v35 = vpop.f32.mrb[14].mxu1 }
 0x236   : > { %1759 = vmatmul.mubr.f32.gmra.mrb[112].mxu1 %v4095_v8  ;;  %v4356_v58 = vpop.f32.mrb[15].mxu1 }
 0x237   : > { %v709_v48 = vpop.f32.mrb[0].mxu0  ;;  %1763 = vmatprep.mubr.f32.mxu1 %v4115_v32 }
 0x238   : > { %v4359_v61 = vadd.f32 %v894_v12, %v709_v48  ;;  %v711_v52 = vpop.f32.mrb[1].mxu0 }
 0x239   : > { %v4361_v59 = vpop.f32.mrb[16].mxu1 }
 0x23a   : > { %1764 = vmatmul.mubr.f32.gmra.mrb[114].mxu1 %v4100_v14  ;;  %v4364_v3 = vpop.f32.mrb[17].mxu1 }
 0x23b   : > { %v714_v63 = vpop.f32.mrb[2].mxu0  ;;  %1768 = vmatprep.mubr.f32.mxu1 %v4124_v40 }
 0x23c   : > { %v4367_v54 = vadd.f32 %v2574_v10, %v714_v63  ;;  %v716_v8 = vpop.f32.mrb[3].mxu0 }
 0x23d   : > { %v4369_v55 = vpop.f32.mrb[18].mxu1 }
 0x23e   : > { %1769 = vmatmul.mubr.f32.gmra.mrb[116].mxu1 %v4103_v20  ;;  %v4372_v32 = vpop.f32.mrb[19].mxu1 }
 0x23f   : > { %v719_v56 = vpop.f32.mrb[4].mxu0  ;;  %1773 = vmatprep.mubr.f32.mxu1 %v4128_v47 }
 0x240   : > { %v4375_v57 = vadd.f32 %v904_v24, %v719_v56  ;;  %v721_v14 = vpop.f32.mrb[5].mxu0 }
 0x241   : > { %v4377_v60 = vpop.f32.mrb[20].mxu1 }
 0x242   : > { %1774 = vmatmul.mubr.f32.gmra.mrb[118].mxu1 %v4111_v27  ;;  %v4380_v40 = vpop.f32.mrb[21].mxu1 }
 0x243   : > { %v724_v62 = vpop.f32.mrb[6].mxu0 }
 0x244   : > { %v4382_v1 = vadd.f32 %v2577_v16, %v724_v62  ;;  %v726_v2 = vpop.f32.mrb[7].mxu0 }
 0x245   : > { %v4384_v4 = vpop.f32.mrb[22].mxu1 }
 0x246   : > { %v4386_v20 = vpop.f32.mrb[23].mxu1 }
 0x247   : > { %v729_v5 = vpop.f32.mrb[8].mxu0 }
 0x248   : > { %v4388_v6 = vadd.f32 %v914_v33, %v729_v5  ;;  %v731_v47 = vpop.f32.mrb[9].mxu0 }
 0x24b   : > { %v734_v7 = vpop.f32.mrb[10].mxu0 }
 0x24c   : > { %v4390_v9 = vadd.f32 %v2580_v26, %v734_v7  ;;  %v736_v11 = vpop.f32.mrb[11].mxu0 }
 0x24f   : > { %v739_v13 = vpop.f32.mrb[12].mxu0 }
 0x250   : > { %v4392_v27 = vadd.f32 %v924_v42, %v739_v13  ;;  %v741_v15 = vpop.f32.mrb[13].mxu0 }
 0x253   : > { %v744_v17 = vpop.f32.mrb[14].mxu0 }
 0x254   : > { %v4394_v18 = vadd.f32 %v2583_v36, %v744_v17  ;;  %v746_v0 = vpop.f32.mrb[15].mxu0 }
 0x257   : > { %v749_v39 = vpop.f32.mrb[16].mxu0 }
 0x258   : > { %v4396_v19 = vadd.f32 %v934_v45, %v749_v39  ;;  %v751_v23 = vpop.f32.mrb[17].mxu0 }
 0x259   : > { %v4398_v43 = vpop.f32.mrb[24].mxu1 }
 0x25a   : > { %v1130_v25 = vpop.f32.mrb[25].mxu1 }
 0x25b   : > { %v754_v28 = vpop.f32.mrb[18].mxu0 }
 0x25c   : > { %v4400_v29 = vadd.f32 %v2586_v21, %v754_v28  ;;  %v756_v30 = vpop.f32.mrb[19].mxu0 }
 0x25d   : > { %v4402_v31 = vpop.f32.mrb[26].mxu1 }
 0x25e   : > { %v1135_v37 = vpop.f32.mrb[27].mxu1 }
 0x25f   : > { %v759_v38 = vpop.f32.mrb[20].mxu0 }
 0x260   : > { %v4404_v41 = vadd.f32 %v944_v50, %v759_v38  ;;  %v761_v44 = vpop.f32.mrb[21].mxu0 }
 0x261   : > { %v4406_v46 = vpop.f32.mrb[28].mxu1 }
 0x262   : > { %v1140_v49 = vpop.f32.mrb[29].mxu1 }
 0x263   : > { %v764_v51 = vpop.f32.mrb[22].mxu0 }
 0x264   : > { %v4409_v10 = vadd.f32 %v4343_v22, %v764_v51  ;;  %v766_v12 = vpop.f32.mrb[23].mxu0 }
 0x265   : > { %v4411_v16 = vpop.f32.mrb[30].mxu1 }
 0x266   : > { %v1145_v24 = vpop.f32.mrb[31].mxu1 }
 0x267   : > { %v769_v26 = vpop.f32.mrb[24].mxu0 }
 0x268   : > { %v4414_v33 = vadd.f32 %v4350_v53, %v769_v26  ;;  %v771_v36 = vpop.f32.mrb[25].mxu0 }
 0x269   : > { %v4416_v42 = vpop.f32.mrb[32].mxu1 }
 0x26a   : > { %v1150_v21 = vpop.f32.mrb[33].mxu1 }
 0x26b   : > { %v774_v45 = vpop.f32.mrb[26].mxu0 }
 0x26c   : > { %v4419_v50 = vadd.f32 %v4347_v34, %v774_v45  ;;  %v776_v48 = vpop.f32.mrb[27].mxu0 }
 0x26d   : > { %v4421_v52 = vpop.f32.mrb[34].mxu1 }
 0x26e   : > { %v1155_v22 = vpop.f32.mrb[35].mxu1 }
 0x26f   : > { %v779_v63 = vpop.f32.mrb[28].mxu0 }
 0x270   : > { %v4424_v8 = vadd.f32 %v4356_v58, %v779_v63  ;;  %v781_v56 = vpop.f32.mrb[29].mxu0 }
 0x271   : > { %v4426_v14 = vpop.f32.mrb[36].mxu1 }
 0x272   : > { %v1160_v53 = vpop.f32.mrb[37].mxu1 }
 0x273   : > { %v784_v62 = vpop.f32.mrb[30].mxu0 }
 0x274   : > { %v4429_v2 = vadd.f32 %v4353_v35, %v784_v62  ;;  %v786_v5 = vpop.f32.mrb[31].mxu0 }
 0x275   : > { %v4431_v47 = vpop.f32.mrb[38].mxu1 }
 0x276   : > { %v1165_v34 = vpop.f32.mrb[39].mxu1 }
 0x277   : > { %v789_v7 = vpop.f32.mrb[32].mxu0 }
 0x278   : > { %v4434_v11 = vadd.f32 %v4364_v3, %v789_v7  ;;  %v791_v13 = vpop.f32.mrb[33].mxu0 }
 0x279   : > { %v4436_v15 = vpop.f32.mrb[40].mxu1 }
 0x27a   : > { %v1170_v58 = vpop.f32.mrb[41].mxu1 }
 0x27b   : > { %v794_v17 = vpop.f32.mrb[34].mxu0 }
 0x27c   : > { %v4439_v0 = vadd.f32 %v4361_v59, %v794_v17  ;;  %v796_v39 = vpop.f32.mrb[35].mxu0 }
 0x27d   : > { %v4441_v23 = vpop.f32.mrb[42].mxu1 }
 0x27e   : > { %v1175_v35 = vpop.f32.mrb[43].mxu1 }
 0x27f   : > { %v799_v25 = vpop.f32.mrb[36].mxu0 }
 0x280   : > { %v4444_v28 = vadd.f32 %v4372_v32, %v799_v25  ;;  %v801_v30 = vpop.f32.mrb[37].mxu0 }
 0x281   : > { %v4446_v37 = vpop.f32.mrb[44].mxu1 }
 0x282   : > { %v1180_v3 = vpop.f32.mrb[45].mxu1 }
 0x283   : > { %v804_v38 = vpop.f32.mrb[38].mxu0 }
 0x284   : > { %v4449_v44 = vadd.f32 %v4369_v55, %v804_v38  ;;  %v806_v49 = vpop.f32.mrb[39].mxu0 }
 0x285   : > { %v4451_v51 = vpop.f32.mrb[46].mxu1 }
 0x286   : > { %v1185_v59 = vpop.f32.mrb[47].mxu1 }
 0x287   : > { %v809_v12 = vpop.f32.mrb[40].mxu0 }
 0x288   : > { %v4454_v24 = vadd.f32 %v4380_v40, %v809_v12  ;;  %v811_v26 = vpop.f32.mrb[41].mxu0 }
 0x289   : > { %v4456_v36 = vpop.f32.mrb[48].mxu1 }
 0x28a   : > { %v1190_v32 = vpop.f32.mrb[49].mxu1 }
 0x28b   : > { %v814_v21 = vpop.f32.mrb[42].mxu0 }
 0x28c   : > { %v4459_v45 = vadd.f32 %v4377_v60, %v814_v21  ;;  %v816_v48 = vpop.f32.mrb[43].mxu0 }
 0x28d   : > { %v4461_v22 = vpop.f32.mrb[50].mxu1 }
 0x28e   : > { %v1195_v55 = vpop.f32.mrb[51].mxu1 }
 0x28f   : > { %v819_v63 = vpop.f32.mrb[44].mxu0 }
 0x290   : > { %v4464_v56 = vadd.f32 %v4386_v20, %v819_v63  ;;  %v821_v53 = vpop.f32.mrb[45].mxu0 }
 0x291   : > { %v4466_v62 = vpop.f32.mrb[52].mxu1 }
 0x292   : > { %v1200_v40 = vpop.f32.mrb[53].mxu1 }
 0x293   : > { %v824_v5 = vpop.f32.mrb[46].mxu0 }
 0x294   : > { %v4469_v34 = vadd.f32 %v4384_v4, %v824_v5  ;;  %v826_v7 = vpop.f32.mrb[47].mxu0 }
 0x295   : > { %v4471_v13 = vpop.f32.mrb[54].mxu1 }
 0x296   : > { %v1205_v60 = vpop.f32.mrb[55].mxu1 }
 0x297   : > { %v2642_v58 = vpop.f32.mrb[48].mxu0 }
 0x298   : > { %v1319_v17 = vadd.f32 %v2642_v58, %v4402_v31  ;;  %v1313_v39 = vpop.f32.mrb[49].mxu0 }
 0x299   : > { %v4474_v35 = vpop.f32.mrb[56].mxu1  ;;  %v1314_v20 = vadd.f32 %v1313_v39, %v4398_v43 }
 0x29a   : > { %v1458_v25 = vrot.slane %v1319_v17, 1  ;;  %v1210_v30 = vpop.f32.mrb[57].mxu1 }
 0x29b   : > { %v1457_v3 = vrot.slane %v1314_v20, 1  ;;  %v2645_v38 = vpop.f32.mrb[50].mxu0 }
 0x29c   : > { %v1329_v4 = vadd.f32 %v2645_v38, %v4411_v16  ;;  %v1323_v49 = vpop.f32.mrb[51].mxu0 }
 0x29d   : > { %v1459_v59 = vsel %vm1456_vm0, %v1457_v3, %v1458_v25  ;;  %v4479_v12 = vpop.f32.mrb[58].mxu1  ;;  %v1324_v26 = vadd.f32 %v1323_v49, %v4406_v46 }
 0x29e   : > { %v4483_v31 = vadd.f32 %v1459_v59, %v4359_v61  ;;  %v1215_v32 = vpop.f32.mrb[59].mxu1  ;;  %v1462_v7 = vrot.slane %v1329_v4, 1 }
 0x29f   : > { %v1460_v21 = vrot.slane %v1324_v26, 1  ;;  %v2648_v43 = vpop.f32.mrb[52].mxu0 }
 0x2a0   : > { %v1339_v48 = vadd.f32 %v2648_v43, %v4421_v52  ;;  %v1333_v55 = vpop.f32.mrb[53].mxu0 }
 0x2a1   : > { %v1461_v63 = vsel %vm1456_vm0, %v1458_v25, %v1460_v21  ;;  %v4488_v16 = vadd.f32 %v1460_v21, %v4375_v57  ;;  %v4490_v53 = vpop.f32.mrb[60].mxu1  ;;  %v1334_v40 = vadd.f32 %v1333_v55, %v4416_v42 }
 0x2a2   : > { %v4494_v46 = vadd.f32 %v1461_v63, %v4367_v54  ;;  %v1465_v61 = vrot.slane %v1339_v48, 1  ;;  %v1220_v5 = vpop.f32.mrb[61].mxu1 }
 0x2a3   : > { %v1463_v60 = vrot.slane %v1334_v40, 1  ;;  %v2651_v58 = vpop.f32.mrb[54].mxu0 }
 0x2a4   : > { %v4497_v52 = vadd.f32 %v1465_v61, %v4390_v9  ;;  %v1349_v17 = vadd.f32 %v2651_v58, %v4431_v47  ;;  %v1343_v39 = vpop.f32.mrb[55].mxu0 }
 0x2a5   : > { %v1464_v57 = vsel %vm1456_vm0, %v1462_v7, %v1463_v60  ;;  %v1466_v20 = vsel %vm1456_vm0, %v1463_v60, %v1465_v61  ;;  %v4502_v25 = vpop.f32.mrb[62].mxu1  ;;  %v1344_v54 = vadd.f32 %v1343_v39, %v4426_v14 }
 0x2a6   : > { %v4506_v42 = vadd.f32 %v1464_v57, %v4382_v1  ;;  %v4509_v30 = vadd.f32 %v1466_v20, %v4388_v6  ;;  %v1468_v3 = vrot.slane %v1349_v17, 1  ;;  %v1225_v9 = vpop.f32.mrb[63].mxu1 }
 0x2a7   : > { %v1467_v38 = vrot.slane %v1344_v54, 1  ;;  %v2654_v4 = vpop.f32.mrb[56].mxu0 }
 0x2a8   : > { %v1359_v47 = vadd.f32 %v2654_v4, %v4441_v23  ;;  %v1353_v49 = vpop.f32.mrb[57].mxu0 }
 0x2a9   : > { %v1469_v59 = vsel %vm1456_vm0, %v1467_v38, %v1468_v3  ;;  %v4513_v26 = vpop.f32.mrb[64].mxu1  ;;  %v1354_v32 = vadd.f32 %v1353_v49, %v4436_v15 }
 0x2aa   : > { %v4517_v14 = vadd.f32 %v1469_v59, %v4392_v27  ;;  %v1230_v1 = vpop.f32.mrb[65].mxu1  ;;  %v1472_v5 = vrot.slane %v1359_v47, 1 }
 0x2ab   : > { %v1470_v21 = vrot.slane %v1354_v32, 1  ;;  %v2657_v6 = vpop.f32.mrb[58].mxu0 }
 0x2ac   : > { %v1369_v43 = vadd.f32 %v2657_v6, %v4451_v51  ;;  %v1363_v48 = vpop.f32.mrb[59].mxu0 }
 0x2ad   : > { %v1471_v55 = vsel %vm1456_vm0, %v1468_v3, %v1470_v21  ;;  %v4522_v23 = vadd.f32 %v1470_v21, %v4396_v19  ;;  %v1233_v63 = vpop.f32.mrb[66].mxu1  ;;  %v1364_v40 = vadd.f32 %v1363_v48, %v4446_v37 }
 0x2ae   : > { %v4526_v61 = vadd.f32 %v1471_v55, %v4394_v18  ;;  %v1475_v15 = vrot.slane %v1369_v43, 1  ;;  %v1235_v27 = vpop.f32.mrb[67].mxu1 }
 0x2af   : > { %v1473_v7 = vrot.slane %v1364_v40, 1  ;;  %v2660_v60 = vpop.f32.mrb[60].mxu0 }
 0x2b0   : > { %v4529_v58 = vadd.f32 %v1475_v15, %v4409_v10  ;;  %v1379_v51 = vadd.f32 %v2660_v60, %v4461_v22  ;;  %v1373_v17 = vpop.f32.mrb[61].mxu0 }
 0x2b1   : > { %v1474_v19 = vsel %vm1456_vm0, %v1472_v5, %v1473_v7  ;;  %v1476_v39 = vsel %vm1456_vm0, %v1473_v7, %v1475_v15  ;;  %v1238_v57 = vpop.f32.mrb[68].mxu1  ;;  %v1374_v37 = vadd.f32 %v1373_v17, %v4456_v36 }
 0x2b2   : > { %v4536_v18 = vadd.f32 %v1474_v19, %v4400_v29  ;;  %v4539_v20 = vadd.f32 %v1476_v39, %v4404_v41  ;;  %v1478_v54 = vrot.slane %v1379_v51, 1  ;;  %v1240_v3 = vpop.f32.mrb[69].mxu1 }
 0x2b3   : > { %v1477_v10 = vrot.slane %v1374_v37, 1  ;;  %v2663_v9 = vpop.f32.mrb[62].mxu0 }
 0x2b4   : > { %v1389_v22 = vadd.f32 %v2663_v9, %v4471_v13  ;;  %v1383_v38 = vpop.f32.mrb[63].mxu0 }
 0x2b5   : > { %v1479_v4 = vsel %vm1456_vm0, %v1477_v10, %v1478_v54  ;;  %v1243_v47 = vpop.f32.mrb[70].mxu1  ;;  %v1384_v49 = vadd.f32 %v1383_v38, %v4466_v62 }
 0x2b6   : > { %v4545_v36 = vadd.f32 %v1479_v4, %v4414_v33  ;;  %v1245_v29 = vpop.f32.mrb[71].mxu1  ;;  %v1482_v55 = vrot.slane %v1389_v22, 1 }
 0x2b7   : > { %v1480_v59 = vrot.slane %v1384_v49, 1  ;;  %v2666_v32 = vpop.f32.mrb[64].mxu0 }
 0x2b8   : > { %v1399_v41 = vadd.f32 %v2666_v32, %v4479_v12  ;;  %v1393_v1 = vpop.f32.mrb[65].mxu0 }
 0x2b9   : > { %v1481_v21 = vsel %vm1456_vm0, %v1478_v54, %v1480_v59  ;;  %v4550_v6 = vadd.f32 %v1480_v59, %v4424_v8  ;;  %v1394_v13 = vadd.f32 %v1393_v1, %v4474_v35  ;;  %v1660_v43 = vpop.f32.mrb[72].mxu1 }
 0x2ba   : > { %v4554_v48 = vadd.f32 %v1481_v21, %v4419_v50  ;;  %v1485_v62 = vrot.slane %v1399_v41, 1  ;;  %v1662_v33 = vpop.f32.mrb[73].mxu1 }
 0x2bb   : > { %v1483_v40 = vrot.slane %v1394_v13, 1  ;;  %v2669_v15 = vpop.f32.mrb[66].mxu0 }
 0x2bc   : > { %v4557_v27 = vadd.f32 %v1485_v62, %v4439_v0  ;;  %v1409_v12 = vadd.f32 %v2669_v15, %v4502_v25  ;;  %v1403_v5 = vpop.f32.mrb[67].mxu0 }
 0x2bd   : > { %v1484_v8 = vsel %vm1456_vm0, %v1482_v55, %v1483_v40  ;;  %v1486_v7 = vsel %vm1456_vm0, %v1483_v40, %v1485_v62  ;;  %v1404_v35 = vadd.f32 %v1403_v5, %v4490_v53  ;;  %v1665_v60 = vpop.f32.mrb[74].mxu1 }
 0x2be   : > { %v4564_v50 = vadd.f32 %v1484_v8, %v4429_v2  ;;  %v4567_v51 = vadd.f32 %v1486_v7, %v4434_v11  ;;  %v1488_v17 = vrot.slane %v1409_v12, 1  ;;  %v1667_v19 = vpop.f32.mrb[75].mxu1 }
 0x2bf   : > { %v1487_v0 = vrot.slane %v1404_v35, 1  ;;  %v2672_v39 = vpop.f32.mrb[68].mxu0  ;;  %v4593_v35 = vld [vmem:[#allocation11] ss:$0 sm:$0xff]  ;;  %v4596_v19 = vld [vmem:[#allocation12] ss:$0 sm:$0xff] }
 0x2c0   : > { %v1419_v37 = vadd.f32 %v2672_v39, %v1233_v63  ;;  %v1413_v25 = vpop.f32.mrb[69].mxu0 }
 0x2c1   : > { %v1489_v54 = vsel %vm1456_vm0, %v1487_v0, %v1488_v17  ;;  %v1414_v3 = vadd.f32 %v1413_v25, %v4513_v26  ;;  %v1670_v10 = vpop.f32.mrb[76].mxu1 }
 0x2c2   : > { %v4572_v53 = vadd.f32 %v1489_v54, %v4444_v28  ;;  %v1672_v9 = vpop.f32.mrb[77].mxu1  ;;  %v1492_v41 = vrot.slane %v1419_v37, 1 }
 0x2c3   : > { %v1490_v2 = vrot.slane %v1414_v3, 1  ;;  %v2675_v22 = vpop.f32.mrb[70].mxu0 }
 0x2c4   : > { %v1429_v38 = vadd.f32 %v2675_v22, %v1243_v47  ;;  %v1423_v11 = vpop.f32.mrb[71].mxu0 }
 0x2c5   : > { %v1491_v4 = vsel %vm1456_vm0, %v1488_v17, %v1490_v2  ;;  %v4576_v49 = vadd.f32 %v1490_v2, %v4454_v24  ;;  %v1424_v63 = vadd.f32 %v1423_v11, %v1238_v57  ;;  %v1675_v29 = vpop.f32.mrb[78].mxu1 }
 0x2c6   : > { %v4579_v59 = vadd.f32 %v1491_v4, %v4449_v44  ;;  %v1495_v26 = vrot.slane %v1429_v38, 1  ;;  %v1677_v32 = vpop.f32.mrb[79].mxu1 }
 0x2c7   : > { %v1493_v28 = vrot.slane %v1424_v63, 1  ;;  %v2710_v1 = vpop.f32.mrb[72].mxu0 }
 0x2c8   : > { %v4582_v21 = vadd.f32 %v1495_v26, %v4469_v34  ;;  %v1851_v47 = vadd.f32 %v2710_v1, %v1665_v60  ;;  %v1845_v13 = vpop.f32.mrb[73].mxu0 }
 0x2c9   : > { %v1494_v62 = vsel %vm1456_vm0, %v1492_v41, %v1493_v28  ;;  %v1496_v24 = vsel %vm1456_vm0, %v1493_v28, %v1495_v26  ;;  %v1680_v33 = vpop.f32.mrb[80].mxu1  ;;  %v1846_v57 = vadd.f32 %v1845_v13, %v1660_v43 }
 0x2ca   : > { %v4587_v55 = vadd.f32 %v1494_v62, %v4459_v45  ;;  %v4590_v44 = vadd.f32 %v1496_v24, %v4464_v56  ;;  %v1990_v40 = vrot.slane %v1851_v47, 2  ;;  %v1682_v15 = vpop.f32.mrb[81].mxu1 }
 0x2cb   : > { %v1989_v12 = vrot.slane %v1846_v57, 2  ;;  %v2713_v34 = vpop.f32.mrb[74].mxu0 }
 0x2cc   : > { %v1861_v5 = vadd.f32 %v2713_v34, %v1675_v29  ;;  %v1855_v8 = vpop.f32.mrb[75].mxu0 }
 0x2cd   : > { %v1991_v7 = vsel %vm1988_vm1, %v1989_v12, %v1990_v40  ;;  %v1685_v60 = vpop.f32.mrb[82].mxu1  ;;  %v1856_v17 = vadd.f32 %v1855_v8, %v1670_v10 }
 0x2ce   : > { %v2053_v43 = vadd.f32 %v1991_v7, %v4483_v31  ;;  %v1687_v45 = vpop.f32.mrb[83].mxu1  ;;  %v1994_v11 = vrot.slane %v1861_v5, 2 }
 0x2cf   : > { %v1992_v56 = vrot.slane %v1856_v17, 2  ;;  %v2716_v0 = vpop.f32.mrb[76].mxu0 }
 0x2d0   : > { %v2084_v39 = vmul.f32 %v4593_v35, %v2053_v43  ;;  %v1871_v37 = vadd.f32 %v2716_v0, %v1685_v60  ;;  %v1865_v25 = vpop.f32.mrb[77].mxu0 }
 0x2d1   : > { %v1993_v54 = vsel %vm1988_vm1, %v1990_v40, %v1992_v56  ;;  %v2055_v3 = vadd.f32 %v1992_v56, %v4488_v16  ;;  %v1690_v9 = vpop.f32.mrb[84].mxu1  ;;  %v1866_v2 = vadd.f32 %v1865_v25, %v1680_v33 }
 0x2d2   : > { %v2115_v22 = vadd.f32 %v4596_v19, %v2084_v39  ;;  %v2054_v10 = vadd.f32 %v1993_v54, %v4494_v46  ;;  %v1997_v31 = vrot.slane %v1871_v37, 2  ;;  %v1692_v38 = vpop.f32.mrb[85].mxu1 }
 0x2d3   : > { %v2086_v4 = vmul.f32 %v4593_v35, %v2055_v3  ;;  %v1995_v63 = vrot.slane %v1866_v2, 2  ;;  %v2719_v29 = vpop.f32.mrb[78].mxu0 }
 0x2d4   : > { %v2139_v26 = vmax.f32 %v2115_v22, 0.0  ;;  %v2085_v32 = vmul.f32 %v4593_v35, %v2054_v10  ;;  %v2058_v41 = vadd.f32 %v1997_v31, %v4497_v52  ;;  %v1875_v16 = vpop.f32.mrb[79].mxu0 }
 0x2d5   : > { %v2117_v28 = vadd.f32 %v4596_v19, %v2086_v4  ;;  %v1996_v1 = vsel %vm1988_vm1, %v1994_v11, %v1995_v63  ;;  %v1998_v46 = vsel %vm1988_vm1, %v1995_v63, %v1997_v31  ;;  %v1695_v47 = vpop.f32.mrb[86].mxu1  ;;  %v1876_v13 = vadd.f32 %v1875_v16, %v1690_v9 }
 0x2d6   : > { %2163 = vst [vmem:[%s4611_s15 - $0x1] sm:$0xfe] %v2139_v26  ;;  %v2116_v62 = vadd.f32 %v4596_v19, %v2085_v32  ;;  %v2089_v24 = vmul.f32 %v4593_v35, %v2058_v41  ;;  %v2056_v52 = vadd.f32 %v1996_v1, %v4506_v42  ;;  %v2057_v33 = vadd.f32 %v1998_v46, %v4509_v30  ;;  %v1697_v57 = vpop.f32.mrb[87].mxu1 }
 0x2d7   : > { %v2141_v40 = vmax.f32 %v2117_v28, 0.0  ;;  %v1881_v15 = vadd.f32 %v2719_v29, %v1695_v47  ;;  %v1999_v12 = vrot.slane %v1876_v13, 2  ;;  %v2722_v34 = vpop.f32.mrb[80].mxu0 }
 0x2d8   : > { %v2140_v5 = vmax.f32 %v2116_v62, 0.0  ;;  %v2120_v8 = vadd.f32 %v4596_v19, %v2089_v24  ;;  %v2087_v7 = vmul.f32 %v4593_v35, %v2056_v52  ;;  %v2088_v60 = vmul.f32 %v4593_v35, %v2057_v33  ;;  %v1885_v17 = vpop.f32.mrb[81].mxu0 }
 0x2d9   : > { %2165 = vst [vmem:[%s4611_s15 + $0xf] sm:$0x1] %v2141_v40  ;;  %v2000_v43 = vrot.slane %v1881_v15, 2  ;;  %v1700_v45 = vpop.f32.mrb[88].mxu1 }
 0x2da   : > { %2164 = vst [vmem:[%s4611_s15 + $0x7] sm:$0xff] %v2140_v5  ;;  %v2144_v42 = vmax.f32 %v2120_v8, 0.0  ;;  %v2118_v30 = vadd.f32 %v4596_v19, %v2087_v7  ;;  %v2119_v56 = vadd.f32 %v4596_v19, %v2088_v60  ;;  %v1886_v0 = vadd.f32 %v1885_v17, %v1700_v45  ;;  %v1702_v39 = vpop.f32.mrb[89].mxu1 }
 0x2db   : > { %v2001_v37 = vsel %vm1988_vm1, %v1999_v12, %v2000_v43  ;;  %v2725_v25 = vpop.f32.mrb[82].mxu0 }
 0x2dc   : > { %2168 = vst [vmem:[%s4611_s15 + $0x1f] sm:$0x1] %v2144_v42  ;;  %v2142_v54 = vmax.f32 %v2118_v30, 0.0  ;;  %v2143_v3 = vmax.f32 %v2119_v56, 0.0  ;;  %v2059_v9 = vadd.f32 %v2001_v37, %v4517_v14  ;;  %v2002_v2 = vrot.slane %v1886_v0, 2  ;;  %v1895_v22 = vpop.f32.mrb[83].mxu0 }
 0x2dd   : > { %v1705_v10 = vpop.f32.mrb[90].mxu1 }
 0x2de   : > { %2166 = vst [vmem:[%s4611_s15 + $0xf] sm:$0xfe] %v2142_v54  ;;  %2167 = vst [vmem:[%s4611_s15 + $0x17] sm:$0xff] %v2143_v3  ;;  %v2090_v31 = vmul.f32 %v4593_v35, %v2059_v9  ;;  %v2003_v38 = vsel %vm1988_vm1, %v2000_v43, %v2002_v2  ;;  %v2061_v11 = vadd.f32 %v2002_v2, %v4522_v23  ;;  %v1707_v63 = vpop.f32.mrb[91].mxu1 }
 0x2df   : > { %v1891_v4 = vadd.f32 %v2722_v34, %v1705_v10  ;;  %v2060_v29 = vadd.f32 %v2003_v38, %v4526_v61  ;;  %v2728_v26 = vpop.f32.mrb[84].mxu0 }
 0x2e0   : > { %v2121_v32 = vadd.f32 %v4596_v19, %v2090_v31  ;;  %v2092_v14 = vmul.f32 %v4593_v35, %v2061_v11  ;;  %v1905_v41 = vpop.f32.mrb[85].mxu0 }
 0x2e1   : > { %v2091_v16 = vmul.f32 %v4593_v35, %v2060_v29  ;;  %v1710_v28 = vpop.f32.mrb[92].mxu1  ;;  %v2004_v24 = vrot.slane %v1891_v4, 2 }
 0x2e2   : > { %v2145_v1 = vmax.f32 %v2121_v32, 0.0  ;;  %v2123_v46 = vadd.f32 %v4596_v19, %v2092_v14  ;;  %v1896_v23 = vadd.f32 %v1895_v22, %v1710_v28  ;;  %v1712_v47 = vpop.f32.mrb[93].mxu1 }
 0x2e3   : > { %v2122_v13 = vadd.f32 %v4596_v19, %v2091_v16  ;;  %v2731_v62 = vpop.f32.mrb[86].mxu0 }
 0x2e4   : > { %2169 = vst [vmem:[%s4611_s15 + $0x1f] sm:$0xfe] %v2145_v1  ;;  %v2147_v61 = vmax.f32 %v2123_v46, 0.0  ;;  %v2005_v52 = vrot.slane %v1896_v23, 2  ;;  %v1915_v33 = vpop.f32.mrb[87].mxu0 }
 0x2e5   : > { %v2146_v57 = vmax.f32 %v2122_v13, 0.0  ;;  %v1715_v40 = vpop.f32.mrb[94].mxu1 }
 0x2e6   : > { %2171 = vst [vmem:[%s4611_s15 + $0x2f] sm:$0x1] %v2147_v61  ;;  %v2006_v15 = vsel %vm1988_vm1, %v2004_v24, %v2005_v52  ;;  %v1901_v12 = vadd.f32 %v2725_v25, %v1715_v40  ;;  %v1717_v34 = vpop.f32.mrb[95].mxu1 }
 0x2e7   : > { %2170 = vst [vmem:[%s4611_s15 + $0x27] sm:$0xff] %v2146_v57  ;;  %v2062_v5 = vadd.f32 %v2006_v15, %v4536_v18  ;;  %v4644_v8 = vpop.f32.mrb[88].mxu0 }
 0x2e8   : > { %v2007_v7 = vrot.slane %v1901_v12, 2  ;;  %v1925_v60 = vpop.f32.mrb[89].mxu0 }
 0x2e9   : > { %v2093_v17 = vmul.f32 %v4593_v35, %v2062_v5  ;;  %v1720_v43 = vpop.f32.mrb[96].mxu1 }
 0x2ea   : > { %v2008_v45 = vsel %vm1988_vm1, %v2005_v52, %v2007_v7  ;;  %v2064_v42 = vadd.f32 %v2007_v7, %v4529_v58  ;;  %v1722_v30 = vpop.f32.mrb[97].mxu1  ;;  %v1906_v56 = vadd.f32 %v1905_v41, %v1720_v43 }
 0x2eb   : > { %v2124_v0 = vadd.f32 %v4596_v19, %v2093_v17  ;;  %v2063_v39 = vadd.f32 %v2008_v45, %v4539_v20  ;;  %v4651_v37 = vpop.f32.mrb[90].mxu0 }
 0x2ec   : > { %v2095_v18 = vmul.f32 %v4593_v35, %v2064_v42  ;;  %v1935_v25 = vpop.f32.mrb[91].mxu0  ;;  %v2009_v38 = vrot.slane %v1906_v56, 2 }
 0x2ed   : > { %v2148_v54 = vmax.f32 %v2124_v0, 0.0  ;;  %v2094_v3 = vmul.f32 %v4593_v35, %v2063_v39  ;;  %v1725_v9 = vpop.f32.mrb[98].mxu1 }
 0x2ee   : > { %v2126_v2 = vadd.f32 %v4596_v19, %v2095_v18  ;;  %v1911_v58 = vadd.f32 %v2728_v26, %v1725_v9  ;;  %v1727_v22 = vpop.f32.mrb[99].mxu1 }
 0x2ef   : > { %2172 = vst [vmem:[%s4611_s15 + $0x2f] sm:$0xfe] %v2148_v54  ;;  %v2125_v10 = vadd.f32 %v4596_v19, %v2094_v3  ;;  %v4658_v31 = vpop.f32.mrb[92].mxu0 }
 0x2f0   : > { %v2150_v20 = vmax.f32 %v2126_v2, 0.0  ;;  %v2010_v11 = vrot.slane %v1911_v58, 2  ;;  %v4660_v4 = vpop.f32.mrb[93].mxu0 }
 0x2f1   : > { %v2149_v63 = vmax.f32 %v2125_v10, 0.0  ;;  %v1730_v29 = vpop.f32.mrb[100].mxu1 }
 0x2f2   : > { %2174 = vst [vmem:[%s4611_s15 + $0x3f] sm:$0x1] %v2150_v20  ;;  %v2011_v32 = vsel %vm1988_vm1, %v2009_v38, %v2010_v11  ;;  %v1916_v14 = vadd.f32 %v1915_v33, %v1730_v29  ;;  %v1732_v41 = vpop.f32.mrb[101].mxu1 }
 0x2f3   : > { %2173 = vst [vmem:[%s4611_s15 + $0x37] sm:$0xff] %v2149_v63  ;;  %v2065_v26 = vadd.f32 %v2011_v32, %v4545_v36  ;;  %v4666_v16 = vpop.f32.mrb[94].mxu0 }
 0x2f4   : > { %v2012_v28 = vrot.slane %v1916_v14, 2  ;;  %v4668_v1 = vpop.f32.mrb[95].mxu0 }
 0x2f5   : > { %v2096_v46 = vmul.f32 %v4593_v35, %v2065_v26  ;;  %v1735_v23 = vpop.f32.mrb[102].mxu1 }
 0x2f6   : > { %v2013_v47 = vsel %vm1988_vm1, %v2010_v11, %v2012_v28  ;;  %v2067_v13 = vadd.f32 %v2012_v28, %v4550_v6  ;;  %v1921_v61 = vadd.f32 %v2731_v62, %v1735_v23  ;;  %v1737_v24 = vpop.f32.mrb[103].mxu1 }
 0x2f7   : > { %v2127_v52 = vadd.f32 %v4596_v19, %v2096_v46  ;;  %v2066_v36 = vadd.f32 %v2013_v47, %v4554_v48 }
 0x2f8   : > { %v2098_v33 = vmul.f32 %v4593_v35, %v2067_v13  ;;  %v2014_v7 = vrot.slane %v1921_v61, 2 }
 0x2f9   : > { %v2151_v57 = vmax.f32 %v2127_v52, 0.0  ;;  %v2097_v40 = vmul.f32 %v4593_v35, %v2066_v36  ;;  %v1740_v15 = vpop.f32.mrb[104].mxu1 }
 0x2fa   : > { %v2129_v12 = vadd.f32 %v4596_v19, %v2098_v33  ;;  %v1926_v34 = vadd.f32 %v1925_v60, %v1740_v15  ;;  %v1742_v5 = vpop.f32.mrb[105].mxu1 }
 0x2fb   : > { %2175 = vst [vmem:[%s4611_s15 + $0x3f] sm:$0xfe] %v2151_v57  ;;  %v2128_v6 = vadd.f32 %v4596_v19, %v2097_v40 }
 0x2fc   : > { %v2153_v62 = vmax.f32 %v2129_v12, 0.0  ;;  %v2015_v17 = vrot.slane %v1926_v34, 2 }
 0x2fd   : > { %v2152_v43 = vmax.f32 %v2128_v6, 0.0  ;;  %v1745_v45 = vpop.f32.mrb[106].mxu1 }
 0x2fe   : > { %2177 = vst [vmem:[%s4611_s15 + $0x4f] sm:$0x1] %v2153_v62  ;;  %v2016_v48 = vsel %vm1988_vm1, %v2014_v7, %v2015_v17  ;;  %v1931_v42 = vadd.f32 %v4644_v8, %v1745_v45  ;;  %v1747_v30 = vpop.f32.mrb[107].mxu1 }
 0x2ff   : > { %2176 = vst [vmem:[%s4611_s15 + $0x47] sm:$0xff] %v2152_v43  ;;  %v2068_v56 = vadd.f32 %v2016_v48, %v4564_v50 }
 0x300   : > { %v2017_v0 = vrot.slane %v1931_v42, 2 }
 0x301   : > { %v2099_v60 = vmul.f32 %v4593_v35, %v2068_v56  ;;  %v1750_v39 = vpop.f32.mrb[108].mxu1 }
 0x302   : > { %v2018_v18 = vsel %vm1988_vm1, %v2015_v17, %v2017_v0  ;;  %v2070_v54 = vadd.f32 %v2017_v0, %v4557_v27  ;;  %v1752_v3 = vpop.f32.mrb[109].mxu1  ;;  %v1936_v9 = vadd.f32 %v1935_v25, %v1750_v39 }
 0x303   : > { %v2130_v2 = vadd.f32 %v4596_v19, %v2099_v60  ;;  %v2069_v8 = vadd.f32 %v2018_v18, %v4567_v51 }
 0x304   : > { %v2101_v58 = vmul.f32 %v4593_v35, %v2070_v54  ;;  %v2019_v63 = vrot.slane %v1936_v9, 2 }
 0x305   : > { %v2154_v22 = vmax.f32 %v2130_v2, 0.0  ;;  %v2100_v50 = vmul.f32 %v4593_v35, %v2069_v8  ;;  %v1755_v10 = vpop.f32.mrb[110].mxu1 }
 0x306   : > { %v2132_v20 = vadd.f32 %v4596_v19, %v2101_v58  ;;  %v1941_v38 = vadd.f32 %v4651_v37, %v1755_v10  ;;  %v1757_v11 = vpop.f32.mrb[111].mxu1 }
 0x307   : > { %2178 = vst [vmem:[%s4611_s15 + $0x4f] sm:$0xfe] %v2154_v22  ;;  %v2131_v27 = vadd.f32 %v4596_v19, %v2100_v50 }
 0x308   : > { %v2156_v25 = vmax.f32 %v2132_v20, 0.0  ;;  %v2020_v29 = vrot.slane %v1941_v38, 2 }
 0x309   : > { %v2155_v32 = vmax.f32 %v2131_v27, 0.0  ;;  %v1760_v51 = vpop.f32.mrb[112].mxu1 }
 0x30a   : > { %2180 = vst [vmem:[%s4611_s15 + $0x5f] sm:$0x1] %v2156_v25  ;;  %v2021_v14 = vsel %vm1988_vm1, %v2019_v63, %v2020_v29  ;;  %v1946_v41 = vadd.f32 %v4660_v4, %v1760_v51  ;;  %v1762_v26 = vpop.f32.mrb[113].mxu1 }
 0x30b   : > { %2179 = vst [vmem:[%s4611_s15 + $0x57] sm:$0xff] %v2155_v32  ;;  %v2071_v28 = vadd.f32 %v2021_v14, %v4572_v53 }
 0x30c   : > { %v2022_v46 = vrot.slane %v1946_v41, 2 }
 0x30d   : > { %v2102_v37 = vmul.f32 %v4593_v35, %v2071_v28  ;;  %v1765_v23 = vpop.f32.mrb[114].mxu1 }
 0x30e   : > { %v2023_v47 = vsel %vm1988_vm1, %v2020_v29, %v2022_v46  ;;  %v2073_v13 = vadd.f32 %v2022_v46, %v4576_v49  ;;  %v1951_v61 = vadd.f32 %v4658_v31, %v1765_v23  ;;  %v1767_v24 = vpop.f32.mrb[115].mxu1 }
 0x30f   : > { %v2133_v52 = vadd.f32 %v4596_v19, %v2102_v37  ;;  %v2072_v4 = vadd.f32 %v2023_v47, %v4579_v59 }
 0x310   : > { %v2104_v36 = vmul.f32 %v4593_v35, %v2073_v13  ;;  %v2024_v34 = vrot.slane %v1951_v61, 2 }
 0x311   : > { %v2157_v53 = vmax.f32 %v2133_v52, 0.0  ;;  %v2103_v33 = vmul.f32 %v4593_v35, %v2072_v4  ;;  %v1770_v57 = vpop.f32.mrb[116].mxu1 }
 0x312   : > { %v2135_v40 = vadd.f32 %v4596_v19, %v2104_v36  ;;  %v1956_v49 = vadd.f32 %v4668_v1, %v1770_v57  ;;  %v1772_v31 = vpop.f32.mrb[117].mxu1 }
 0x313   : > { %2181 = vst [vmem:[%s4611_s15 + $0x5f] sm:$0xfe] %v2157_v53  ;;  %v2134_v15 = vadd.f32 %v4596_v19, %v2103_v33 }
 0x314   : > { %v2159_v12 = vmax.f32 %v2135_v40, 0.0  ;;  %v2025_v59 = vrot.slane %v1956_v49, 2 }
 0x315   : > { %v2158_v5 = vmax.f32 %v2134_v15, 0.0  ;;  %v1775_v6 = vpop.f32.mrb[118].mxu1 }
 0x316   : > { %2183 = vst [vmem:[%s4611_s15 + $0x6f] sm:$0x1] %v2159_v12  ;;  %v2026_v62 = vsel %vm1988_vm1, %v2024_v34, %v2025_v59  ;;  %v1961_v7 = vadd.f32 %v4666_v16, %v1775_v6  ;;  %v1777_v17 = vpop.f32.mrb[119].mxu1 }
 0x317   : > { %2182 = vst [vmem:[%s4611_s15 + $0x67] sm:$0xff] %v2158_v5  ;;  %v2074_v1 = vadd.f32 %v2026_v62, %v4587_v55 }
 0x318   : > { %v2027_v43 = vrot.slane %v1961_v7, 2 }
 0x319   : > { %v2105_v45 = vmul.f32 %v4593_v35, %v2074_v1 }
 0x31a   : > { %v2028_v48 = vsel %vm1988_vm1, %v2025_v59, %v2027_v43  ;;  %v2076_v42 = vadd.f32 %v2027_v43, %v4582_v21 }
 0x31b   : > { %v2136_v16 = vadd.f32 %v4596_v19, %v2105_v45  ;;  %v2075_v30 = vadd.f32 %v2028_v48, %v4590_v44 }
 0x31c   : > { %v2107_v55 = vmul.f32 %v4593_v35, %v2076_v42 }
 0x31d   : > { %v2160_v56 = vmax.f32 %v2136_v16, 0.0  ;;  %v2106_v0 = vmul.f32 %v4593_v35, %v2075_v30 }
 0x31e   : > { %v2138_v60 = vadd.f32 %v4596_v19, %v2107_v55 }
 0x31f   : > { %2184 = vst [vmem:[%s4611_s15 + $0x6f] sm:$0xfe] %v2160_v56  ;;  %v2137_v21 = vadd.f32 %v4596_v19, %v2106_v0 }
 0x320   : > { %v2162_v39 = vmax.f32 %v2138_v60, 0.0 }
 0x321   : > { %v2161_v44 = vmax.f32 %v2137_v21, 0.0 }
 0x322   : > { %2186 = vst [vmem:[%s4611_s15 + $0x7f] sm:$0x1] %v2162_v39 }
 0x323   : > { %2185 = vst [vmem:[%s4611_s15 + $0x77] sm:$0xff] %v2161_v44 }
 0x324   : > { %3357 = shalt.err (!%p3354_p13)
}
 0x325   : > { %s3358_s6 = scalar_lea.hbm %s4734_s20, 2048  ;;  %s3362_s11 = scalar_lea.hbm %s4926_s19, 8192 }
 0x326   : > { %p3359_p11 = scmp.ne.s32.totalorder %s4734_s20, %s3358_s6  ;;  %p3363_p3 = scmp.lt.u32.totalorder %s4734_s20, %s4926_s19 }
 0x327   : > { %p3364_p12 = scmp.lt.u32.totalorder %s3362_s11, %s3358_s6  ;;  %p3366_p5 = scmp.lt.u32.totalorder %s3358_s6, %s4734_s20 }
 0x328   : > { %p3360_p0 = pnand %p3359_p11, %p4927_p10 }
 0x329   : > { %p3365_p4 = por %p3364_p12, %p3363_p3 }
 0x32a   : > { %p3361_p1 = pneg %p3360_p0 }
 0x32b   : > { %p3367_p8 = por %p3366_p5, %p3365_p4 }
 0x32d   : > { %p3368_p2 = pnand %p3367_p8, %p3361_p1 }
 0x32f   : > { %3371 = shalt.err (!%p3368_p2)
}
 0x330   : > { %s3519_s12 = smov 128   ;;  %s3520_s16 = smov 8  }
 0x331   : > { %3002 = dma.vmem_to_hbm [thread:$0]  (%p4927_p10), %s4736_s0, 2048, %s4734_s20, %s2188_s9, %s3519_s12, %s3519_s12, %s3520_s16  }
 0x332 PF: > { %p3035_p9 = scmp.ge.s32.totalorder %s3506_s10, 2  ;;  %s2219_s8 = sand.u32 1, %s3478_s27  }
 0x333   : > { %p4928_p7 = scmp.ne.s32.totalorder %s4896_s17, 0  ;;  %s2220_s1 = scalar_lea.sflag [#allocation5], %s2219_s8 }
 0x335   : > { %p3025_p6 = pnand %p3035_p9, %p4928_p7 }
 0x337   : > { %3449 = dma.done.wait (!%p3025_p6), %s2220_s1, 2048  }
 0x338   : > { %3451 = vsyncadd (!%p3025_p6), %s2220_s1, 4294965248  ;;  %s27_s10 = sadd.s32 1, %s3506_s10   ;;  %s4930_s21 = sld [smem:[#allocation22_spill]] }
 0x339   : > { %p4769_p13 = scmp.ge.s32.totalorder %s27_s10, 6   ;;  %s4931_s22 = sld [smem:[#allocation23_spill]] }
 0x33a   : > { %s4932_s7 = sld [smem:[#allocation24_spill]]  ;;  %s4933_s0 = smov %s3718_s24 }
 0x33b   : > { %s4934_s20 = sld [smem:[#allocation35_spill]]  ;;  %s4935_s30 = sld [smem:[#allocation27_spill]] }
 0x33c   : > { %s4936_s17 = sld [smem:[#allocation28_spill]]  ;;  %s4937_s8 = sld [smem:[#allocation30_spill]] }
 0x33d   : > { %s4938_s9 = sld [smem:[#allocation31_spill]]  ;;  %s4939_s23 = smov %s4962_s18 }
 0x33e   : > { %s4941_s25 = smov %s3474_s26  ;;  %s4942_s26 = smov %s4933_s0 }
 0x33f   : > { %s4943_s27 = smov %s3482_s28  ;;  %s4944_s28 = smov %s3486_s29 }
 0x340   : > { %s4940_s24 = smov %s4932_s7  ;;  %26 = sbr.rel (!%p4769_p13) target bundleno = 22 (0x16), region = 130 }
 0x341   : > { %s4945_s29 = smov %s4934_s20 }
 0x342   : > { %s4946_s7 = smov %s4936_s17 }
 0x347   :  { %2225 = vsyncpa [#allocation4], 1 }
 0x348   :  { %2227 = vsyncpa [#allocation4 + $0x1], 1 }
 0x349   :  { %2228 = vsyncpa [#allocation7], 1 }
 0x34a   :  { %2230 = vsyncpa [#allocation7 + $0x1], 1 }
 0x34b   :  { %2231 = vsyncpa [#allocation10], 1 }
 0x34c   :  { %2232 = vsyncpa [#allocation13], 1 }
 0x34d   :  { %2233 = vsyncpa [#allocation5], 1 }
 0x34e   :  { %2235 = vsyncpa [#allocation5 + $0x1], 1 }

// kernel: hg_block_forward.6
= control target key start
LH: loop header
LB: loop body
LE: loop exit
PB: predicated region body
PF: predicated region fallthrough
CT: control target
= control target key end

     0   :  { %11 = vsyncpa [#allocation4], 0  ;;  %s2736_s0 = inlined_call_operand.hbm [shape: f32[512,128], index: 0, kind: input, shape index: {}]   ;;  %s2737_s1 = inlined_call_operand.hbm [shape: f32[512,128], index: 1, kind: input, shape index: {}]   ;;  %s2738_s2 = inlined_call_operand.hbm [shape: f32[512,128], index: 2, kind: input, shape index: {}]   ;;  %s2739_s3 = inlined_call_operand.hbm [shape: f32[384,128], index: 3, kind: input, shape index: {}]   ;;  %s2740_s4 = inlined_call_operand.hbm [shape: f32[1,128], index: 4, kind: input, shape index: {}]   ;;  %s2741_s5 = inlined_call_operand.hbm [shape: f32[1,128], index: 5, kind: input, shape index: {}]   ;;  %s2742_s6 = inlined_call_operand.hbm [shape: f32[512,128], index: 6, kind: output, shape index: {}]  }
   0x1   :  { %12 = vsyncpa [#allocation7], 0 }
   0x2   :  { %13 = vsyncpa [#allocation10], 0 }
   0x3   :  { %14 = vsyncpa [#allocation13], 0 }
   0x4   :  { %15 = vsyncpa [#allocation5], 0  ;;  %s2282_s21 = smov [#allocation6]   ;;  %s2283_s23 = smov [#allocation9]  }
   0x5   :  { %s33_s22 = sshll.u32 %s2282_s21, 4  ;;  %s57_s24 = sshll.u32 %s2283_s23, 4  ;;  %s34_s22 = int_to_ptr.vmem [resolvable:$true] %s33_s22  ;;  %s2327_s24 = int_to_ptr.vmem [resolvable:$true] %s57_s24 }
   0x6   :  { %s2118_s27 = scalar_lea.hbm %s2737_s1, 8192 }
   0x7   :  { %p2119_p0 = scmp.ne.s32.totalorder %s2737_s1, %s2118_s27  ;;  %p2122_p1 = scmp.lt.u32.totalorder %s2118_s27, %s2737_s1 }
   0x9   :  { %p2124_p2 = pnand %p2122_p1, %p2119_p0 }
   0xb   :  { %2127 = shalt.err (!%p2124_p2)
}
   0xc   :  { %s2128_s8 = scalar_lea.vmem %s34_s22, 8192  ;;  %p2133_p4 = scmp.lt.s32.totalorder %s34_s22, %s34_s22 }
   0xd   :  { %p2129_p3 = scmp.ne.s32.totalorder %s34_s22, %s2128_s8  ;;  %p2134_p5 = scmp.lt.s32.totalorder %s2128_s8, %s2128_s8 }
   0xf   :  { %p2135_p6 = por %p2134_p5, %p2133_p4 }
  0x11   :  { %p2136_p7 = pnand %p2135_p6, %p2129_p3 }
  0x13   :  { %2139 = shalt.err (!%p2136_p7)
}
  0x14   :  { %s2284_s9 = smov 128   ;;  %s2285_s10 = smov 8  }
  0x15   :  { %39 = dma.hbm_to_vmem [thread:$0]  %s2737_s1, 8192, %s34_s22, [#allocation7], %s2284_s9, %s2284_s9, %s2285_s10  }
  0x16   :  { %s2140_s15 = scalar_lea.hbm %s2739_s3, 6144 }
  0x17   :  { %p2141_p8 = scmp.ne.s32.totalorder %s2739_s3, %s2140_s15  ;;  %p2144_p9 = scmp.lt.u32.totalorder %s2140_s15, %s2739_s3 }
  0x19   :  { %p2146_p10 = pnand %p2144_p9, %p2141_p8 }
  0x1b   :  { %2149 = shalt.err (!%p2146_p10)
}
  0x1c   :  { %s2150_s20 = scalar_lea.vmem %s2327_s24, 6144  ;;  %p2155_p12 = scmp.lt.s32.totalorder %s2327_s24, %s2327_s24 }
  0x1d   :  { %p2151_p11 = scmp.ne.s32.totalorder %s2327_s24, %s2150_s20  ;;  %p2156_p13 = scmp.lt.s32.totalorder %s2150_s20, %s2150_s20 }
  0x1f   :  { %p2157_p0 = por %p2156_p13, %p2155_p12 }
  0x21   :  { %p2158_p1 = pnand %p2157_p0, %p2151_p11 }
  0x23   :  { %2161 = shalt.err (!%p2158_p1)
}
  0x24   :  { %63 = dma.hbm_to_vmem [thread:$0]  %s2739_s3, 6144, %s2327_s24, [#allocation10], %s2284_s9, %s2284_s9, %s2285_s10  }
  0x25   :  { %s2286_s22 = smov [#allocation3]   ;;  %s2287_s25 = smov [#allocation8]  }
  0x26   :  { %s21_s23 = sshll.u32 %s2286_s22, 4  ;;  %s45_s26 = sshll.u32 %s2287_s25, 4  ;;  %s22_s23 = int_to_ptr.vmem [resolvable:$true] %s21_s23  ;;  %s2364_s26 = int_to_ptr.vmem [resolvable:$true] %s45_s26 }
  0x27   :  { %s2162_s29 = scalar_lea.hbm %s2736_s0, 8192 }
  0x28   :  { %p2163_p2 = scmp.ne.s32.totalorder %s2736_s0, %s2162_s29  ;;  %p2166_p3 = scmp.lt.u32.totalorder %s2162_s29, %s2736_s0 }
  0x2a   :  { %p2168_p4 = pnand %p2166_p3, %p2163_p2 }
  0x2c   :  { %2171 = shalt.err (!%p2168_p4)
}
  0x2d   :  { %s2172_s3 = scalar_lea.vmem %s22_s23, 8192  ;;  %p2177_p6 = scmp.lt.s32.totalorder %s22_s23, %s22_s23 }
  0x2e   :  { %p2173_p5 = scmp.ne.s32.totalorder %s22_s23, %s2172_s3  ;;  %p2178_p7 = scmp.lt.s32.totalorder %s2172_s3, %s2172_s3 }
  0x30   :  { %p2179_p8 = por %p2178_p7, %p2177_p6 }
  0x32   :  { %p2180_p9 = pnand %p2179_p8, %p2173_p5 }
  0x34   :  { %2183 = shalt.err (!%p2180_p9)
}
  0x35   :  { %27 = dma.hbm_to_vmem [thread:$0]  %s2736_s0, 8192, %s22_s23, [#allocation4], %s2284_s9, %s2284_s9, %s2285_s10  }
  0x36   :  { %s2184_s15 = scalar_lea.hbm %s2738_s2, 8192 }
  0x37   :  { %p2185_p10 = scmp.ne.s32.totalorder %s2738_s2, %s2184_s15  ;;  %p2188_p11 = scmp.lt.u32.totalorder %s2184_s15, %s2738_s2 }
  0x39   :  { %p2190_p12 = pnand %p2188_p11, %p2185_p10 }
  0x3b   :  { %2193 = shalt.err (!%p2190_p12)
}
  0x3c   :  { %s2194_s20 = scalar_lea.vmem %s2364_s26, 8192  ;;  %p2199_p0 = scmp.lt.s32.totalorder %s2364_s26, %s2364_s26 }
  0x3d   :  { %p2195_p13 = scmp.ne.s32.totalorder %s2364_s26, %s2194_s20  ;;  %p2200_p1 = scmp.lt.s32.totalorder %s2194_s20, %s2194_s20 }
  0x3f   :  { %p2201_p2 = por %p2200_p1, %p2199_p0 }
  0x41   :  { %p2202_p3 = pnand %p2201_p2, %p2195_p13 }
  0x43   :  { %2205 = shalt.err (!%p2202_p3)
}
  0x44   :  { %51 = dma.hbm_to_vmem [thread:$0]  %s2738_s2, 8192, %s2364_s26, [#allocation7], %s2284_s9, %s2284_s9, %s2285_s10  }
  0x45   :  { %s2288_s21 = smov [#allocation11]   ;;  %s2289_s23 = smov [#allocation12]  }
  0x46   :  { %s70_s22 = sshll.u32 %s2288_s21, 4  ;;  %s80_s25 = sshll.u32 %s2289_s23, 4  ;;  %s71_s22 = int_to_ptr.vmem [resolvable:$true] %s70_s22  ;;  %s81_s25 = int_to_ptr.vmem [resolvable:$true] %s80_s25 }
  0x47   :  { %s2206_s29 = scalar_lea.hbm %s2740_s4, 16 }
  0x48   :  { %p2207_p4 = scmp.ne.s32.totalorder %s2740_s4, %s2206_s29  ;;  %p2210_p5 = scmp.lt.u32.totalorder %s2206_s29, %s2740_s4 }
  0x4a   :  { %p2212_p6 = pnand %p2210_p5, %p2207_p4 }
  0x4c   :  { %2215 = shalt.err (!%p2212_p6)
}
  0x4d   :  { %s2216_s2 = scalar_lea.vmem %s71_s22, 16  ;;  %s2220_s26 = scalar_lea.vmem %s71_s22, 32 }
  0x4e   :  { %p2217_p7 = scmp.ne.s32.totalorder %s71_s22, %s2216_s2  ;;  %p2221_p8 = scmp.lt.s32.totalorder %s71_s22, %s71_s22 }
  0x4f   :  { %p2222_p9 = scmp.lt.s32.totalorder %s2220_s26, %s2216_s2 }
  0x51   :  { %p2223_p10 = por %p2222_p9, %p2221_p8 }
  0x53   :  { %p2224_p11 = pnand %p2223_p10, %p2217_p7 }
  0x55   :  { %2227 = shalt.err (!%p2224_p11)
}
  0x56   :  { %73 = dma.hbm_to_vmem [thread:$0]  %s2740_s4, 16, %s71_s22, [#allocation10]  }
  0x57   :  { %s2228_s14 = scalar_lea.hbm %s2741_s5, 16 }
  0x58   :  { %p2229_p12 = scmp.ne.s32.totalorder %s2741_s5, %s2228_s14  ;;  %p2232_p13 = scmp.lt.u32.totalorder %s2228_s14, %s2741_s5 }
  0x5a   :  { %p2234_p0 = pnand %p2232_p13, %p2229_p12 }
  0x5c   :  { %2237 = shalt.err (!%p2234_p0)
}
  0x5d   :  { %s2238_s19 = scalar_lea.vmem %s81_s25, 16  ;;  %s2242_s20 = scalar_lea.vmem %s81_s25, 32 }
  0x5e   :  { %p2239_p1 = scmp.ne.s32.totalorder %s81_s25, %s2238_s19  ;;  %p2243_p2 = scmp.lt.s32.totalorder %s81_s25, %s81_s25 }
  0x5f   :  { %p2244_p3 = scmp.lt.s32.totalorder %s2242_s20, %s2238_s19 }
  0x61   :  { %p2245_p4 = por %p2244_p3, %p2243_p2 }
  0x63   :  { %p2246_p5 = pnand %p2245_p4, %p2239_p1 }
  0x65   :  { %2249 = shalt.err (!%p2246_p5)
}
  0x66   :  { %83 = dma.hbm_to_vmem [thread:$0]  %s2741_s5, 16, %s81_s25, [#allocation13]  }
  0x67   :  { %2272 = dma.done.wait [#allocation4], 8192  }
  0x68   :  { %2273 = vsyncadd [#allocation4], 4294959104 }
  0x69   :  { %2274 = dma.done.wait [#allocation7], 16384  }
  0x6a   :  { %2275 = vsyncadd [#allocation7], 4294950912 }
  0x6b   :  { %2276 = dma.done.wait [#allocation10], 6160  }
  0x6c   :  { %2277 = vsyncadd [#allocation10], 4294961136 }
  0x6d   :  { %2278 = dma.done.wait [#allocation13], 16  }
  0x6e   :  { %2279 = vsyncadd [#allocation13], 4294967280  ;;  %v2290_v0 = vmov 0.0|0.0   ;;  %v678_v1 = vld [vmem:[#allocation9] sm:$0xff]  ;;  %v679_v2 = vld [vmem:[#allocation9 + $0x8] sm:$0xff]  ;;  %s2291_s5 = smov [#allocation14]  }
  0x6f   :  { %1996 = vmatprep.subr.bf16.mxu0 %v2290_v0  ;;  %2076 = vmatprep.subr.bf16.mxu1 %v2290_v0  ;;  %v680_v3 = vld [vmem:[#allocation9 + $0x10] sm:$0xff]  ;;  %v1997_v4 = vpack.c.bf16 %v679_v2, %v678_v1  ;;  %v681_v5 = vld [vmem:[#allocation9 + $0x18] sm:$0xff]  ;;  %v682_v7 = vld [vmem:[#allocation9 + $0x20] sm:$0xff]  ;;  %s1771_s1 = sshll.u32 %s2291_s5, 4  ;;  %s1772_s1 = int_to_ptr.vmem [resolvable:$true] %s1771_s1 }
  0x70   :  { %v2000_v6 = vpack.c.bf16 %v681_v5, %v680_v3  ;;  %v683_v8 = vld [vmem:[#allocation9 + $0x28] sm:$0xff]  ;;  %v684_v10 = vld [vmem:[#allocation9 + $0x30] sm:$0xff]  ;;  %v685_v11 = vld [vmem:[#allocation9 + $0x38] sm:$0xff]  ;;  %s2250_s21 = scalar_lea.vmem %s1772_s1, 8192  ;;  %p2255_p7 = scmp.lt.s32.totalorder %s1772_s1, %s1772_s1 }
  0x71   :  { %1998 = vmatpush1.bf16.msra.mxu0 %v1997_v4  ;;  %2092 = vmatpush1.bf16.msra.mxu1 %v1997_v4  ;;  %v2003_v9 = vpack.c.bf16 %v683_v8, %v682_v7  ;;  %v230_v12 = vld [vmem:[#allocation6] sm:$0xff]  ;;  %v2006_v13 = vpack.c.bf16 %v685_v11, %v684_v10  ;;  %v687_v16 = vld [vmem:[#allocation9 + $0x48] sm:$0xff]  ;;  %v688_v18 = vld [vmem:[#allocation9 + $0x50] sm:$0xff]  ;;  %p2251_p6 = scmp.ne.s32.totalorder %s1772_s1, %s2250_s21  ;;  %p2256_p8 = scmp.lt.s32.totalorder %s2250_s21, %s2250_s21 }
  0x72   :  { %1999 = vmatprep.subr.bf16.mxu0 %v2290_v0  ;;  %2077 = vmatprep.subr.bf16.mxu1 %v2290_v0  ;;  %v278_v14 = vld [vmem:[#allocation6 + $0x180] sm:$0xff]  ;;  %v689_v19 = vld [vmem:[#allocation9 + $0x58] sm:$0xff]  ;;  %v691_v22 = vld [vmem:[#allocation9 + $0x68] sm:$0xff] }
  0x73   :  { %v686_v15 = vld [vmem:[#allocation9 + $0x40] sm:$0xff]  ;;  %790 = vmatprep.mubr.f32.mxu0 %v230_v12  ;;  %1030 = vmatprep.mubr.f32.mxu1 %v278_v14  ;;  %v2012_v20 = vpack.c.bf16 %v689_v19, %v688_v18  ;;  %v692_v24 = vld [vmem:[#allocation9 + $0x70] sm:$0xff]  ;;  %v693_v25 = vld [vmem:[#allocation9 + $0x78] sm:$0xff]  ;;  %p2257_p9 = por %p2256_p8, %p2255_p7 }
  0x74   :  { %v2009_v17 = vpack.c.bf16 %v687_v16, %v686_v15  ;;  %v690_v21 = vld [vmem:[#allocation9 + $0x60] sm:$0xff]  ;;  %v2018_v26 = vpack.c.bf16 %v693_v25, %v692_v24  ;;  %v695_v28 = vld [vmem:[#allocation9 + $0x88] sm:$0xff]  ;;  %v696_v30 = vld [vmem:[#allocation9 + $0x90] sm:$0xff] }
  0x75   :  { %2001 = vmatpush1.bf16.msra.mxu0 %v2000_v6  ;;  %2093 = vmatpush1.bf16.msra.mxu1 %v2000_v6  ;;  %v2015_v23 = vpack.c.bf16 %v691_v22, %v690_v21  ;;  %v694_v27 = vld [vmem:[#allocation9 + $0x80] sm:$0xff]  ;;  %v697_v31 = vld [vmem:[#allocation9 + $0x98] sm:$0xff]  ;;  %v699_v34 = vld [vmem:[#allocation9 + $0xa8] sm:$0xff]  ;;  %p2258_p10 = pnand %p2257_p9, %p2251_p6 }
  0x76   :  { %2002 = vmatprep.subr.bf16.mxu0 %v2290_v0  ;;  %2078 = vmatprep.subr.bf16.mxu1 %v2290_v0  ;;  %v2021_v29 = vpack.c.bf16 %v695_v28, %v694_v27  ;;  %v2024_v32 = vpack.c.bf16 %v697_v31, %v696_v30  ;;  %v698_v33 = vld [vmem:[#allocation9 + $0xa0] sm:$0xff]  ;;  %v700_v36 = vld [vmem:[#allocation9 + $0xb0] sm:$0xff]  ;;  %v701_v37 = vld [vmem:[#allocation9 + $0xb8] sm:$0xff] }
  0x77   :  { %v2027_v35 = vpack.c.bf16 %v699_v34, %v698_v33  ;;  %v2030_v38 = vpack.c.bf16 %v701_v37, %v700_v36  ;;  %v702_v39 = vld [vmem:[#allocation9 + $0xc0] sm:$0xff]  ;;  %v703_v40 = vld [vmem:[#allocation9 + $0xc8] sm:$0xff]  ;;  %v704_v42 = vld [vmem:[#allocation9 + $0xd0] sm:$0xff] }
  0x78   :  { %v2033_v41 = vpack.c.bf16 %v703_v40, %v702_v39  ;;  %v705_v43 = vld [vmem:[#allocation9 + $0xd8] sm:$0xff]  ;;  %v706_v45 = vld [vmem:[#allocation9 + $0xe0] sm:$0xff]  ;;  %v707_v46 = vld [vmem:[#allocation9 + $0xe8] sm:$0xff] }
  0x79   :  { %2004 = vmatpush1.bf16.msra.mxu0 %v2003_v9  ;;  %2094 = vmatpush1.bf16.msra.mxu1 %v2003_v9  ;;  %v2036_v44 = vpack.c.bf16 %v705_v43, %v704_v42  ;;  %v2039_v47 = vpack.c.bf16 %v707_v46, %v706_v45  ;;  %v708_v48 = vld [vmem:[#allocation9 + $0xf0] sm:$0xff]  ;;  %v709_v49 = vld [vmem:[#allocation9 + $0xf8] sm:$0xff]  ;;  %v710_v50 = vld [vmem:[#allocation9 + $0x100] sm:$0xff] }
  0x7a   :  { %2005 = vmatprep.subr.bf16.mxu0 %v2290_v0  ;;  %2079 = vmatprep.subr.bf16.mxu1 %v2290_v0  ;;  %v711_v51 = vld [vmem:[#allocation9 + $0x108] sm:$0xff]  ;;  %v2042_v52 = vpack.c.bf16 %v709_v49, %v708_v48  ;;  %v712_v54 = vld [vmem:[#allocation9 + $0x110] sm:$0xff]  ;;  %v713_v55 = vld [vmem:[#allocation9 + $0x118] sm:$0xff] }
  0x7b   :  { %v2044_v53 = vpack.c.bf16 %v711_v51, %v710_v50  ;;  %v102_v56 = vld [vmem:[#allocation3] sm:$0xff]  ;;  %v231_v58 = vld [vmem:[#allocation6 + $0x8] sm:$0xff]  ;;  %v2048_v59 = vpack.c.bf16 %v713_v55, %v712_v54  ;;  %v280_v2 = vld [vmem:[#allocation6 + $0x190] sm:$0xff] }
  0x7c   :  { %v150_v57 = vld [vmem:[#allocation3 + $0x180] sm:$0xff]  ;;  %v279_v60 = vld [vmem:[#allocation6 + $0x188] sm:$0xff]  ;;  %v716_v4 = vld [vmem:[#allocation9 + $0x130] sm:$0xff] }
  0x7d   :  { %2007 = vmatpush1.bf16.msra.mxu0 %v2006_v13  ;;  %2095 = vmatpush1.bf16.msra.mxu1 %v2006_v13  ;;  %v714_v61 = vld [vmem:[#allocation9 + $0x120] sm:$0xff]  ;;  %v715_v62 = vld [vmem:[#allocation9 + $0x128] sm:$0xff]  ;;  %v717_v5 = vld [vmem:[#allocation9 + $0x138] sm:$0xff] }
  0x7e   :  { %2008 = vmatprep.subr.bf16.mxu0 %v2290_v0  ;;  %2080 = vmatprep.subr.bf16.mxu1 %v2290_v0  ;;  %v103_v63 = vld [vmem:[#allocation3 + $0x8] sm:$0xff]  ;;  %v2052_v3 = vpack.c.bf16 %v715_v62, %v714_v61  ;;  %v104_v6 = vld [vmem:[#allocation3 + $0x10] sm:$0xff]  ;;  %v233_v8 = vld [vmem:[#allocation6 + $0x18] sm:$0xff]  ;;  %v2056_v10 = vpack.c.bf16 %v717_v5, %v716_v4 }
  0x7f   :  { %v151_v1 = vld [vmem:[#allocation3 + $0x188] sm:$0xff]  ;;  %v152_v7 = vld [vmem:[#allocation3 + $0x190] sm:$0xff]  ;;  %v281_v9 = vld [vmem:[#allocation6 + $0x198] sm:$0xff] }
  0x80   :  { %v718_v11 = vld [vmem:[#allocation9 + $0x140] sm:$0xff]  ;;  %v719_v12 = vld [vmem:[#allocation9 + $0x148] sm:$0xff]  ;;  %v105_v13 = vld [vmem:[#allocation3 + $0x18] sm:$0xff] }
  0x81   :  { %2010 = vmatpush1.bf16.msra.mxu0 %v2009_v17  ;;  %2096 = vmatpush1.bf16.msra.mxu1 %v2009_v17  ;;  %v153_v14 = vld [vmem:[#allocation3 + $0x198] sm:$0xff]  ;;  %v234_v15 = vld [vmem:[#allocation6 + $0x20] sm:$0xff]  ;;  %v2060_v17 = vpack.c.bf16 %v719_v12, %v718_v11  ;;  %v720_v18 = vld [vmem:[#allocation9 + $0x150] sm:$0xff] }
  0x82   :  { %2011 = vmatprep.subr.bf16.mxu0 %v2290_v0  ;;  %2081 = vmatprep.subr.bf16.mxu1 %v2290_v0  ;;  %v282_v16 = vld [vmem:[#allocation6 + $0x1a0] sm:$0xff]  ;;  %v721_v19 = vld [vmem:[#allocation9 + $0x158] sm:$0xff]  ;;  %v235_v22 = vld [vmem:[#allocation6 + $0x28] sm:$0xff] }
  0x83   :  { %v154_v21 = vld [vmem:[#allocation3 + $0x1a0] sm:$0xff]  ;;  %v2064_v24 = vpack.c.bf16 %v721_v19, %v720_v18  ;;  %v107_v27 = vld [vmem:[#allocation3 + $0x28] sm:$0xff]  ;;  %v284_v30 = vld [vmem:[#allocation6 + $0x1b0] sm:$0xff] }
  0x84   :  { %v722_v25 = vld [vmem:[#allocation9 + $0x160] sm:$0xff]  ;;  %v155_v28 = vld [vmem:[#allocation3 + $0x1a8] sm:$0xff]  ;;  %v725_v33 = vld [vmem:[#allocation9 + $0x178] sm:$0xff] }
  0x85   :  { %2013 = vmatpush1.bf16.msra.mxu0 %v2012_v20  ;;  %2097 = vmatpush1.bf16.msra.mxu1 %v2012_v20  ;;  %v106_v20 = vld [vmem:[#allocation3 + $0x20] sm:$0xff]  ;;  %v108_v34 = vld [vmem:[#allocation3 + $0x30] sm:$0xff]  ;;  %v237_v36 = vld [vmem:[#allocation6 + $0x38] sm:$0xff] }
  0x86   :  { %2014 = vmatprep.subr.bf16.mxu0 %v2290_v0  ;;  %2082 = vmatprep.subr.bf16.mxu1 %v2290_v0  ;;  %v285_v37 = vld [vmem:[#allocation6 + $0x1b8] sm:$0xff]  ;;  %v286_v42 = vld [vmem:[#allocation6 + $0x1c0] sm:$0xff]  ;;  %v239_v45 = vld [vmem:[#allocation6 + $0x48] sm:$0xff] }
  0x87   :  { %v109_v39 = vld [vmem:[#allocation3 + $0x38] sm:$0xff]  ;;  %v110_v43 = vld [vmem:[#allocation3 + $0x40] sm:$0xff]  ;;  %v287_v46 = vld [vmem:[#allocation6 + $0x1c8] sm:$0xff] }
  0x88   :  { %v157_v40 = vld [vmem:[#allocation3 + $0x1b8] sm:$0xff]  ;;  %v159_v48 = vld [vmem:[#allocation3 + $0x1c8] sm:$0xff]  ;;  %v240_v49 = vld [vmem:[#allocation6 + $0x50] sm:$0xff] }
  0x89   :  { %2016 = vmatpush1.bf16.msra.mxu0 %v2015_v23  ;;  %2098 = vmatpush1.bf16.msra.mxu1 %v2015_v23  ;;  %v283_v23 = vld [vmem:[#allocation6 + $0x1a8] sm:$0xff]  ;;  %v288_v50 = vld [vmem:[#allocation6 + $0x1d0] sm:$0xff]  ;;  %v289_v54 = vld [vmem:[#allocation6 + $0x1d8] sm:$0xff] }
  0x8a   :  { %2017 = vmatprep.subr.bf16.mxu0 %v2290_v0  ;;  %2083 = vmatprep.subr.bf16.mxu1 %v2290_v0  ;;  %v112_v51 = vld [vmem:[#allocation3 + $0x50] sm:$0xff]  ;;  %v113_v55 = vld [vmem:[#allocation3 + $0x58] sm:$0xff]  ;;  %v243_v61 = vld [vmem:[#allocation6 + $0x68] sm:$0xff] }
  0x8b   :  { %v291_v62 = vld [vmem:[#allocation6 + $0x1e8] sm:$0xff]  ;;  %v164_v4 = vld [vmem:[#allocation3 + $0x1f0] sm:$0xff]  ;;  %v245_v5 = vld [vmem:[#allocation6 + $0x78] sm:$0xff] }
  0x8c   :  { %v118_v11 = vld [vmem:[#allocation3 + $0x80] sm:$0xff]  ;;  %v359_v12 = vld [vmem:[#allocation8 + $0x8] sm:$0xff]  ;;  %v120_v19 = vld [vmem:[#allocation3 + $0x90] sm:$0xff] }
  0x8d   :  { %2019 = vmatpush1.bf16.msra.mxu0 %v2018_v26  ;;  %2099 = vmatpush1.bf16.msra.mxu1 %v2018_v26  ;;  %v723_v26 = vld [vmem:[#allocation9 + $0x168] sm:$0xff]  ;;  %v362_v18 = vld [vmem:[#allocation8 + $0x20] sm:$0xff] }
  0x8e   :  { %2020 = vmatprep.subr.bf16.mxu0 %v2290_v0  ;;  %2084 = vmatprep.subr.bf16.mxu1 %v2290_v0  ;;  %v2068_v31 = vpack.c.bf16 %v723_v26, %v722_v25  ;;  %v250_v25 = vld [vmem:[#allocation6 + $0xa0] sm:$0xff] }
  0x8f   :  { %v366_v26 = vld [vmem:[#allocation8 + $0x40] sm:$0xff] }
  0x91   :  { %2022 = vmatpush1.bf16.msra.mxu0 %v2021_v29  ;;  %2100 = vmatpush1.bf16.msra.mxu1 %v2021_v29  ;;  %v236_v29 = vld [vmem:[#allocation6 + $0x30] sm:$0xff] }
  0x92   :  { %2023 = vmatprep.subr.bf16.mxu0 %v2290_v0  ;;  %2085 = vmatprep.subr.bf16.mxu1 %v2290_v0 }
  0x95   :  { %2025 = vmatpush1.bf16.msra.mxu0 %v2024_v32  ;;  %2101 = vmatpush1.bf16.msra.mxu1 %v2024_v32  ;;  %v724_v32 = vld [vmem:[#allocation9 + $0x170] sm:$0xff] }
  0x96   :  { %2026 = vmatprep.subr.bf16.mxu0 %v2290_v0  ;;  %2086 = vmatprep.subr.bf16.mxu1 %v2290_v0 }
  0x99   :  { %2028 = vmatpush1.bf16.msra.mxu0 %v2027_v35  ;;  %2102 = vmatpush1.bf16.msra.mxu1 %v2027_v35  ;;  %v156_v35 = vld [vmem:[#allocation3 + $0x1b0] sm:$0xff] }
  0x9a   :  { %2029 = vmatprep.subr.bf16.mxu0 %v2290_v0  ;;  %2087 = vmatprep.subr.bf16.mxu1 %v2290_v0 }
  0x9d   :  { %2031 = vmatpush1.bf16.msra.mxu0 %v2030_v38  ;;  %2103 = vmatpush1.bf16.msra.mxu1 %v2030_v38  ;;  %v2072_v38 = vpack.c.bf16 %v725_v33, %v724_v32  ;;  %v369_v32 = vld [vmem:[#allocation8 + $0x58] sm:$0xff]  ;;  %v252_v33 = vld [vmem:[#allocation6 + $0xb0] sm:$0xff] }
  0x9e   :  { %2032 = vmatprep.subr.bf16.mxu0 %v2290_v0  ;;  %2088 = vmatprep.subr.bf16.mxu1 %v2290_v0 }
  0xa1   :  { %2034 = vmatpush1.bf16.msra.mxu0 %v2033_v41  ;;  %2104 = vmatpush1.bf16.msra.mxu1 %v2033_v41  ;;  %v238_v41 = vld [vmem:[#allocation6 + $0x40] sm:$0xff] }
  0xa2   :  { %2035 = vmatprep.subr.bf16.mxu0 %v2290_v0  ;;  %2089 = vmatprep.subr.bf16.mxu1 %v2290_v0 }
  0xa5   :  { %2037 = vmatpush1.bf16.msra.mxu0 %v2036_v44  ;;  %2105 = vmatpush1.bf16.msra.mxu1 %v2036_v44  ;;  %v158_v44 = vld [vmem:[#allocation3 + $0x1c0] sm:$0xff] }
  0xa6   :  { %2038 = vmatprep.subr.bf16.mxu0 %v2290_v0  ;;  %2090 = vmatprep.subr.bf16.mxu1 %v2290_v0 }
  0xa9   :  { %2040 = vmatpush1.bf16.msra.mxu0 %v2039_v47  ;;  %2106 = vmatpush1.bf16.msra.mxu1 %v2039_v47  ;;  %v111_v47 = vld [vmem:[#allocation3 + $0x48] sm:$0xff] }
  0xaa   :  { %2041 = vmatprep.subr.bf16.mxu0 %v2290_v0  ;;  %2091 = vmatprep.subr.bf16.mxu1 %v2290_v0  ;;  %v232_v0 = vld [vmem:[#allocation6 + $0x10] sm:$0xff] }
  0xad   :  { %2043 = vmatpush1.bf16.msra.mxu0 %v2042_v52  ;;  %2107 = vmatpush1.bf16.msra.mxu1 %v2042_v52  ;;  %v160_v52 = vld [vmem:[#allocation3 + $0x1d0] sm:$0xff] }
  0xae   :  { %2045 = vmatprep.subr.bf16.mxu1 %v2044_v53 }
  0xb0   :  { %791 = vmatmul.mubr.f32.vlgmr.msra.gmra.mrb[0].mxu0 %v102_v56  ;;  %1031 = vmatmul.mubr.f32.vlgmr.msra.gmra.mrb[0].mxu1 %v150_v57  ;;  %v161_v56 = vld [vmem:[#allocation3 + $0x1d8] sm:$0xff]  ;;  %v242_v57 = vld [vmem:[#allocation6 + $0x60] sm:$0xff] }
  0xb1   :  { %2047 = vmatpush3.bf16.msra.mxu1 %v2044_v53  ;;  %795 = vmatprep.mubr.f32.mxu0 %v231_v58  ;;  %v241_v53 = vld [vmem:[#allocation6 + $0x58] sm:$0xff]  ;;  %v290_v58 = vld [vmem:[#allocation6 + $0x1e0] sm:$0xff] }
  0xb2   :  { %1035 = vmatprep.mubr.f32.mxu1 %v279_v60  ;;  %2049 = vmatprep.subr.bf16.mxu1 %v2048_v59  ;;  %v162_v60 = vld [vmem:[#allocation3 + $0x1e0] sm:$0xff] }
  0xb4   :  { %796 = vmatmul.mubr.f32.gmra.mrb[2].mxu0 %v103_v63  ;;  %1036 = vmatmul.mubr.f32.gmra.mrb[2].mxu1 %v151_v1  ;;  %v115_v63 = vld [vmem:[#allocation3 + $0x68] sm:$0xff] }
  0xb5   :  { %800 = vmatprep.mubr.f32.mxu0 %v232_v0  ;;  %1040 = vmatprep.mubr.f32.mxu1 %v280_v2  ;;  %v163_v1 = vld [vmem:[#allocation3 + $0x1e8] sm:$0xff]  ;;  %v244_v0 = vld [vmem:[#allocation6 + $0x70] sm:$0xff] }
  0xb6   :  { %2051 = vmatpush3.bf16.msra.mxu1 %v2048_v59  ;;  %v114_v59 = vld [vmem:[#allocation3 + $0x60] sm:$0xff]  ;;  %v292_v2 = vld [vmem:[#allocation6 + $0x1f0] sm:$0xff] }
  0xb7   :  { %2053 = vmatprep.subr.bf16.mxu1 %v2052_v3 }
  0xb8   :  { %801 = vmatmul.mubr.f32.gmra.mrb[4].mxu0 %v104_v6  ;;  %1041 = vmatmul.mubr.f32.gmra.mrb[4].mxu1 %v152_v7  ;;  %v293_v6 = vld [vmem:[#allocation6 + $0x1f8] sm:$0xff] }
  0xb9   :  { %805 = vmatprep.mubr.f32.mxu0 %v233_v8  ;;  %1045 = vmatprep.mubr.f32.mxu1 %v281_v9  ;;  %v117_v7 = vld [vmem:[#allocation3 + $0x78] sm:$0xff]  ;;  %v246_v9 = vld [vmem:[#allocation6 + $0x80] sm:$0xff] }
  0xba   :  { %2055 = vmatpush3.bf16.msra.mxu1 %v2052_v3  ;;  %v116_v3 = vld [vmem:[#allocation3 + $0x70] sm:$0xff]  ;;  %v165_v8 = vld [vmem:[#allocation3 + $0x1f8] sm:$0xff] }
  0xbb   :  { %2057 = vmatprep.subr.bf16.mxu1 %v2056_v10 }
  0xbc   :  { %806 = vmatmul.mubr.f32.gmra.mrb[6].mxu0 %v105_v13  ;;  %1046 = vmatmul.mubr.f32.gmra.mrb[6].mxu1 %v153_v14  ;;  %v247_v13 = vld [vmem:[#allocation6 + $0x88] sm:$0xff]  ;;  %v360_v14 = vld [vmem:[#allocation8 + $0x10] sm:$0xff] }
  0xbd   :  { %810 = vmatprep.mubr.f32.mxu0 %v234_v15  ;;  %1050 = vmatprep.mubr.f32.mxu1 %v282_v16  ;;  %v119_v15 = vld [vmem:[#allocation3 + $0x88] sm:$0xff]  ;;  %v361_v16 = vld [vmem:[#allocation8 + $0x18] sm:$0xff] }
  0xbe   :  { %2059 = vmatpush3.bf16.msra.mxu1 %v2056_v10  ;;  %v358_v10 = vld [vmem:[#allocation8] sm:$0xff] }
  0xbf   :  { %2061 = vmatprep.subr.bf16.mxu1 %v2060_v17 }
  0xc0   :  { %811 = vmatmul.mubr.f32.gmra.mrb[8].mxu0 %v106_v20  ;;  %1051 = vmatmul.mubr.f32.gmra.mrb[8].mxu1 %v154_v21  ;;  %v363_v20 = vld [vmem:[#allocation8 + $0x28] sm:$0xff]  ;;  %v249_v21 = vld [vmem:[#allocation6 + $0x98] sm:$0xff] }
  0xc1   :  { %815 = vmatprep.mubr.f32.mxu0 %v235_v22  ;;  %1055 = vmatprep.mubr.f32.mxu1 %v283_v23  ;;  %v364_v22 = vld [vmem:[#allocation8 + $0x30] sm:$0xff]  ;;  %v121_v23 = vld [vmem:[#allocation3 + $0x98] sm:$0xff] }
  0xc2   :  { %2063 = vmatpush3.bf16.msra.mxu1 %v2060_v17  ;;  %v248_v17 = vld [vmem:[#allocation6 + $0x90] sm:$0xff] }
  0xc3   :  { %2065 = vmatprep.subr.bf16.mxu1 %v2064_v24 }
  0xc4   :  { %816 = vmatmul.mubr.f32.gmra.mrb[10].mxu0 %v107_v27  ;;  %1056 = vmatmul.mubr.f32.gmra.mrb[10].mxu1 %v155_v28  ;;  %v122_v27 = vld [vmem:[#allocation3 + $0xa0] sm:$0xff]  ;;  %v367_v28 = vld [vmem:[#allocation8 + $0x48] sm:$0xff] }
  0xc5   :  { %820 = vmatprep.mubr.f32.mxu0 %v236_v29  ;;  %1060 = vmatprep.mubr.f32.mxu1 %v284_v30  ;;  %v251_v29 = vld [vmem:[#allocation6 + $0xa8] sm:$0xff]  ;;  %v368_v30 = vld [vmem:[#allocation8 + $0x50] sm:$0xff] }
  0xc6   :  { %2067 = vmatpush3.bf16.msra.mxu1 %v2064_v24  ;;  %v365_v24 = vld [vmem:[#allocation8 + $0x38] sm:$0xff] }
  0xc7   :  { %2069 = vmatprep.subr.bf16.mxu1 %v2068_v31 }
  0xc8   :  { %821 = vmatmul.mubr.f32.gmra.mrb[12].mxu0 %v108_v34  ;;  %1061 = vmatmul.mubr.f32.gmra.mrb[12].mxu1 %v156_v35  ;;  %v370_v34 = vld [vmem:[#allocation8 + $0x60] sm:$0xff]  ;;  %v124_v35 = vld [vmem:[#allocation3 + $0xb0] sm:$0xff] }
  0xc9   :  { %825 = vmatprep.mubr.f32.mxu0 %v237_v36  ;;  %1065 = vmatprep.mubr.f32.mxu1 %v285_v37  ;;  %v371_v36 = vld [vmem:[#allocation8 + $0x68] sm:$0xff]  ;;  %v253_v37 = vld [vmem:[#allocation6 + $0xb8] sm:$0xff] }
  0xca   :  { %2071 = vmatpush3.bf16.msra.mxu1 %v2068_v31  ;;  %v123_v31 = vld [vmem:[#allocation3 + $0xa8] sm:$0xff] }
  0xcb   :  { %2073 = vmatprep.subr.bf16.mxu1 %v2072_v38 }
  0xcc   :  { %826 = vmatmul.mubr.f32.gmra.mrb[14].mxu0 %v109_v39  ;;  %1066 = vmatmul.mubr.f32.gmra.mrb[14].mxu1 %v157_v40  ;;  %v125_v39 = vld [vmem:[#allocation3 + $0xb8] sm:$0xff] }
  0xcd   :  { %830 = vmatprep.mubr.f32.mxu0 %v238_v41  ;;  %1070 = vmatprep.mubr.f32.mxu1 %v286_v42  ;;  %v373_v40 = vld [vmem:[#allocation8 + $0x78] sm:$0xff]  ;;  %v254_v41 = vld [vmem:[#allocation6 + $0xc0] sm:$0xff] }
  0xce   :  { %2075 = vmatpush3.bf16.msra.mxu1 %v2072_v38  ;;  %v372_v38 = vld [vmem:[#allocation8 + $0x70] sm:$0xff]  ;;  %v374_v42 = vld [vmem:[#allocation8 + $0x80] sm:$0xff] }
  0xd0   :  { %831 = vmatmul.mubr.f32.gmra.mrb[16].mxu0 %v110_v43  ;;  %1071 = vmatmul.mubr.f32.gmra.mrb[16].mxu1 %v158_v44  ;;  %v126_v43 = vld [vmem:[#allocation3 + $0xc0] sm:$0xff]  ;;  %v375_v44 = vld [vmem:[#allocation8 + $0x88] sm:$0xff] }
  0xd1   :  { %835 = vmatprep.mubr.f32.mxu0 %v239_v45  ;;  %1075 = vmatprep.mubr.f32.mxu1 %v287_v46  ;;  %v255_v45 = vld [vmem:[#allocation6 + $0xc8] sm:$0xff]  ;;  %v376_v46 = vld [vmem:[#allocation8 + $0x90] sm:$0xff] }
  0xd4   :  { %836 = vmatmul.mubr.f32.gmra.mrb[18].mxu0 %v111_v47  ;;  %1076 = vmatmul.mubr.f32.gmra.mrb[18].mxu1 %v159_v48  ;;  %v127_v47 = vld [vmem:[#allocation3 + $0xc8] sm:$0xff]  ;;  %v377_v48 = vld [vmem:[#allocation8 + $0x98] sm:$0xff] }
  0xd5   :  { %840 = vmatprep.mubr.f32.mxu0 %v240_v49  ;;  %1080 = vmatprep.mubr.f32.mxu1 %v288_v50  ;;  %v256_v49 = vld [vmem:[#allocation6 + $0xd0] sm:$0xff]  ;;  %v378_v50 = vld [vmem:[#allocation8 + $0xa0] sm:$0xff] }
  0xd8   :  { %841 = vmatmul.mubr.f32.gmra.mrb[20].mxu0 %v112_v51  ;;  %1081 = vmatmul.mubr.f32.gmra.mrb[20].mxu1 %v160_v52  ;;  %v128_v51 = vld [vmem:[#allocation3 + $0xd0] sm:$0xff]  ;;  %v379_v52 = vld [vmem:[#allocation8 + $0xa8] sm:$0xff] }
  0xd9   :  { %845 = vmatprep.mubr.f32.mxu0 %v241_v53  ;;  %1085 = vmatprep.mubr.f32.mxu1 %v289_v54  ;;  %v257_v53 = vld [vmem:[#allocation6 + $0xd8] sm:$0xff]  ;;  %v380_v54 = vld [vmem:[#allocation8 + $0xb0] sm:$0xff] }
  0xdc   :  { %846 = vmatmul.mubr.f32.gmra.mrb[22].mxu0 %v113_v55  ;;  %1086 = vmatmul.mubr.f32.gmra.mrb[22].mxu1 %v161_v56  ;;  %v129_v55 = vld [vmem:[#allocation3 + $0xd8] sm:$0xff] }
  0xdd   :  { %850 = vmatprep.mubr.f32.mxu0 %v242_v57  ;;  %1090 = vmatprep.mubr.f32.mxu1 %v290_v58  ;;  %v381_v56 = vld [vmem:[#allocation8 + $0xb8] sm:$0xff]  ;;  %v258_v57 = vld [vmem:[#allocation6 + $0xe0] sm:$0xff] }
  0xde   :  { %v382_v58 = vld [vmem:[#allocation8 + $0xc0] sm:$0xff] }
  0xe0   :  { %851 = vmatmul.mubr.f32.gmra.mrb[24].mxu0 %v114_v59  ;;  %1091 = vmatmul.mubr.f32.gmra.mrb[24].mxu1 %v162_v60  ;;  %v130_v59 = vld [vmem:[#allocation3 + $0xe0] sm:$0xff]  ;;  %v383_v60 = vld [vmem:[#allocation8 + $0xc8] sm:$0xff] }
  0xe1   :  { %855 = vmatprep.mubr.f32.mxu0 %v243_v61  ;;  %1095 = vmatprep.mubr.f32.mxu1 %v291_v62  ;;  %v259_v61 = vld [vmem:[#allocation6 + $0xe8] sm:$0xff]  ;;  %v384_v62 = vld [vmem:[#allocation8 + $0xd0] sm:$0xff] }
  0xe4   :  { %856 = vmatmul.mubr.f32.gmra.mrb[26].mxu0 %v115_v63  ;;  %1096 = vmatmul.mubr.f32.gmra.mrb[26].mxu1 %v163_v1  ;;  %v131_v63 = vld [vmem:[#allocation3 + $0xe8] sm:$0xff]  ;;  %v385_v1 = vld [vmem:[#allocation8 + $0xd8] sm:$0xff] }
  0xe5   :  { %860 = vmatprep.mubr.f32.mxu0 %v244_v0  ;;  %1100 = vmatprep.mubr.f32.mxu1 %v292_v2  ;;  %v260_v0 = vld [vmem:[#allocation6 + $0xf0] sm:$0xff]  ;;  %v386_v2 = vld [vmem:[#allocation8 + $0xe0] sm:$0xff] }
  0xe8   :  { %861 = vmatmul.mubr.f32.gmra.mrb[28].mxu0 %v116_v3  ;;  %1101 = vmatmul.mubr.f32.gmra.mrb[28].mxu1 %v164_v4  ;;  %v132_v3 = vld [vmem:[#allocation3 + $0xf0] sm:$0xff]  ;;  %v387_v4 = vld [vmem:[#allocation8 + $0xe8] sm:$0xff] }
  0xe9   :  { %865 = vmatprep.mubr.f32.mxu0 %v245_v5  ;;  %1105 = vmatprep.mubr.f32.mxu1 %v293_v6  ;;  %v261_v5 = vld [vmem:[#allocation6 + $0xf8] sm:$0xff]  ;;  %v388_v6 = vld [vmem:[#allocation8 + $0xf0] sm:$0xff] }
  0xec   :  { %866 = vmatmul.mubr.f32.gmra.mrb[30].mxu0 %v117_v7  ;;  %1106 = vmatmul.mubr.f32.gmra.mrb[30].mxu1 %v165_v8  ;;  %v133_v7 = vld [vmem:[#allocation3 + $0xf8] sm:$0xff] }
  0xed   :  { %870 = vmatprep.mubr.f32.mxu0 %v246_v9  ;;  %1900 = vmatprep.mubr.f32.mxu1 %v358_v10  ;;  %v389_v8 = vld [vmem:[#allocation8 + $0xf8] sm:$0xff]  ;;  %v262_v9 = vld [vmem:[#allocation6 + $0x100] sm:$0xff] }
  0xee   :  { %v390_v10 = vld [vmem:[#allocation8 + $0x100] sm:$0xff] }
  0xf0   :  { %871 = vmatmul.mubr.f32.gmra.mrb[32].mxu0 %v118_v11  ;;  %1901 = vmatmul.mubr.f32.vlgmr.msra.gmra.mrb[32].mxu1 %v359_v12  ;;  %v134_v11 = vld [vmem:[#allocation3 + $0x100] sm:$0xff]  ;;  %v391_v12 = vld [vmem:[#allocation8 + $0x108] sm:$0xff] }
  0xf1   :  { %875 = vmatprep.mubr.f32.mxu0 %v247_v13  ;;  %1903 = vmatprep.mubr.f32.mxu1 %v360_v14  ;;  %v263_v13 = vld [vmem:[#allocation6 + $0x108] sm:$0xff]  ;;  %v392_v14 = vld [vmem:[#allocation8 + $0x110] sm:$0xff] }
  0xf4   :  { %876 = vmatmul.mubr.f32.gmra.mrb[34].mxu0 %v119_v15  ;;  %1904 = vmatmul.mubr.f32.gmra.mrb[34].mxu1 %v361_v16  ;;  %v135_v15 = vld [vmem:[#allocation3 + $0x108] sm:$0xff]  ;;  %v393_v16 = vld [vmem:[#allocation8 + $0x118] sm:$0xff] }
  0xf5   :  { %880 = vmatprep.mubr.f32.mxu0 %v248_v17  ;;  %1906 = vmatprep.mubr.f32.mxu1 %v362_v18  ;;  %v264_v17 = vld [vmem:[#allocation6 + $0x110] sm:$0xff]  ;;  %v394_v18 = vld [vmem:[#allocation8 + $0x120] sm:$0xff] }
  0xf8   :  { %881 = vmatmul.mubr.f32.gmra.mrb[36].mxu0 %v120_v19  ;;  %1907 = vmatmul.mubr.f32.gmra.mrb[36].mxu1 %v363_v20  ;;  %v136_v19 = vld [vmem:[#allocation3 + $0x110] sm:$0xff]  ;;  %v395_v20 = vld [vmem:[#allocation8 + $0x128] sm:$0xff] }
  0xf9   :  { %885 = vmatprep.mubr.f32.mxu0 %v249_v21  ;;  %1909 = vmatprep.mubr.f32.mxu1 %v364_v22  ;;  %v265_v21 = vld [vmem:[#allocation6 + $0x118] sm:$0xff]  ;;  %v396_v22 = vld [vmem:[#allocation8 + $0x130] sm:$0xff] }
  0xfc   :  { %886 = vmatmul.mubr.f32.gmra.mrb[38].mxu0 %v121_v23  ;;  %1910 = vmatmul.mubr.f32.gmra.mrb[38].mxu1 %v365_v24  ;;  %v137_v23 = vld [vmem:[#allocation3 + $0x118] sm:$0xff] }
  0xfd   :  { %890 = vmatprep.mubr.f32.mxu0 %v250_v25  ;;  %1912 = vmatprep.mubr.f32.mxu1 %v366_v26  ;;  %v397_v24 = vld [vmem:[#allocation8 + $0x138] sm:$0xff]  ;;  %v266_v25 = vld [vmem:[#allocation6 + $0x120] sm:$0xff] }
  0xfe   :  { %v398_v26 = vld [vmem:[#allocation8 + $0x140] sm:$0xff] }
 0x100   :  { %891 = vmatmul.mubr.f32.gmra.mrb[40].mxu0 %v122_v27  ;;  %1913 = vmatmul.mubr.f32.gmra.mrb[40].mxu1 %v367_v28  ;;  %v138_v27 = vld [vmem:[#allocation3 + $0x120] sm:$0xff]  ;;  %v399_v28 = vld [vmem:[#allocation8 + $0x148] sm:$0xff] }
 0x101   :  { %895 = vmatprep.mubr.f32.mxu0 %v251_v29  ;;  %1915 = vmatprep.mubr.f32.mxu1 %v368_v30  ;;  %v267_v29 = vld [vmem:[#allocation6 + $0x128] sm:$0xff]  ;;  %v400_v30 = vld [vmem:[#allocation8 + $0x150] sm:$0xff] }
 0x104   :  { %896 = vmatmul.mubr.f32.gmra.mrb[42].mxu0 %v123_v31  ;;  %1916 = vmatmul.mubr.f32.gmra.mrb[42].mxu1 %v369_v32  ;;  %v139_v31 = vld [vmem:[#allocation3 + $0x128] sm:$0xff]  ;;  %v401_v32 = vld [vmem:[#allocation8 + $0x158] sm:$0xff] }
 0x105   :  { %900 = vmatprep.mubr.f32.mxu0 %v252_v33  ;;  %1918 = vmatprep.mubr.f32.mxu1 %v370_v34  ;;  %v268_v33 = vld [vmem:[#allocation6 + $0x130] sm:$0xff]  ;;  %v402_v34 = vld [vmem:[#allocation8 + $0x160] sm:$0xff] }
 0x108   :  { %901 = vmatmul.mubr.f32.gmra.mrb[44].mxu0 %v124_v35  ;;  %1919 = vmatmul.mubr.f32.gmra.mrb[44].mxu1 %v371_v36  ;;  %v140_v35 = vld [vmem:[#allocation3 + $0x130] sm:$0xff]  ;;  %v403_v36 = vld [vmem:[#allocation8 + $0x168] sm:$0xff] }
 0x109   :  { %905 = vmatprep.mubr.f32.mxu0 %v253_v37  ;;  %1921 = vmatprep.mubr.f32.mxu1 %v372_v38  ;;  %v269_v37 = vld [vmem:[#allocation6 + $0x138] sm:$0xff]  ;;  %v404_v38 = vld [vmem:[#allocation8 + $0x170] sm:$0xff] }
 0x10c   :  { %906 = vmatmul.mubr.f32.gmra.mrb[46].mxu0 %v125_v39  ;;  %1922 = vmatmul.mubr.f32.gmra.mrb[46].mxu1 %v373_v40  ;;  %v141_v39 = vld [vmem:[#allocation3 + $0x138] sm:$0xff] }
 0x10d   :  { %910 = vmatprep.mubr.f32.mxu0 %v254_v41  ;;  %1924 = vmatprep.mubr.f32.mxu1 %v374_v42  ;;  %v405_v40 = vld [vmem:[#allocation8 + $0x178] sm:$0xff]  ;;  %v270_v41 = vld [vmem:[#allocation6 + $0x140] sm:$0xff] }
 0x10e   :  { %v406_v42 = vld [vmem:[#allocation8 + $0x180] sm:$0xff] }
 0x110   :  { %911 = vmatmul.mubr.f32.gmra.mrb[48].mxu0 %v126_v43  ;;  %1925 = vmatmul.mubr.f32.gmra.mrb[48].mxu1 %v375_v44  ;;  %v142_v43 = vld [vmem:[#allocation3 + $0x140] sm:$0xff]  ;;  %v407_v44 = vld [vmem:[#allocation8 + $0x188] sm:$0xff] }
 0x111   :  { %915 = vmatprep.mubr.f32.mxu0 %v255_v45  ;;  %1927 = vmatprep.mubr.f32.mxu1 %v376_v46  ;;  %v271_v45 = vld [vmem:[#allocation6 + $0x148] sm:$0xff]  ;;  %v408_v46 = vld [vmem:[#allocation8 + $0x190] sm:$0xff] }
 0x114   :  { %916 = vmatmul.mubr.f32.gmra.mrb[50].mxu0 %v127_v47  ;;  %1928 = vmatmul.mubr.f32.gmra.mrb[50].mxu1 %v377_v48  ;;  %v143_v47 = vld [vmem:[#allocation3 + $0x148] sm:$0xff]  ;;  %v409_v48 = vld [vmem:[#allocation8 + $0x198] sm:$0xff] }
 0x115   :  { %920 = vmatprep.mubr.f32.mxu0 %v256_v49  ;;  %1930 = vmatprep.mubr.f32.mxu1 %v378_v50  ;;  %v272_v49 = vld [vmem:[#allocation6 + $0x150] sm:$0xff]  ;;  %v410_v50 = vld [vmem:[#allocation8 + $0x1a0] sm:$0xff] }
 0x118   :  { %921 = vmatmul.mubr.f32.gmra.mrb[52].mxu0 %v128_v51  ;;  %1931 = vmatmul.mubr.f32.gmra.mrb[52].mxu1 %v379_v52  ;;  %v144_v51 = vld [vmem:[#allocation3 + $0x150] sm:$0xff]  ;;  %v411_v52 = vld [vmem:[#allocation8 + $0x1a8] sm:$0xff] }
 0x119   :  { %925 = vmatprep.mubr.f32.mxu0 %v257_v53  ;;  %1933 = vmatprep.mubr.f32.mxu1 %v380_v54  ;;  %v273_v53 = vld [vmem:[#allocation6 + $0x158] sm:$0xff]  ;;  %v412_v54 = vld [vmem:[#allocation8 + $0x1b0] sm:$0xff] }
 0x11c   :  { %926 = vmatmul.mubr.f32.gmra.mrb[54].mxu0 %v129_v55  ;;  %1934 = vmatmul.mubr.f32.gmra.mrb[54].mxu1 %v381_v56  ;;  %v145_v55 = vld [vmem:[#allocation3 + $0x158] sm:$0xff] }
 0x11d   :  { %930 = vmatprep.mubr.f32.mxu0 %v258_v57  ;;  %1936 = vmatprep.mubr.f32.mxu1 %v382_v58  ;;  %v413_v56 = vld [vmem:[#allocation8 + $0x1b8] sm:$0xff]  ;;  %v274_v57 = vld [vmem:[#allocation6 + $0x160] sm:$0xff] }
 0x11e   :  { %v414_v58 = vld [vmem:[#allocation8 + $0x1c0] sm:$0xff] }
 0x120   :  { %931 = vmatmul.mubr.f32.gmra.mrb[56].mxu0 %v130_v59  ;;  %1937 = vmatmul.mubr.f32.gmra.mrb[56].mxu1 %v383_v60  ;;  %v146_v59 = vld [vmem:[#allocation3 + $0x160] sm:$0xff]  ;;  %v415_v60 = vld [vmem:[#allocation8 + $0x1c8] sm:$0xff] }
 0x121   :  { %935 = vmatprep.mubr.f32.mxu0 %v259_v61  ;;  %1939 = vmatprep.mubr.f32.mxu1 %v384_v62  ;;  %v275_v61 = vld [vmem:[#allocation6 + $0x168] sm:$0xff]  ;;  %v416_v62 = vld [vmem:[#allocation8 + $0x1d0] sm:$0xff] }
 0x124   :  { %936 = vmatmul.mubr.f32.gmra.mrb[58].mxu0 %v131_v63  ;;  %1940 = vmatmul.mubr.f32.gmra.mrb[58].mxu1 %v385_v1  ;;  %v147_v63 = vld [vmem:[#allocation3 + $0x168] sm:$0xff]  ;;  %v417_v1 = vld [vmem:[#allocation8 + $0x1d8] sm:$0xff] }
 0x125   :  { %940 = vmatprep.mubr.f32.mxu0 %v260_v0  ;;  %1942 = vmatprep.mubr.f32.mxu1 %v386_v2  ;;  %v276_v0 = vld [vmem:[#allocation6 + $0x170] sm:$0xff]  ;;  %v418_v2 = vld [vmem:[#allocation8 + $0x1e0] sm:$0xff] }
 0x128   :  { %941 = vmatmul.mubr.f32.gmra.mrb[60].mxu0 %v132_v3  ;;  %1943 = vmatmul.mubr.f32.gmra.mrb[60].mxu1 %v387_v4  ;;  %v148_v3 = vld [vmem:[#allocation3 + $0x170] sm:$0xff]  ;;  %v419_v4 = vld [vmem:[#allocation8 + $0x1e8] sm:$0xff] }
 0x129   :  { %945 = vmatprep.mubr.f32.mxu0 %v261_v5  ;;  %1945 = vmatprep.mubr.f32.mxu1 %v388_v6  ;;  %v277_v5 = vld [vmem:[#allocation6 + $0x178] sm:$0xff]  ;;  %v420_v6 = vld [vmem:[#allocation8 + $0x1f0] sm:$0xff] }
 0x12c   :  { %946 = vmatmul.mubr.f32.gmra.mrb[62].mxu0 %v133_v7  ;;  %1946 = vmatmul.mubr.f32.gmra.mrb[62].mxu1 %v389_v8  ;;  %v149_v7 = vld [vmem:[#allocation3 + $0x178] sm:$0xff] }
 0x12d   :  { %950 = vmatprep.mubr.f32.mxu0 %v262_v9  ;;  %1948 = vmatprep.mubr.f32.mxu1 %v390_v10  ;;  %v421_v8 = vld [vmem:[#allocation8 + $0x1f8] sm:$0xff] }
 0x130   :  { %951 = vmatmul.mubr.f32.gmra.mrb[64].mxu0 %v134_v11  ;;  %1949 = vmatmul.mubr.f32.gmra.mrb[64].mxu1 %v391_v12 }
 0x131   :  { %955 = vmatprep.mubr.f32.mxu0 %v263_v13  ;;  %1951 = vmatprep.mubr.f32.mxu1 %v392_v14 }
 0x134   :  { %956 = vmatmul.mubr.f32.gmra.mrb[66].mxu0 %v135_v15  ;;  %1952 = vmatmul.mubr.f32.gmra.mrb[66].mxu1 %v393_v16 }
 0x135   :  { %960 = vmatprep.mubr.f32.mxu0 %v264_v17  ;;  %1954 = vmatprep.mubr.f32.mxu1 %v394_v18 }
 0x138   :  { %961 = vmatmul.mubr.f32.gmra.mrb[68].mxu0 %v136_v19  ;;  %1955 = vmatmul.mubr.f32.gmra.mrb[68].mxu1 %v395_v20 }
 0x139   :  { %965 = vmatprep.mubr.f32.mxu0 %v265_v21  ;;  %1957 = vmatprep.mubr.f32.mxu1 %v396_v22 }
 0x13c   :  { %966 = vmatmul.mubr.f32.gmra.mrb[70].mxu0 %v137_v23  ;;  %1958 = vmatmul.mubr.f32.gmra.mrb[70].mxu1 %v397_v24 }
 0x13d   :  { %970 = vmatprep.mubr.f32.mxu0 %v266_v25  ;;  %1960 = vmatprep.mubr.f32.mxu1 %v398_v26 }
 0x140   :  { %971 = vmatmul.mubr.f32.gmra.mrb[72].mxu0 %v138_v27  ;;  %1961 = vmatmul.mubr.f32.gmra.mrb[72].mxu1 %v399_v28 }
 0x141   :  { %975 = vmatprep.mubr.f32.mxu0 %v267_v29  ;;  %1963 = vmatprep.mubr.f32.mxu1 %v400_v30 }
 0x144   :  { %976 = vmatmul.mubr.f32.gmra.mrb[74].mxu0 %v139_v31  ;;  %1964 = vmatmul.mubr.f32.gmra.mrb[74].mxu1 %v401_v32 }
 0x145   :  { %980 = vmatprep.mubr.f32.mxu0 %v268_v33  ;;  %1966 = vmatprep.mubr.f32.mxu1 %v402_v34 }
 0x148   :  { %981 = vmatmul.mubr.f32.gmra.mrb[76].mxu0 %v140_v35  ;;  %1967 = vmatmul.mubr.f32.gmra.mrb[76].mxu1 %v403_v36 }
 0x149   :  { %985 = vmatprep.mubr.f32.mxu0 %v269_v37  ;;  %1969 = vmatprep.mubr.f32.mxu1 %v404_v38 }
 0x14c   :  { %986 = vmatmul.mubr.f32.gmra.mrb[78].mxu0 %v141_v39  ;;  %1970 = vmatmul.mubr.f32.gmra.mrb[78].mxu1 %v405_v40 }
 0x14d   :  { %990 = vmatprep.mubr.f32.mxu0 %v270_v41  ;;  %1972 = vmatprep.mubr.f32.mxu1 %v406_v42 }
 0x150   :  { %991 = vmatmul.mubr.f32.gmra.mrb[80].mxu0 %v142_v43  ;;  %1973 = vmatmul.mubr.f32.gmra.mrb[80].mxu1 %v407_v44 }
 0x151   :  { %995 = vmatprep.mubr.f32.mxu0 %v271_v45  ;;  %1975 = vmatprep.mubr.f32.mxu1 %v408_v46 }
 0x154   :  { %996 = vmatmul.mubr.f32.gmra.mrb[82].mxu0 %v143_v47  ;;  %1976 = vmatmul.mubr.f32.gmra.mrb[82].mxu1 %v409_v48 }
 0x155   :  { %1000 = vmatprep.mubr.f32.mxu0 %v272_v49  ;;  %1978 = vmatprep.mubr.f32.mxu1 %v410_v50 }
 0x158   :  { %1001 = vmatmul.mubr.f32.gmra.mrb[84].mxu0 %v144_v51  ;;  %1979 = vmatmul.mubr.f32.gmra.mrb[84].mxu1 %v411_v52 }
 0x159   :  { %1005 = vmatprep.mubr.f32.mxu0 %v273_v53  ;;  %1981 = vmatprep.mubr.f32.mxu1 %v412_v54 }
 0x15c   :  { %1006 = vmatmul.mubr.f32.gmra.mrb[86].mxu0 %v145_v55  ;;  %1982 = vmatmul.mubr.f32.gmra.mrb[86].mxu1 %v413_v56 }
 0x15d   :  { %1010 = vmatprep.mubr.f32.mxu0 %v274_v57  ;;  %1984 = vmatprep.mubr.f32.mxu1 %v414_v58 }
 0x160   :  { %1011 = vmatmul.mubr.f32.gmra.mrb[88].mxu0 %v146_v59  ;;  %1985 = vmatmul.mubr.f32.gmra.mrb[88].mxu1 %v415_v60 }
 0x161   :  { %1015 = vmatprep.mubr.f32.mxu0 %v275_v61  ;;  %1987 = vmatprep.mubr.f32.mxu1 %v416_v62 }
 0x164   :  { %1016 = vmatmul.mubr.f32.gmra.mrb[90].mxu0 %v147_v63  ;;  %1988 = vmatmul.mubr.f32.gmra.mrb[90].mxu1 %v417_v1 }
 0x165   :  { %1020 = vmatprep.mubr.f32.mxu0 %v276_v0  ;;  %1990 = vmatprep.mubr.f32.mxu1 %v418_v2 }
 0x168   :  { %1021 = vmatmul.mubr.f32.gmra.mrb[92].mxu0 %v148_v3  ;;  %1991 = vmatmul.mubr.f32.gmra.mrb[92].mxu1 %v419_v4 }
 0x169   :  { %1025 = vmatprep.mubr.f32.mxu0 %v277_v5  ;;  %1993 = vmatprep.mubr.f32.mxu1 %v420_v6 }
 0x16c   :  { %1026 = vmatmul.mubr.f32.gmra.mrb[94].mxu0 %v149_v7  ;;  %1994 = vmatmul.mubr.f32.gmra.mrb[94].mxu1 %v421_v8 }
 0x183   :  { %v2457_v9 = vpop.f32.mrb[0].mxu1  ;;  %v2459_v10 = vpop.f32.mrb[0].mxu0 }
 0x184   :  { %v1034_v11 = vpop.f32.mrb[1].mxu1  ;;  %v794_v12 = vpop.f32.mrb[1].mxu0 }
 0x185   :  { %v2519_v12 = vld [vmem:[#allocation11] ss:$0 sm:$0xff] }
 0x187   :  { %v2461_v13 = vpop.f32.mrb[2].mxu1  ;;  %v797_v14 = vpop.f32.mrb[2].mxu0 }
 0x188   :  { %v1039_v15 = vpop.f32.mrb[3].mxu1  ;;  %v799_v16 = vpop.f32.mrb[3].mxu0 }
 0x18b   :  { %v2463_v17 = vpop.f32.mrb[4].mxu1  ;;  %v2465_v18 = vpop.f32.mrb[4].mxu0 }
 0x18c   :  { %v1044_v19 = vpop.f32.mrb[5].mxu1  ;;  %v804_v20 = vpop.f32.mrb[5].mxu0 }
 0x18f   :  { %v2467_v21 = vpop.f32.mrb[6].mxu1  ;;  %v2469_v22 = vpop.f32.mrb[6].mxu0 }
 0x190   :  { %v1049_v23 = vpop.f32.mrb[7].mxu1  ;;  %v809_v24 = vpop.f32.mrb[7].mxu0 }
 0x191   :  { %v2523_v23 = vld [vmem:[#allocation12] ss:$0 sm:$0xff] }
 0x193   :  { %v2471_v25 = vpop.f32.mrb[8].mxu1  ;;  %v2473_v26 = vpop.f32.mrb[8].mxu0 }
 0x194   :  { %v1054_v27 = vpop.f32.mrb[9].mxu1  ;;  %v814_v28 = vpop.f32.mrb[9].mxu0 }
 0x197   :  { %v2475_v29 = vpop.f32.mrb[10].mxu1  ;;  %v2477_v30 = vpop.f32.mrb[10].mxu0 }
 0x198   :  { %v1059_v31 = vpop.f32.mrb[11].mxu1  ;;  %v819_v32 = vpop.f32.mrb[11].mxu0 }
 0x19b   :  { %v2479_v33 = vpop.f32.mrb[12].mxu1  ;;  %v2481_v34 = vpop.f32.mrb[12].mxu0 }
 0x19c   :  { %v1064_v35 = vpop.f32.mrb[13].mxu1  ;;  %v824_v36 = vpop.f32.mrb[13].mxu0 }
 0x19f   :  { %v2483_v37 = vpop.f32.mrb[14].mxu1  ;;  %v2485_v38 = vpop.f32.mrb[14].mxu0 }
 0x1a0   :  { %v1069_v39 = vpop.f32.mrb[15].mxu1  ;;  %v829_v40 = vpop.f32.mrb[15].mxu0 }
 0x1a3   :  { %v2487_v41 = vpop.f32.mrb[16].mxu1  ;;  %v2489_v42 = vpop.f32.mrb[16].mxu0 }
 0x1a4   :  { %v1074_v43 = vpop.f32.mrb[17].mxu1  ;;  %v834_v44 = vpop.f32.mrb[17].mxu0 }
 0x1a7   :  { %v2491_v45 = vpop.f32.mrb[18].mxu1  ;;  %v2493_v46 = vpop.f32.mrb[18].mxu0 }
 0x1a8   :  { %v1079_v47 = vpop.f32.mrb[19].mxu1  ;;  %v839_v48 = vpop.f32.mrb[19].mxu0 }
 0x1ab   :  { %v2495_v49 = vpop.f32.mrb[20].mxu1  ;;  %v2497_v50 = vpop.f32.mrb[20].mxu0 }
 0x1ac   :  { %v1084_v51 = vpop.f32.mrb[21].mxu1  ;;  %v844_v52 = vpop.f32.mrb[21].mxu0 }
 0x1af   :  { %v2499_v53 = vpop.f32.mrb[22].mxu1  ;;  %v2501_v54 = vpop.f32.mrb[22].mxu0 }
 0x1b0   :  { %v1089_v55 = vpop.f32.mrb[23].mxu1  ;;  %v849_v56 = vpop.f32.mrb[23].mxu0 }
 0x1b3   :  { %v2503_v57 = vpop.f32.mrb[24].mxu1  ;;  %v2505_v58 = vpop.f32.mrb[24].mxu0 }
 0x1b4   :  { %v1094_v59 = vpop.f32.mrb[25].mxu1  ;;  %v854_v60 = vpop.f32.mrb[25].mxu0 }
 0x1b7   :  { %v2507_v61 = vpop.f32.mrb[26].mxu1  ;;  %v2509_v62 = vpop.f32.mrb[26].mxu0 }
 0x1b8   :  { %v1099_v63 = vpop.f32.mrb[27].mxu1  ;;  %v859_v1 = vpop.f32.mrb[27].mxu0 }
 0x1bb   :  { %v2511_v0 = vpop.f32.mrb[28].mxu1  ;;  %v2513_v2 = vpop.f32.mrb[28].mxu0 }
 0x1bc   :  { %v1104_v3 = vpop.f32.mrb[29].mxu1  ;;  %v864_v4 = vpop.f32.mrb[29].mxu0 }
 0x1bf   :  { %v2515_v5 = vpop.f32.mrb[30].mxu1  ;;  %v2517_v6 = vpop.f32.mrb[30].mxu0 }
 0x1c0   :  { %v1109_v7 = vpop.f32.mrb[31].mxu1  ;;  %v869_v8 = vpop.f32.mrb[31].mxu0 }
 0x1c3   :  { %v1902_v11 = vpop.f32.mrb[32].mxu1  ;;  %v2521_v15 = vpop.f32.mrb[32].mxu0 }
 0x1c4   :  { %v1183_v16 = vadd.f32 %v1902_v11, %v797_v14  ;;  %v1177_v19 = vpop.f32.mrb[33].mxu1  ;;  %v874_v20 = vpop.f32.mrb[33].mxu0 }
 0x1c5   :  { %v1178_v24 = vadd.f32 %v1177_v19, %v2459_v10 }
 0x1c6   :  { %v1504_v27 = vmul.f32 %v2519_v12, %v1183_v16 }
 0x1c7   :  { %v1503_v28 = vmul.f32 %v2519_v12, %v1178_v24  ;;  %v1905_v31 = vpop.f32.mrb[34].mxu1  ;;  %v2528_v32 = vpop.f32.mrb[34].mxu0 }
 0x1c8   :  { %v1575_v35 = vadd.f32 %v2523_v23, %v1504_v27  ;;  %v1193_v36 = vadd.f32 %v1905_v31, %v2469_v22  ;;  %v1187_v39 = vpop.f32.mrb[35].mxu1  ;;  %v879_v40 = vpop.f32.mrb[35].mxu0 }
 0x1c9   :  { %v1574_v14 = vadd.f32 %v2523_v23, %v1503_v28  ;;  %v1188_v43 = vadd.f32 %v1187_v39, %v2465_v18 }
 0x1ca   :  { %v1639_v44 = vmax.f32 %v1575_v35, 0.0  ;;  %v1506_v10 = vmul.f32 %v2519_v12, %v1193_v36 }
 0x1cb   :  { %v1638_v47 = vmax.f32 %v1574_v14, 0.0  ;;  %v1505_v48 = vmul.f32 %v2519_v12, %v1188_v43  ;;  %v1908_v51 = vpop.f32.mrb[36].mxu1  ;;  %v2536_v52 = vpop.f32.mrb[36].mxu0 }
 0x1cc   :  { %1703 = vst [vmem:[#allocation14 + $0x8] sm:$0xff] %v1639_v44  ;;  %v1577_v55 = vadd.f32 %v2523_v23, %v1506_v10  ;;  %v1203_v22 = vadd.f32 %v1908_v51, %v2477_v30  ;;  %v1197_v56 = vpop.f32.mrb[37].mxu1  ;;  %v884_v59 = vpop.f32.mrb[37].mxu0 }
 0x1cd   :  { %1702 = vst [vmem:[#allocation14] sm:$0xff] %v1638_v47  ;;  %v1576_v60 = vadd.f32 %v2523_v23, %v1505_v48  ;;  %v1198_v18 = vadd.f32 %v1197_v56, %v2473_v26 }
 0x1ce   :  { %v1641_v63 = vmax.f32 %v1577_v55, 0.0  ;;  %v1508_v1 = vmul.f32 %v2519_v12, %v1203_v22 }
 0x1cf   :  { %v1640_v3 = vmax.f32 %v1576_v60, 0.0  ;;  %v1507_v4 = vmul.f32 %v2519_v12, %v1198_v18  ;;  %v1911_v7 = vpop.f32.mrb[38].mxu1  ;;  %v2544_v8 = vpop.f32.mrb[38].mxu0 }
 0x1d0   :  { %1705 = vst [vmem:[#allocation14 + $0x18] sm:$0xff] %v1641_v63  ;;  %v1579_v11 = vadd.f32 %v2523_v23, %v1508_v1  ;;  %v1213_v30 = vadd.f32 %v1911_v7, %v2485_v38  ;;  %v1207_v16 = vpop.f32.mrb[39].mxu1  ;;  %v889_v19 = vpop.f32.mrb[39].mxu0 }
 0x1d1   :  { %1704 = vst [vmem:[#allocation14 + $0x10] sm:$0xff] %v1640_v3  ;;  %v1578_v20 = vadd.f32 %v2523_v23, %v1507_v4  ;;  %v1208_v26 = vadd.f32 %v1207_v16, %v2481_v34 }
 0x1d2   :  { %v1643_v24 = vmax.f32 %v1579_v11, 0.0  ;;  %v1510_v27 = vmul.f32 %v2519_v12, %v1213_v30 }
 0x1d3   :  { %v1642_v28 = vmax.f32 %v1578_v20, 0.0  ;;  %v1509_v31 = vmul.f32 %v2519_v12, %v1208_v26  ;;  %v1914_v35 = vpop.f32.mrb[40].mxu1  ;;  %v2552_v36 = vpop.f32.mrb[40].mxu0 }
 0x1d4   :  { %1707 = vst [vmem:[#allocation14 + $0x28] sm:$0xff] %v1643_v24  ;;  %v1581_v39 = vadd.f32 %v2523_v23, %v1510_v27  ;;  %v1223_v38 = vadd.f32 %v1914_v35, %v2493_v46  ;;  %v1217_v40 = vpop.f32.mrb[41].mxu1  ;;  %v894_v14 = vpop.f32.mrb[41].mxu0 }
 0x1d5   :  { %1706 = vst [vmem:[#allocation14 + $0x20] sm:$0xff] %v1642_v28  ;;  %v1580_v43 = vadd.f32 %v2523_v23, %v1509_v31  ;;  %v1218_v34 = vadd.f32 %v1217_v40, %v2489_v42 }
 0x1d6   :  { %v1645_v44 = vmax.f32 %v1581_v39, 0.0  ;;  %v1512_v10 = vmul.f32 %v2519_v12, %v1223_v38 }
 0x1d7   :  { %v1644_v47 = vmax.f32 %v1580_v43, 0.0  ;;  %v1511_v48 = vmul.f32 %v2519_v12, %v1218_v34  ;;  %v1917_v51 = vpop.f32.mrb[42].mxu1  ;;  %v2560_v55 = vpop.f32.mrb[42].mxu0 }
 0x1d8   :  { %1709 = vst [vmem:[#allocation14 + $0x38] sm:$0xff] %v1645_v44  ;;  %v1583_v22 = vadd.f32 %v2523_v23, %v1512_v10  ;;  %v1233_v46 = vadd.f32 %v1917_v51, %v2501_v54  ;;  %v1227_v56 = vpop.f32.mrb[43].mxu1  ;;  %v899_v59 = vpop.f32.mrb[43].mxu0 }
 0x1d9   :  { %1708 = vst [vmem:[#allocation14 + $0x30] sm:$0xff] %v1644_v47  ;;  %v1582_v60 = vadd.f32 %v2523_v23, %v1511_v48  ;;  %v1228_v42 = vadd.f32 %v1227_v56, %v2497_v50 }
 0x1da   :  { %v1647_v18 = vmax.f32 %v1583_v22, 0.0  ;;  %v1514_v63 = vmul.f32 %v2519_v12, %v1233_v46 }
 0x1db   :  { %v1646_v1 = vmax.f32 %v1582_v60, 0.0  ;;  %v1513_v3 = vmul.f32 %v2519_v12, %v1228_v42  ;;  %v1920_v4 = vpop.f32.mrb[44].mxu1  ;;  %v2568_v7 = vpop.f32.mrb[44].mxu0 }
 0x1dc   :  { %1711 = vst [vmem:[#allocation14 + $0x48] sm:$0xff] %v1647_v18  ;;  %v1585_v11 = vadd.f32 %v2523_v23, %v1514_v63  ;;  %v1243_v54 = vadd.f32 %v1920_v4, %v2509_v62  ;;  %v1237_v30 = vpop.f32.mrb[45].mxu1  ;;  %v904_v16 = vpop.f32.mrb[45].mxu0 }
 0x1dd   :  { %1710 = vst [vmem:[#allocation14 + $0x40] sm:$0xff] %v1646_v1  ;;  %v1584_v19 = vadd.f32 %v2523_v23, %v1513_v3  ;;  %v1238_v50 = vadd.f32 %v1237_v30, %v2505_v58 }
 0x1de   :  { %v1649_v20 = vmax.f32 %v1585_v11, 0.0  ;;  %v1516_v26 = vmul.f32 %v2519_v12, %v1243_v54 }
 0x1df   :  { %v1648_v24 = vmax.f32 %v1584_v19, 0.0  ;;  %v1515_v27 = vmul.f32 %v2519_v12, %v1238_v50  ;;  %v1923_v28 = vpop.f32.mrb[46].mxu1  ;;  %v907_v31 = vpop.f32.mrb[46].mxu0 }
 0x1e0   :  { %1713 = vst [vmem:[#allocation14 + $0x58] sm:$0xff] %v1649_v20  ;;  %v1587_v35 = vadd.f32 %v2523_v23, %v1516_v26  ;;  %v1253_v62 = vadd.f32 %v1923_v28, %v2517_v6  ;;  %v1247_v39 = vpop.f32.mrb[47].mxu1  ;;  %v909_v38 = vpop.f32.mrb[47].mxu0 }
 0x1e1   :  { %1712 = vst [vmem:[#allocation14 + $0x50] sm:$0xff] %v1648_v24  ;;  %v1586_v40 = vadd.f32 %v2523_v23, %v1515_v27  ;;  %v1248_v58 = vadd.f32 %v1247_v39, %v2513_v2 }
 0x1e2   :  { %v1651_v14 = vmax.f32 %v1587_v35, 0.0  ;;  %v1518_v43 = vmul.f32 %v2519_v12, %v1253_v62 }
 0x1e3   :  { %v1650_v34 = vmax.f32 %v1586_v40, 0.0  ;;  %v1517_v44 = vmul.f32 %v2519_v12, %v1248_v58  ;;  %v1926_v10 = vpop.f32.mrb[48].mxu1  ;;  %v2582_v47 = vpop.f32.mrb[48].mxu0 }
 0x1e4   :  { %1715 = vst [vmem:[#allocation14 + $0x68] sm:$0xff] %v1651_v14  ;;  %v1589_v48 = vadd.f32 %v2523_v23, %v1518_v43  ;;  %v1263_v6 = vadd.f32 %v1926_v10, %v2528_v32  ;;  %v1257_v51 = vpop.f32.mrb[49].mxu1  ;;  %v914_v22 = vpop.f32.mrb[49].mxu0 }
 0x1e5   :  { %1714 = vst [vmem:[#allocation14 + $0x60] sm:$0xff] %v1650_v34  ;;  %v1588_v46 = vadd.f32 %v2523_v23, %v1517_v44  ;;  %v1258_v2 = vadd.f32 %v1257_v51, %v2521_v15 }
 0x1e6   :  { %v1653_v56 = vmax.f32 %v1589_v48, 0.0  ;;  %v1520_v59 = vmul.f32 %v2519_v12, %v1263_v6 }
 0x1e7   :  { %v1652_v60 = vmax.f32 %v1588_v46, 0.0  ;;  %v1519_v42 = vmul.f32 %v2519_v12, %v1258_v2  ;;  %v1929_v18 = vpop.f32.mrb[50].mxu1  ;;  %v917_v63 = vpop.f32.mrb[50].mxu0 }
 0x1e8   :  { %1717 = vst [vmem:[#allocation14 + $0x78] sm:$0xff] %v1653_v56  ;;  %v1591_v1 = vadd.f32 %v2523_v23, %v1520_v59  ;;  %v1273_v32 = vadd.f32 %v1929_v18, %v2544_v8  ;;  %v1267_v3 = vpop.f32.mrb[51].mxu1  ;;  %v919_v4 = vpop.f32.mrb[51].mxu0 }
 0x1e9   :  { %1716 = vst [vmem:[#allocation14 + $0x70] sm:$0xff] %v1652_v60  ;;  %v1590_v11 = vadd.f32 %v2523_v23, %v1519_v42  ;;  %v1268_v15 = vadd.f32 %v1267_v3, %v2536_v52 }
 0x1ea   :  { %v1655_v54 = vmax.f32 %v1591_v1, 0.0  ;;  %v1522_v30 = vmul.f32 %v2519_v12, %v1273_v32 }
 0x1eb   :  { %v1654_v16 = vmax.f32 %v1590_v11, 0.0  ;;  %v1521_v19 = vmul.f32 %v2519_v12, %v1268_v15  ;;  %v1932_v50 = vpop.f32.mrb[52].mxu1  ;;  %v922_v20 = vpop.f32.mrb[52].mxu0 }
 0x1ec   :  { %1719 = vst [vmem:[#allocation14 + $0x88] sm:$0xff] %v1655_v54  ;;  %v1593_v26 = vadd.f32 %v2523_v23, %v1522_v30  ;;  %v1283_v8 = vadd.f32 %v1932_v50, %v2560_v55  ;;  %v1277_v24 = vpop.f32.mrb[53].mxu1  ;;  %v924_v27 = vpop.f32.mrb[53].mxu0 }
 0x1ed   :  { %1718 = vst [vmem:[#allocation14 + $0x80] sm:$0xff] %v1654_v16  ;;  %v1592_v28 = vadd.f32 %v2523_v23, %v1521_v19  ;;  %v1278_v52 = vadd.f32 %v1277_v24, %v2552_v36 }
 0x1ee   :  { %v1657_v35 = vmax.f32 %v1593_v26, 0.0  ;;  %v1524_v62 = vmul.f32 %v2519_v12, %v1283_v8 }
 0x1ef   :  { %v1656_v39 = vmax.f32 %v1592_v28, 0.0  ;;  %v1523_v38 = vmul.f32 %v2519_v12, %v1278_v52  ;;  %v1935_v40 = vpop.f32.mrb[54].mxu1  ;;  %v927_v58 = vpop.f32.mrb[54].mxu0 }
 0x1f0   :  { %1721 = vst [vmem:[#allocation14 + $0x98] sm:$0xff] %v1657_v35  ;;  %v1595_v14 = vadd.f32 %v2523_v23, %v1524_v62  ;;  %v1293_v43 = vadd.f32 %v1935_v40, %v907_v31  ;;  %v1287_v55 = vpop.f32.mrb[55].mxu1  ;;  %v929_v34 = vpop.f32.mrb[55].mxu0 }
 0x1f1   :  { %1720 = vst [vmem:[#allocation14 + $0x90] sm:$0xff] %v1656_v39  ;;  %v1594_v44 = vadd.f32 %v2523_v23, %v1523_v38  ;;  %v1288_v10 = vadd.f32 %v1287_v55, %v2568_v7 }
 0x1f2   :  { %v1659_v36 = vmax.f32 %v1595_v14, 0.0  ;;  %v1526_v48 = vmul.f32 %v2519_v12, %v1293_v43 }
 0x1f3   :  { %v1658_v6 = vmax.f32 %v1594_v44, 0.0  ;;  %v1525_v51 = vmul.f32 %v2519_v12, %v1288_v10  ;;  %v1938_v22 = vpop.f32.mrb[56].mxu1  ;;  %v932_v46 = vpop.f32.mrb[56].mxu0 }
 0x1f4   :  { %1723 = vst [vmem:[#allocation14 + $0xa8] sm:$0xff] %v1659_v36  ;;  %v1597_v2 = vadd.f32 %v2523_v23, %v1526_v48  ;;  %v1303_v56 = vadd.f32 %v1938_v22, %v917_v63  ;;  %v1297_v31 = vpop.f32.mrb[57].mxu1  ;;  %v934_v59 = vpop.f32.mrb[57].mxu0 }
 0x1f5   :  { %1722 = vst [vmem:[#allocation14 + $0xa0] sm:$0xff] %v1658_v6  ;;  %v1596_v60 = vadd.f32 %v2523_v23, %v1525_v51  ;;  %v1298_v42 = vadd.f32 %v1297_v31, %v2582_v47 }
 0x1f6   :  { %v1661_v7 = vmax.f32 %v1597_v2, 0.0  ;;  %v1528_v18 = vmul.f32 %v2519_v12, %v1303_v56 }
 0x1f7   :  { %v1660_v1 = vmax.f32 %v1596_v60, 0.0  ;;  %v1527_v32 = vmul.f32 %v2519_v12, %v1298_v42  ;;  %v1941_v3 = vpop.f32.mrb[58].mxu1  ;;  %v937_v4 = vpop.f32.mrb[58].mxu0 }
 0x1f8   :  { %1725 = vst [vmem:[#allocation14 + $0xb8] sm:$0xff] %v1661_v7  ;;  %v1599_v11 = vadd.f32 %v2523_v23, %v1528_v18  ;;  %v1313_v15 = vadd.f32 %v1941_v3, %v927_v58  ;;  %v1307_v63 = vpop.f32.mrb[59].mxu1  ;;  %v939_v54 = vpop.f32.mrb[59].mxu0 }
 0x1f9   :  { %1724 = vst [vmem:[#allocation14 + $0xb0] sm:$0xff] %v1660_v1  ;;  %v1598_v30 = vadd.f32 %v2523_v23, %v1527_v32  ;;  %v1308_v16 = vadd.f32 %v1307_v63, %v922_v20 }
 0x1fa   :  { %v1663_v19 = vmax.f32 %v1599_v11, 0.0  ;;  %v1530_v47 = vmul.f32 %v2519_v12, %v1313_v15 }
 0x1fb   :  { %v1662_v50 = vmax.f32 %v1598_v30, 0.0  ;;  %v1529_v26 = vmul.f32 %v2519_v12, %v1308_v16  ;;  %v1944_v8 = vpop.f32.mrb[60].mxu1  ;;  %v942_v24 = vpop.f32.mrb[60].mxu0 }
 0x1fc   :  { %1727 = vst [vmem:[#allocation14 + $0xc8] sm:$0xff] %v1663_v19  ;;  %v1601_v27 = vadd.f32 %v2523_v23, %v1530_v47  ;;  %v1323_v28 = vadd.f32 %v1944_v8, %v937_v4  ;;  %v1317_v52 = vpop.f32.mrb[61].mxu1  ;;  %v944_v35 = vpop.f32.mrb[61].mxu0 }
 0x1fd   :  { %1726 = vst [vmem:[#allocation14 + $0xc0] sm:$0xff] %v1662_v50  ;;  %v1600_v62 = vadd.f32 %v2523_v23, %v1529_v26  ;;  %v1318_v39 = vadd.f32 %v1317_v52, %v932_v46 }
 0x1fe   :  { %v1665_v38 = vmax.f32 %v1601_v27, 0.0  ;;  %v1532_v20 = vmul.f32 %v2519_v12, %v1323_v28 }
 0x1ff   :  { %v1664_v40 = vmax.f32 %v1600_v62, 0.0  ;;  %v1531_v58 = vmul.f32 %v2519_v12, %v1318_v39  ;;  %v1947_v14 = vpop.f32.mrb[62].mxu1  ;;  %v947_v43 = vpop.f32.mrb[62].mxu0 }
 0x200   :  { %1729 = vst [vmem:[#allocation14 + $0xd8] sm:$0xff] %v1665_v38  ;;  %v1603_v55 = vadd.f32 %v2523_v23, %v1532_v20  ;;  %v1333_v34 = vadd.f32 %v1947_v14, %v947_v43  ;;  %v1327_v44 = vpop.f32.mrb[63].mxu1  ;;  %v949_v10 = vpop.f32.mrb[63].mxu0 }
 0x201   :  { %1728 = vst [vmem:[#allocation14 + $0xd0] sm:$0xff] %v1664_v40  ;;  %v1602_v36 = vadd.f32 %v2523_v23, %v1531_v58  ;;  %v1328_v48 = vadd.f32 %v1327_v44, %v942_v24 }
 0x202   :  { %v1667_v6 = vmax.f32 %v1603_v55, 0.0  ;;  %v1534_v51 = vmul.f32 %v2519_v12, %v1333_v34 }
 0x203   :  { %v1666_v22 = vmax.f32 %v1602_v36, 0.0  ;;  %v1533_v46 = vmul.f32 %v2519_v12, %v1328_v48  ;;  %v1950_v2 = vpop.f32.mrb[64].mxu1  ;;  %v952_v56 = vpop.f32.mrb[64].mxu0 }
 0x204   :  { %1731 = vst [vmem:[#allocation14 + $0xe8] sm:$0xff] %v1667_v6  ;;  %v1605_v31 = vadd.f32 %v2523_v23, %v1534_v51  ;;  %v1337_v59 = vpop.f32.mrb[65].mxu1  ;;  %v954_v60 = vpop.f32.mrb[65].mxu0 }
 0x205   :  { %1730 = vst [vmem:[#allocation14 + $0xe0] sm:$0xff] %v1666_v22  ;;  %v1604_v42 = vadd.f32 %v2523_v23, %v1533_v46  ;;  %v1338_v7 = vadd.f32 %v1337_v59, %v952_v56 }
 0x206   :  { %v1669_v18 = vmax.f32 %v1605_v31, 0.0 }
 0x207   :  { %v1668_v1 = vmax.f32 %v1604_v42, 0.0  ;;  %v1535_v32 = vmul.f32 %v2519_v12, %v1338_v7  ;;  %v957_v3 = vpop.f32.mrb[66].mxu0  ;;  %v1953_v4 = vpop.f32.mrb[66].mxu1 }
 0x208   :  { %1733 = vst [vmem:[#allocation14 + $0xf8] sm:$0xff] %v1669_v18  ;;  %v1343_v11 = vadd.f32 %v1950_v2, %v957_v3  ;;  %v1347_v15 = vpop.f32.mrb[67].mxu1  ;;  %v959_v63 = vpop.f32.mrb[67].mxu0 }
 0x209   :  { %1732 = vst [vmem:[#allocation14 + $0xf0] sm:$0xff] %v1668_v1  ;;  %v1606_v54 = vadd.f32 %v2523_v23, %v1535_v32 }
 0x20a   :  { %v1536_v30 = vmul.f32 %v2519_v12, %v1343_v11 }
 0x20b   :  { %v1670_v16 = vmax.f32 %v1606_v54, 0.0  ;;  %v962_v19 = vpop.f32.mrb[68].mxu0  ;;  %v1956_v47 = vpop.f32.mrb[68].mxu1 }
 0x20c   :  { %v1607_v50 = vadd.f32 %v2523_v23, %v1536_v30  ;;  %v1348_v26 = vadd.f32 %v1347_v15, %v962_v19  ;;  %v1357_v8 = vpop.f32.mrb[69].mxu1  ;;  %v964_v24 = vpop.f32.mrb[69].mxu0 }
 0x20d   :  { %1734 = vst [vmem:[#allocation14 + $0x100] sm:$0xff] %v1670_v16 }
 0x20e   :  { %v1671_v27 = vmax.f32 %v1607_v50, 0.0  ;;  %v1537_v28 = vmul.f32 %v2519_v12, %v1348_v26 }
 0x20f   :  { %v967_v52 = vpop.f32.mrb[70].mxu0  ;;  %v1959_v35 = vpop.f32.mrb[70].mxu1 }
 0x210   :  { %1735 = vst [vmem:[#allocation14 + $0x108] sm:$0xff] %v1671_v27  ;;  %v1608_v62 = vadd.f32 %v2523_v23, %v1537_v28  ;;  %v1353_v39 = vadd.f32 %v1953_v4, %v967_v52  ;;  %v1367_v38 = vpop.f32.mrb[71].mxu1  ;;  %v969_v20 = vpop.f32.mrb[71].mxu0 }
 0x212   :  { %v1672_v40 = vmax.f32 %v1608_v62, 0.0  ;;  %v1538_v58 = vmul.f32 %v2519_v12, %v1353_v39 }
 0x213   :  { %v972_v14 = vpop.f32.mrb[72].mxu0  ;;  %v1962_v43 = vpop.f32.mrb[72].mxu1 }
 0x214   :  { %1736 = vst [vmem:[#allocation14 + $0x110] sm:$0xff] %v1672_v40  ;;  %v1609_v55 = vadd.f32 %v2523_v23, %v1538_v58  ;;  %v1358_v34 = vadd.f32 %v1357_v8, %v972_v14  ;;  %v1377_v44 = vpop.f32.mrb[73].mxu1  ;;  %v974_v10 = vpop.f32.mrb[73].mxu0 }
 0x216   :  { %v1673_v36 = vmax.f32 %v1609_v55, 0.0  ;;  %v1539_v48 = vmul.f32 %v2519_v12, %v1358_v34 }
 0x217   :  { %v977_v6 = vpop.f32.mrb[74].mxu0  ;;  %v2635_v51 = vpop.f32.mrb[74].mxu1 }
 0x218   :  { %1737 = vst [vmem:[#allocation14 + $0x118] sm:$0xff] %v1673_v36  ;;  %v1610_v22 = vadd.f32 %v2523_v23, %v1539_v48  ;;  %v1363_v46 = vadd.f32 %v1956_v47, %v977_v6  ;;  %v1387_v2 = vpop.f32.mrb[75].mxu1  ;;  %v979_v56 = vpop.f32.mrb[75].mxu0 }
 0x21a   :  { %v1674_v31 = vmax.f32 %v1610_v22, 0.0  ;;  %v1540_v59 = vmul.f32 %v2519_v12, %v1363_v46 }
 0x21b   :  { %v982_v60 = vpop.f32.mrb[76].mxu0  ;;  %v2639_v42 = vpop.f32.mrb[76].mxu1 }
 0x21c   :  { %1738 = vst [vmem:[#allocation14 + $0x120] sm:$0xff] %v1674_v31  ;;  %v1611_v7 = vadd.f32 %v2523_v23, %v1540_v59  ;;  %v1368_v18 = vadd.f32 %v1367_v38, %v982_v60  ;;  %v2642_v1 = vpop.f32.mrb[77].mxu1  ;;  %v984_v32 = vpop.f32.mrb[77].mxu0 }
 0x21e   :  { %v1675_v3 = vmax.f32 %v1611_v7, 0.0  ;;  %v1541_v4 = vmul.f32 %v2519_v12, %v1368_v18 }
 0x21f   :  { %v987_v11 = vpop.f32.mrb[78].mxu0  ;;  %v2645_v15 = vpop.f32.mrb[78].mxu1 }
 0x220   :  { %1739 = vst [vmem:[#allocation14 + $0x128] sm:$0xff] %v1675_v3  ;;  %v1612_v63 = vadd.f32 %v2523_v23, %v1541_v4  ;;  %v1373_v54 = vadd.f32 %v1959_v35, %v987_v11  ;;  %v2648_v30 = vpop.f32.mrb[79].mxu1  ;;  %v989_v16 = vpop.f32.mrb[79].mxu0 }
 0x222   :  { %v1676_v19 = vmax.f32 %v1612_v63, 0.0  ;;  %v1542_v47 = vmul.f32 %v2519_v12, %v1373_v54 }
 0x223   :  { %v992_v50 = vpop.f32.mrb[80].mxu0  ;;  %v1974_v26 = vpop.f32.mrb[80].mxu1 }
 0x224   :  { %1740 = vst [vmem:[#allocation14 + $0x130] sm:$0xff] %v1676_v19  ;;  %v1613_v8 = vadd.f32 %v2523_v23, %v1542_v47  ;;  %v1378_v24 = vadd.f32 %v1377_v44, %v992_v50  ;;  %v1423_v27 = vadd.f32 %v1974_v26, %v2461_v13  ;;  %v1417_v28 = vpop.f32.mrb[81].mxu1  ;;  %v994_v52 = vpop.f32.mrb[81].mxu0 }
 0x225   :  { %v1418_v62 = vadd.f32 %v1417_v28, %v2457_v9 }
 0x226   :  { %v1677_v39 = vmax.f32 %v1613_v8, 0.0  ;;  %v1543_v35 = vmul.f32 %v2519_v12, %v1378_v24  ;;  %v1552_v38 = vmul.f32 %v2519_v12, %v1423_v27 }
 0x227   :  { %v1551_v20 = vmul.f32 %v2519_v12, %v1418_v62  ;;  %v997_v40 = vpop.f32.mrb[82].mxu0  ;;  %v1977_v58 = vpop.f32.mrb[82].mxu1 }
 0x228   :  { %1741 = vst [vmem:[#allocation14 + $0x138] sm:$0xff] %v1677_v39  ;;  %v1614_v14 = vadd.f32 %v2523_v23, %v1543_v35  ;;  %v1623_v55 = vadd.f32 %v2523_v23, %v1552_v38  ;;  %v1383_v34 = vadd.f32 %v1962_v43, %v997_v40  ;;  %v1433_v13 = vadd.f32 %v1977_v58, %v2467_v21  ;;  %v1427_v44 = vpop.f32.mrb[83].mxu1  ;;  %v999_v10 = vpop.f32.mrb[83].mxu0 }
 0x229   :  { %v1622_v9 = vadd.f32 %v2523_v23, %v1551_v20  ;;  %v1428_v36 = vadd.f32 %v1427_v44, %v2463_v17 }
 0x22a   :  { %v1678_v48 = vmax.f32 %v1614_v14, 0.0  ;;  %v1687_v6 = vmax.f32 %v1623_v55, 0.0  ;;  %v1544_v22 = vmul.f32 %v2519_v12, %v1383_v34  ;;  %v1554_v46 = vmul.f32 %v2519_v12, %v1433_v13 }
 0x22b   :  { %v1686_v56 = vmax.f32 %v1622_v9, 0.0  ;;  %v1553_v31 = vmul.f32 %v2519_v12, %v1428_v36  ;;  %v1002_v59 = vpop.f32.mrb[84].mxu0  ;;  %v1980_v60 = vpop.f32.mrb[84].mxu1 }
 0x22c   :  { %1742 = vst [vmem:[#allocation14 + $0x140] sm:$0xff] %v1678_v48  ;;  %1751 = vst [vmem:[#allocation14 + $0x188] sm:$0xff] %v1687_v6  ;;  %v1615_v21 = vadd.f32 %v2523_v23, %v1544_v22  ;;  %v1625_v43 = vadd.f32 %v2523_v23, %v1554_v46  ;;  %v1388_v7 = vadd.f32 %v1387_v2, %v1002_v59  ;;  %v1437_v18 = vpop.f32.mrb[85].mxu1  ;;  %v1004_v32 = vpop.f32.mrb[85].mxu0 }
 0x22d   :  { %v1443_v17 = vadd.f32 %v1980_v60, %v2475_v29  ;;  %1750 = vst [vmem:[#allocation14 + $0x180] sm:$0xff] %v1686_v56  ;;  %v1624_v3 = vadd.f32 %v2523_v23, %v1553_v31  ;;  %v1438_v4 = vadd.f32 %v1437_v18, %v2471_v25 }
 0x22e   :  { %v1679_v11 = vmax.f32 %v1615_v21, 0.0  ;;  %v1689_v63 = vmax.f32 %v1625_v43, 0.0  ;;  %v1545_v54 = vmul.f32 %v2519_v12, %v1388_v7 }
 0x22f   :  { %v1556_v16 = vmul.f32 %v2519_v12, %v1443_v17  ;;  %v1688_v19 = vmax.f32 %v1624_v3, 0.0  ;;  %v1555_v47 = vmul.f32 %v2519_v12, %v1438_v4  ;;  %v1007_v50 = vpop.f32.mrb[86].mxu0  ;;  %v1983_v2 = vpop.f32.mrb[86].mxu1 }
 0x230   :  { %1743 = vst [vmem:[#allocation14 + $0x148] sm:$0xff] %v1679_v11  ;;  %1753 = vst [vmem:[#allocation14 + $0x198] sm:$0xff] %v1689_v63  ;;  %v1616_v29 = vadd.f32 %v2523_v23, %v1545_v54  ;;  %v1393_v8 = vadd.f32 %v2635_v51, %v1007_v50  ;;  %v1453_v25 = vadd.f32 %v1983_v2, %v2483_v37  ;;  %v1447_v24 = vpop.f32.mrb[87].mxu1  ;;  %v1009_v27 = vpop.f32.mrb[87].mxu0 }
 0x231   :  { %v1627_v26 = vadd.f32 %v2523_v23, %v1556_v16  ;;  %1752 = vst [vmem:[#allocation14 + $0x190] sm:$0xff] %v1688_v19  ;;  %v1626_v28 = vadd.f32 %v2523_v23, %v1555_v47  ;;  %v1448_v52 = vadd.f32 %v1447_v24, %v2479_v33 }
 0x232   :  { %v1680_v62 = vmax.f32 %v1616_v29, 0.0  ;;  %v1546_v35 = vmul.f32 %v2519_v12, %v1393_v8  ;;  %v1558_v38 = vmul.f32 %v2519_v12, %v1453_v25 }
 0x233   :  { %v1691_v39 = vmax.f32 %v1627_v26, 0.0  ;;  %v1690_v20 = vmax.f32 %v1626_v28, 0.0  ;;  %v1557_v40 = vmul.f32 %v2519_v12, %v1448_v52  ;;  %v1012_v58 = vpop.f32.mrb[88].mxu0  ;;  %v1986_v51 = vpop.f32.mrb[88].mxu1 }
 0x234   :  { %1744 = vst [vmem:[#allocation14 + $0x150] sm:$0xff] %v1680_v62  ;;  %v1617_v37 = vadd.f32 %v2523_v23, %v1546_v35  ;;  %v1629_v14 = vadd.f32 %v2523_v23, %v1558_v38  ;;  %v1398_v55 = vadd.f32 %v2642_v1, %v1012_v58  ;;  %v1463_v33 = vadd.f32 %v1986_v51, %v2491_v45  ;;  %v1457_v34 = vpop.f32.mrb[89].mxu1  ;;  %v1014_v13 = vpop.f32.mrb[89].mxu0 }
 0x235   :  { %1755 = vst [vmem:[#allocation14 + $0x1a8] sm:$0xff] %v1691_v39  ;;  %1754 = vst [vmem:[#allocation14 + $0x1a0] sm:$0xff] %v1690_v20  ;;  %v1628_v44 = vadd.f32 %v2523_v23, %v1557_v40  ;;  %v1458_v10 = vadd.f32 %v1457_v34, %v2487_v41 }
 0x236   :  { %v1681_v9 = vmax.f32 %v1617_v37, 0.0  ;;  %v1693_v36 = vmax.f32 %v1629_v14, 0.0  ;;  %v1547_v48 = vmul.f32 %v2519_v12, %v1398_v55  ;;  %v1560_v6 = vmul.f32 %v2519_v12, %v1463_v33 }
 0x237   :  { %v1692_v22 = vmax.f32 %v1628_v44, 0.0  ;;  %v1559_v46 = vmul.f32 %v2519_v12, %v1458_v10  ;;  %v1017_v56 = vpop.f32.mrb[90].mxu0  ;;  %v1989_v1 = vpop.f32.mrb[90].mxu1 }
 0x238   :  { %1745 = vst [vmem:[#allocation14 + $0x158] sm:$0xff] %v1681_v9  ;;  %1757 = vst [vmem:[#allocation14 + $0x1b8] sm:$0xff] %v1693_v36  ;;  %v1618_v45 = vadd.f32 %v2523_v23, %v1547_v48  ;;  %v1631_v31 = vadd.f32 %v2523_v23, %v1560_v6  ;;  %v1403_v59 = vadd.f32 %v2639_v42, %v1017_v56  ;;  %v1467_v60 = vpop.f32.mrb[91].mxu1  ;;  %v1019_v21 = vpop.f32.mrb[91].mxu0 }
 0x239   :  { %v1473_v41 = vadd.f32 %v1989_v1, %v2499_v53  ;;  %1756 = vst [vmem:[#allocation14 + $0x1b0] sm:$0xff] %v1692_v22  ;;  %v1630_v43 = vadd.f32 %v2523_v23, %v1559_v46  ;;  %v1468_v7 = vadd.f32 %v1467_v60, %v2495_v49 }
 0x23a   :  { %v1682_v17 = vmax.f32 %v1618_v45, 0.0  ;;  %v1695_v18 = vmax.f32 %v1631_v31, 0.0  ;;  %v1548_v32 = vmul.f32 %v2519_v12, %v1403_v59 }
 0x23b   :  { %v1562_v3 = vmul.f32 %v2519_v12, %v1473_v41  ;;  %v1694_v4 = vmax.f32 %v1630_v43, 0.0  ;;  %v1561_v11 = vmul.f32 %v2519_v12, %v1468_v7  ;;  %v1022_v63 = vpop.f32.mrb[92].mxu0  ;;  %v1992_v42 = vpop.f32.mrb[92].mxu1 }
 0x23c   :  { %1746 = vst [vmem:[#allocation14 + $0x160] sm:$0xff] %v1682_v17  ;;  %1759 = vst [vmem:[#allocation14 + $0x1c8] sm:$0xff] %v1695_v18  ;;  %v1619_v53 = vadd.f32 %v2523_v23, %v1548_v32  ;;  %v1408_v16 = vadd.f32 %v2648_v30, %v1022_v63  ;;  %v1483_v49 = vadd.f32 %v1992_v42, %v2507_v61  ;;  %v1477_v19 = vpop.f32.mrb[93].mxu1  ;;  %v1024_v47 = vpop.f32.mrb[93].mxu0 }
 0x23d   :  { %v1633_v54 = vadd.f32 %v2523_v23, %v1562_v3  ;;  %1758 = vst [vmem:[#allocation14 + $0x1c0] sm:$0xff] %v1694_v4  ;;  %v1632_v50 = vadd.f32 %v2523_v23, %v1561_v11  ;;  %v1478_v2 = vadd.f32 %v1477_v19, %v2503_v57 }
 0x23e   :  { %v1683_v29 = vmax.f32 %v1619_v53, 0.0  ;;  %v1549_v8 = vmul.f32 %v2519_v12, %v1408_v16  ;;  %v1564_v25 = vmul.f32 %v2519_v12, %v1483_v49 }
 0x23f   :  { %v1697_v26 = vmax.f32 %v1633_v54, 0.0  ;;  %v1696_v24 = vmax.f32 %v1632_v50, 0.0  ;;  %v1563_v27 = vmul.f32 %v2519_v12, %v1478_v2  ;;  %v1027_v28 = vpop.f32.mrb[94].mxu0  ;;  %v1995_v30 = vpop.f32.mrb[94].mxu1 }
 0x240   :  { %1747 = vst [vmem:[#allocation14 + $0x168] sm:$0xff] %v1683_v29  ;;  %v1620_v61 = vadd.f32 %v2523_v23, %v1549_v8  ;;  %v1635_v52 = vadd.f32 %v2523_v23, %v1564_v25  ;;  %v1413_v62 = vadd.f32 %v2645_v15, %v1027_v28  ;;  %v1493_v57 = vadd.f32 %v1995_v30, %v2515_v5  ;;  %v1487_v39 = vpop.f32.mrb[95].mxu1  ;;  %v1029_v35 = vpop.f32.mrb[95].mxu0 }
 0x241   :  { %1761 = vst [vmem:[#allocation14 + $0x1d8] sm:$0xff] %v1697_v26  ;;  %1760 = vst [vmem:[#allocation14 + $0x1d0] sm:$0xff] %v1696_v24  ;;  %v1634_v38 = vadd.f32 %v2523_v23, %v1563_v27  ;;  %v1488_v20 = vadd.f32 %v1487_v39, %v2511_v0 }
 0x242   :  { %v1684_v40 = vmax.f32 %v1620_v61, 0.0  ;;  %v1699_v58 = vmax.f32 %v1635_v52, 0.0  ;;  %v1550_v51 = vmul.f32 %v2519_v12, %v1413_v62  ;;  %v1566_v37 = vmul.f32 %v2519_v12, %v1493_v57 }
 0x243   :  { %v1698_v14 = vmax.f32 %v1634_v38, 0.0  ;;  %v1565_v55 = vmul.f32 %v2519_v12, %v1488_v20 }
 0x244   :  { %1748 = vst [vmem:[#allocation14 + $0x170] sm:$0xff] %v1684_v40  ;;  %1763 = vst [vmem:[#allocation14 + $0x1e8] sm:$0xff] %v1699_v58  ;;  %v1621_v5 = vadd.f32 %v2523_v23, %v1550_v51  ;;  %v1637_v15 = vadd.f32 %v2523_v23, %v1566_v37 }
 0x245   :  { %1762 = vst [vmem:[#allocation14 + $0x1e0] sm:$0xff] %v1698_v14  ;;  %v1636_v0 = vadd.f32 %v2523_v23, %v1565_v55 }
 0x246   :  { %v1685_v33 = vmax.f32 %v1621_v5, 0.0  ;;  %v1701_v34 = vmax.f32 %v1637_v15, 0.0 }
 0x247   :  { %v1700_v13 = vmax.f32 %v1636_v0, 0.0 }
 0x248   :  { %1749 = vst [vmem:[#allocation14 + $0x178] sm:$0xff] %v1685_v33  ;;  %1765 = vst [vmem:[#allocation14 + $0x1f8] sm:$0xff] %v1701_v34 }
 0x249   :  { %1764 = vst [vmem:[#allocation14 + $0x1f0] sm:$0xff] %v1700_v13 }
 0x24a   :  { %2261 = shalt.err (!%p2258_p10)
}
 0x24b   :  { %s2262_s25 = scalar_lea.hbm %s2742_s6, 8192 }
 0x24c   :  { %p2263_p11 = scmp.ne.s32.totalorder %s2742_s6, %s2262_s25  ;;  %p2266_p12 = scmp.lt.u32.totalorder %s2262_s25, %s2742_s6 }
 0x24e   :  { %p2268_p13 = pnand %p2266_p12, %p2263_p11 }
 0x250   :  { %2271 = shalt.err (!%p2268_p13)
}
 0x251   :  { %1777 = dma.vmem_to_hbm [thread:$0]  %s1772_s1, 8192, %s2742_s6, [#allocation5], %s2284_s9, %s2284_s9, %s2285_s10  }
 0x252   :  { %2280 = dma.done.wait [#allocation5], 8192  }
 0x253   :  { %2281 = vsyncadd [#allocation5], 4294959104 }
 0x254   :  { %1781 = vsyncpa [#allocation4], 1 }
 0x255   :  { %1782 = vsyncpa [#allocation7], 1 }
 0x256   :  { %1783 = vsyncpa [#allocation10], 1 }
 0x257   :  { %1784 = vsyncpa [#allocation13], 1 }
 0x258   :  { %1785 = vsyncpa [#allocation5], 1 }

</bundles_post_ra>
